<compile_context>
chip_gen: v7x
topology: tpu7x:2x2x1
jax: 0.10.0
libtpu: 0.0.40
codegen_flags: <defaults>
</compile_context>

<pallas_src>
import functools

import jax
import jax.numpy as jnp
from jax import lax
from jax.experimental import pallas as pl
from jax.experimental.pallas import tpu as pltpu


_STD = (((1,), (0,)), ((), ()))       # plain  A @ B
_TRANS_B = (((1,), (1,)), ((), ()))   # A @ B^T (contract last dims of both)


def _sanet_kernel(content_ref, cmean_ref, cinv_ref, g_ref, h_ref,
                  wf_ref, bf_ref, wo_ref, bo_ref, out_ref,
                  *, ns_valid, ns_total, exp_bf16):
    content = content_ref[0]                                        # (TQ, C) f32
    cn = ((content - cmean_ref[0]) * cinv_ref[0]).astype(jnp.bfloat16)
    f = (jnp.dot(cn, wf_ref[...], preferred_element_type=jnp.float32)
         + bf_ref[...]).astype(jnp.bfloat16)                        # (TQ, C)

    # S = F @ G^T -> (TQ, Ns); both operands positions-major, no transposes.
    s = lax.dot_general(f, g_ref[0], _TRANS_B,
                        preferred_element_type=jnp.float32)
    if ns_total > ns_valid:  # static: mask padded style positions
        lane = lax.broadcasted_iota(jnp.int32, s.shape, 1)
        s = jnp.where(lane < ns_valid, s, -1e30)

    # softmax over style positions.  The normalization is deferred until after
    # the A@H matmul so the per-element scaling is TQ*C instead of TQ*Ns.
    s = s - jnp.max(s, axis=-1, keepdims=True)
    if exp_bf16:  # bf16 EUP on v6e/v7x halves exp pushes; safe after max-sub
        e_mm = jnp.exp(s.astype(jnp.bfloat16))                      # (TQ, Ns)
        denom = jnp.sum(e_mm.astype(jnp.float32), axis=-1, keepdims=True)
    else:
        e = jnp.exp(s)
        denom = jnp.sum(e, axis=-1, keepdims=True)
        e_mm = e.astype(jnp.bfloat16)

    # O^T = A @ H^T with unnormalized weights, then one (TQ, C) scale.
    o = lax.dot_general(e_mm, h_ref[0], _STD,
                        preferred_element_type=jnp.float32)          # (TQ, C)
    o = o * pl.reciprocal(denom, approx=True)

    out = (jnp.dot(o.astype(jnp.bfloat16), wo_ref[...],
                   preferred_element_type=jnp.float32) + bo_ref[...])
    out_ref[0] = (out + content).astype(out_ref.dtype)


def _round_up(x, m):
    return (x + m - 1) // m * m


def _pad_last2(x, rows, cols):
    pr, pc = rows - x.shape[-2], cols - x.shape[-1]
    if pr == 0 and pc == 0:
        return x
    cfg = [(0, 0)] * (x.ndim - 2) + [(0, pr), (0, pc)]
    return jnp.pad(x, cfg)


def _tpu_generation():
    """Best-effort TPU generation (5 for v5e, 6 for v6e, 7 for v7x, ...)."""
    try:
        kind = jax.devices()[0].device_kind.lower()
    except Exception:
        return 6
    for gen in (7, 6, 5, 4, 3, 2):
        if f"v{gen}" in kind:
            return gen
    return 6


def _vmem_capacity_bytes(gen):
    try:
        return int(pltpu.get_tpu_info().vmem_capacity_bytes)
    except Exception:
        return (64 << 20) if gen >= 7 else (128 << 20)


def _vmem_limit_bytes(c, tq, ns, gen):
    est = (4 * tq * c * 4          # content + out blocks (double-buffered, f32)
           + 2 * ns * c * 2        # G + H bf16 (single-buffered, grid-invariant)
           + 2 * c * c * 2         # wf^T / wo^T bf16
           + 4 * tq * ns * 4       # score / exp / mask temporaries (f32)
           + 4 * tq * c * 4)       # F / O temporaries
    est = est * 2 + (4 << 20)      # slack + misc headroom
    cap = _vmem_capacity_bytes(gen) * 7 // 8   # ~112 MiB v5e/v6e, ~56 MiB v7x
    return int(min(max(est, 16 << 20), cap))


def sanet_forward(content, style, params, *, tq=None, eps=1e-5):
    """content: (B, C, Hc, Wc), style: (B, C, Hs, Ws), NCHW float32."""
    B, C, Hc, Wc = content.shape
    _, _, Hs, Ws = style.shape
    Nc, Ns = Hc * Wc, Hs * Ws
    # NOTE: unbiased variance (ddof=1, matching torch.var) needs Nc > 1, Ns > 1.

    gen = _tpu_generation()
    exp_bf16 = gen >= 6                       # no bf16 EUP on v5e and older
    if tq is None:
        tq = 256 if gen >= 6 else 128         # 256-wide MXU on v6e/v7x
    tq = min(tq, _round_up(Nc, 128))          # don't over-pad small images

    # positions-major layout: channels on lanes, spatial positions on sublanes.
    c_t = jnp.transpose(content.reshape(B, C, Nc), (0, 2, 1)).astype(jnp.float32)
    s_t = jnp.transpose(style.reshape(B, C, Ns), (0, 2, 1)).astype(jnp.float32)

    # exact per-channel stats on the unpadded features (wrapper side, so the
    # kernel can tile the content axis without full-Nc reductions per tile).
    c_mean = jnp.mean(c_t, axis=1, keepdims=True)
    c_inv = lax.rsqrt(jnp.var(c_t, axis=1, ddof=1, keepdims=True) + eps)
    s_mean = jnp.mean(s_t, axis=1, keepdims=True)
    s_inv = lax.rsqrt(jnp.var(s_t, axis=1, ddof=1, keepdims=True) + eps)

    wf, bf, wg, bg, wh, bh, wo, bo = params

    # G = g(mvn(style)), H = h(style): one-time XLA matmuls in the wrapper,
    # streamed into the kernel as bf16 positions-major slabs.
    sn = (s_t - s_mean) * s_inv
    g_full = jnp.einsum("bnc,oc->bno", sn, wg) + bg[None, None, :]
    h_full = jnp.einsum("bnc,oc->bno", s_t, wh) + bh[None, None, :]

    C_pad = _round_up(max(C, 1), 128)         # lane-dense blocks & MXU fill
    Nc_pad = _round_up(Nc, tq)
    Ns_pad = _round_up(Ns, 128)
    nq = Nc_pad // tq

    c_t = _pad_last2(c_t, Nc_pad, C_pad)
    c_mean = _pad_last2(c_mean, 1, C_pad)
    c_inv = _pad_last2(c_inv, 1, C_pad)
    g_pad = _pad_last2(g_full.astype(jnp.bfloat16), Ns_pad, C_pad)
    h_pad = _pad_last2(h_full.astype(jnp.bfloat16), Ns_pad, C_pad)

    # pre-transposed 1x1-conv weights -> plain (m,k)x(k,n) MXU contractions.
    wf_t = _pad_last2(wf.T.astype(jnp.bfloat16), C_pad, C_pad)
    wo_t = _pad_last2(wo.T.astype(jnp.bfloat16), C_pad, C_pad)
    bf_p = _pad_last2(bf.reshape(1, C).astype(jnp.float32), 1, C_pad)
    bo_p = _pad_last2(bo.reshape(1, C).astype(jnp.float32), 1, C_pad)

    kernel = functools.partial(_sanet_kernel, ns_valid=Ns, ns_total=Ns_pad,
                               exp_bf16=exp_bf16)
    vmem_limit = _vmem_limit_bytes(C_pad, tq, Ns_pad, gen)

    def run(single_buffer):
        if single_buffer:
            def inv_spec(shape, index_map):
                return pl.BlockSpec(shape, index_map,
                                    pipeline_mode=pl.Buffered(buffer_count=1))
        else:
            def inv_spec(shape, index_map):
                return pl.BlockSpec(shape, index_map)

        x_spec = pl.BlockSpec((1, tq, C_pad), lambda b, q: (b, q, 0))
        stat_spec = inv_spec((1, 1, C_pad), lambda b, q: (b, 0, 0))
        gh_spec = inv_spec((1, Ns_pad, C_pad), lambda b, q: (b, 0, 0))
        w_spec = inv_spec((C_pad, C_pad), lambda b, q: (0, 0))
        b_spec = inv_spec((1, C_pad), lambda b, q: (0, 0))

        return pl.pallas_call(
            kernel,
            out_shape=jax.ShapeDtypeStruct((B, Nc_pad, C_pad), jnp.float32),
            grid_spec=pltpu.PrefetchScalarGridSpec(
                num_scalar_prefetch=0,
                grid=(B, nq),
                in_specs=[
                    x_spec, stat_spec, stat_spec,   # content tile + its stats
                    gh_spec, gh_spec,               # precomputed G / H (bf16)
                    w_spec, b_spec,                 # f projection (pre-transposed)
                    w_spec, b_spec,                 # out_conv (pre-transposed)
                ],
                out_specs=x_spec,
            ),
            compiler_params=pltpu.CompilerParams(
                dimension_semantics=("parallel", "parallel"),
                vmem_limit_bytes=vmem_limit,
            ),
        )(c_t, c_mean, c_inv, g_pad, h_pad, wf_t, bf_p, wo_t, bo_p)

    try:
        out = run(single_buffer=True)
    except Exception:
        # Fallback for jax builds without BlockSpec.pipeline_mode / pl.Buffered.
        out = run(single_buffer=False)

    out = out[:, :Nc, :C]
    return jnp.transpose(out, (0, 2, 1)).reshape(B, C, Hc, Wc)


def init_params(key, in_planes):
    """Deterministic 1x1-conv weights (C,C) and biases (C,) for f, g, h, out_conv."""
    ks = jax.random.split(key, 8)
    scale = 1.0 / jnp.sqrt(in_planes)
    def u(k, shape):
        return jax.random.uniform(k, shape, jnp.float32, -scale, scale)
    return (u(ks[0], (in_planes, in_planes)), u(ks[1], (in_planes,)),
            u(ks[2], (in_planes, in_planes)), u(ks[3], (in_planes,)),
            u(ks[4], (in_planes, in_planes)), u(ks[5], (in_planes,)),
            u(ks[6], (in_planes, in_planes)), u(ks[7], (in_planes,)))


def _reference(content, style, params, eps=1e-5):
    """Pure-jnp replica of the PyTorch SANet forward (f32)."""
    B, C, Hc, Wc = content.shape
    Nc = Hc * Wc
    Ns = style.shape[2] * style.shape[3]
    c = content.reshape(B, C, Nc).astype(jnp.float32)
    s = style.reshape(B, C, Ns).astype(jnp.float32)
    wf, bf, wg, bg, wh, bh, wo, bo = params

    def mvn(x):
        m = jnp.mean(x, axis=2, keepdims=True)
        v = jnp.var(x, axis=2, ddof=1, keepdims=True)
        return (x - m) / jnp.sqrt(v + eps)

    F = jnp.einsum("oc,bcn->bon", wf, mvn(c)) + bf[None, :, None]
    G = jnp.einsum("oc,bcn->bon", wg, mvn(s)) + bg[None, :, None]
    H = jnp.einsum("oc,bcn->bon", wh, s) + bh[None, :, None]
    A = jax.nn.softmax(jnp.einsum("bcq,bck->bqk", F, G), axis=-1)
    O = jnp.einsum("bck,bqk->bcq", H, A)
    out = jnp.einsum("oc,bcq->boq", wo, O) + bo[None, :, None] + c
    return out.reshape(B, C, Hc, Wc)


if __name__ == "__main__":
    key = jax.random.PRNGKey(0)
    k_c, k_s, k_p = jax.random.split(key, 3)

    B, C, H, W = 2, 4, 16, 16
    content = jax.random.normal(k_c, (B, C, H, W), jnp.float32)
    style = jax.random.normal(k_s, (B, C, H, W), jnp.float32)
    params = init_params(k_p, C)

    out = sanet_forward(content, style, params)
    jax.block_until_ready(out)
    assert out.shape == (B, C, H, W)

    ref = _reference(content, style, params)
    max_err = float(jnp.max(jnp.abs(out - ref)))
    assert max_err < 0.15, f"max abs error too large: {max_err}"
    print("KERNEL_OK")
</pallas_src>

<mosaic_0001>
module attributes {stable_mosaic.version = 11 : i64} {
  func.func @_sanet_kernel(%arg0: i32, %arg1: i32, %arg2: memref<1x256x128xf32, #tpu.memory_space<vmem>>, %arg3: memref<1x1x128xf32, #tpu.memory_space<vmem>>, %arg4: memref<1x1x128xf32, #tpu.memory_space<vmem>>, %arg5: memref<1x256x128xbf16, #tpu.memory_space<vmem>>, %arg6: memref<1x256x128xbf16, #tpu.memory_space<vmem>>, %arg7: memref<128x128xbf16, #tpu.memory_space<vmem>>, %arg8: memref<1x128xf32, #tpu.memory_space<vmem>>, %arg9: memref<128x128xbf16, #tpu.memory_space<vmem>>, %arg10: memref<1x128xf32, #tpu.memory_space<vmem>>, %arg11: memref<1x256x128xf32, #tpu.memory_space<vmem>>) attributes {dimension_semantics = [#tpu.dimension_semantics<parallel>, #tpu.dimension_semantics<parallel>], iteration_bounds = array<i64: 2, 1>, scalar_prefetch = 0 : i64, scratch_operands = 0 : i64, tpu.core_type = #tpu.core_type<tc>, window_params = [{transform_indices = @transform_0, window_bounds = array<i64: 1, 256, 128>}, {pipeline_mode = #tpu.pipeline_mode<synchronous>, transform_indices = @transform_1, window_bounds = array<i64: 1, 1, 128>}, {pipeline_mode = #tpu.pipeline_mode<synchronous>, transform_indices = @transform_2, window_bounds = array<i64: 1, 1, 128>}, {pipeline_mode = #tpu.pipeline_mode<synchronous>, transform_indices = @transform_3, window_bounds = array<i64: 1, 256, 128>}, {pipeline_mode = #tpu.pipeline_mode<synchronous>, transform_indices = @transform_4, window_bounds = array<i64: 1, 256, 128>}, {pipeline_mode = #tpu.pipeline_mode<synchronous>, transform_indices = @transform_5, window_bounds = array<i64: 128, 128>}, {pipeline_mode = #tpu.pipeline_mode<synchronous>, transform_indices = @transform_6, window_bounds = array<i64: 1, 128>}, {pipeline_mode = #tpu.pipeline_mode<synchronous>, transform_indices = @transform_7, window_bounds = array<i64: 128, 128>}, {pipeline_mode = #tpu.pipeline_mode<synchronous>, transform_indices = @transform_8, window_bounds = array<i64: 1, 128>}, {transform_indices = @transform_9, window_bounds = array<i64: 1, 256, 128>}]} {
    %c0 = arith.constant 0 : index
    %c0_0 = arith.constant 0 : index
    %c0_1 = arith.constant 0 : index
    %0 = vector.load %arg2[%c0, %c0_0, %c0_1] : memref<1x256x128xf32, #tpu.memory_space<vmem>>, vector<1x256x128xf32>
    %1 = vector.shape_cast %0 : vector<1x256x128xf32> to vector<256x128xf32>
    %c0_2 = arith.constant 0 : index
    %c0_3 = arith.constant 0 : index
    %c0_4 = arith.constant 0 : index
    %2 = vector.load %arg3[%c0_2, %c0_3, %c0_4] : memref<1x1x128xf32, #tpu.memory_space<vmem>>, vector<1x1x128xf32>
    %3 = vector.shape_cast %2 : vector<1x1x128xf32> to vector<1x128xf32>
    %4 = vector.broadcast %3 : vector<1x128xf32> to vector<256x128xf32>
    %5 = arith.subf %1, %4 : vector<256x128xf32>
    %c0_5 = arith.constant 0 : index
    %c0_6 = arith.constant 0 : index
    %c0_7 = arith.constant 0 : index
    %6 = vector.load %arg4[%c0_5, %c0_6, %c0_7] : memref<1x1x128xf32, #tpu.memory_space<vmem>>, vector<1x1x128xf32>
    %7 = vector.shape_cast %6 : vector<1x1x128xf32> to vector<1x128xf32>
    %8 = vector.broadcast %7 : vector<1x128xf32> to vector<256x128xf32>
    %9 = arith.mulf %5, %8 : vector<256x128xf32>
    %10 = arith.truncf %9 : vector<256x128xf32> to vector<256x128xbf16>
    %c0_8 = arith.constant 0 : index
    %c0_9 = arith.constant 0 : index
    %11 = vector.load %arg7[%c0_8, %c0_9] : memref<128x128xbf16, #tpu.memory_space<vmem>>, vector<128x128xbf16>
    %cst = arith.constant dense<0.000000e+00> : vector<256x128xf32>
    %12 = tpu.matmul %10, %11, %cst {dimension_numbers = #tpu.dot_dimension_numbers<[1], [0], [0], [1], [0, 0, 1, 1], [], []>} : vector<256x128xbf16>, vector<128x128xbf16>, vector<256x128xf32> -> vector<256x128xf32>
    %c0_10 = arith.constant 0 : index
    %c0_11 = arith.constant 0 : index
    %13 = vector.load %arg8[%c0_10, %c0_11] : memref<1x128xf32, #tpu.memory_space<vmem>>, vector<1x128xf32>
    %14 = vector.broadcast %13 : vector<1x128xf32> to vector<256x128xf32>
    %15 = arith.addf %12, %14 : vector<256x128xf32>
    %16 = arith.truncf %15 : vector<256x128xf32> to vector<256x128xbf16>
    %c0_12 = arith.constant 0 : index
    %c0_13 = arith.constant 0 : index
    %c0_14 = arith.constant 0 : index
    %17 = vector.load %arg5[%c0_12, %c0_13, %c0_14] : memref<1x256x128xbf16, #tpu.memory_space<vmem>>, vector<1x256x128xbf16>
    %18 = vector.shape_cast %17 : vector<1x256x128xbf16> to vector<256x128xbf16>
    %cst_15 = arith.constant dense<0.000000e+00> : vector<256x256xf32>
    %19 = tpu.matmul %16, %18, %cst_15 {dimension_numbers = #tpu.dot_dimension_numbers<[1], [1], [0], [0], [0, 0, 1, 0], [], []>} : vector<256x128xbf16>, vector<256x128xbf16>, vector<256x256xf32> -> vector<256x256xf32>
    %cst_16 = arith.constant dense<0xFF800000> : vector<256xf32>
    %20 = vector.multi_reduction <maximumf>, %19, %cst_16 [1] : vector<256x256xf32> to vector<256xf32>
    %21 = vector.shape_cast %20 : vector<256xf32> to vector<256x1xf32>
    %22 = vector.broadcast %21 : vector<256x1xf32> to vector<256x256xf32>
    %23 = arith.subf %19, %22 : vector<256x256xf32>
    %24 = arith.truncf %23 : vector<256x256xf32> to vector<256x256xbf16>
    %25 = math.exp %24 : vector<256x256xbf16>
    %26 = arith.extf %25 : vector<256x256xbf16> to vector<256x256xf32>
    %cst_17 = arith.constant dense<0.000000e+00> : vector<256xf32>
    %27 = vector.multi_reduction <add>, %26, %cst_17 [1] : vector<256x256xf32> to vector<256xf32>
    %28 = vector.shape_cast %27 : vector<256xf32> to vector<256x1xf32>
    %c0_18 = arith.constant 0 : index
    %c0_19 = arith.constant 0 : index
    %c0_20 = arith.constant 0 : index
    %29 = vector.load %arg6[%c0_18, %c0_19, %c0_20] : memref<1x256x128xbf16, #tpu.memory_space<vmem>>, vector<1x256x128xbf16>
    %30 = vector.shape_cast %29 : vector<1x256x128xbf16> to vector<256x128xbf16>
    %cst_21 = arith.constant dense<0.000000e+00> : vector<256x128xf32>
    %31 = tpu.matmul %25, %30, %cst_21 {dimension_numbers = #tpu.dot_dimension_numbers<[1], [0], [0], [1], [0, 0, 1, 1], [], []>} : vector<256x256xbf16>, vector<256x128xbf16>, vector<256x128xf32> -> vector<256x128xf32>
    %32 = tpu.reciprocal %28 {approx = true} : vector<256x1xf32> -> vector<256x1xf32>
    %33 = vector.broadcast %32 : vector<256x1xf32> to vector<256x128xf32>
    %34 = arith.mulf %31, %33 : vector<256x128xf32>
    %35 = arith.truncf %34 : vector<256x128xf32> to vector<256x128xbf16>
    %c0_22 = arith.constant 0 : index
    %c0_23 = arith.constant 0 : index
    %36 = vector.load %arg9[%c0_22, %c0_23] : memref<128x128xbf16, #tpu.memory_space<vmem>>, vector<128x128xbf16>
    %cst_24 = arith.constant dense<0.000000e+00> : vector<256x128xf32>
    %37 = tpu.matmul %35, %36, %cst_24 {dimension_numbers = #tpu.dot_dimension_numbers<[1], [0], [0], [1], [0, 0, 1, 1], [], []>} : vector<256x128xbf16>, vector<128x128xbf16>, vector<256x128xf32> -> vector<256x128xf32>
    %c0_25 = arith.constant 0 : index
    %c0_26 = arith.constant 0 : index
    %38 = vector.load %arg10[%c0_25, %c0_26] : memref<1x128xf32, #tpu.memory_space<vmem>>, vector<1x128xf32>
    %39 = vector.broadcast %38 : vector<1x128xf32> to vector<256x128xf32>
    %40 = arith.addf %37, %39 : vector<256x128xf32>
    %41 = arith.addf %40, %1 : vector<256x128xf32>
    %c0_27 = arith.constant 0 : index
    %c0_28 = arith.constant 0 : index
    %c0_29 = arith.constant 0 : index
    %42 = vector.load %arg11[%c0_27, %c0_28, %c0_29] : memref<1x256x128xf32, #tpu.memory_space<vmem>>, vector<1x256x128xf32>
    %43 = vector.shape_cast %42 : vector<1x256x128xf32> to vector<256x128xf32>
    %44 = vector.shape_cast %41 : vector<256x128xf32> to vector<1x256x128xf32>
    tpu.vector_store %arg11[%c0_27, %c0_28, %c0_29], %44 {strides = array<i32>} : memref<1x256x128xf32, #tpu.memory_space<vmem>>, vector<1x256x128xf32>,
    return
  }
  func.func @transform_0(%arg0: i32, %arg1: i32) -> (i32, i32, i32) {
    %c0_i32 = arith.constant 0 : i32
    %c0_i32_0 = arith.constant 0 : i32
    return %arg0, %arg1, %c0_i32 : i32, i32, i32
  }
  func.func @transform_1(%arg0: i32, %arg1: i32) -> (i32, i32, i32) {
    %c0_i32 = arith.constant 0 : i32
    %c0_i32_0 = arith.constant 0 : i32
    %c0_i32_1 = arith.constant 0 : i32
    return %arg0, %c0_i32, %c0_i32_0 : i32, i32, i32
  }
  func.func @transform_2(%arg0: i32, %arg1: i32) -> (i32, i32, i32) {
    %c0_i32 = arith.constant 0 : i32
    %c0_i32_0 = arith.constant 0 : i32
    %c0_i32_1 = arith.constant 0 : i32
    return %arg0, %c0_i32, %c0_i32_0 : i32, i32, i32
  }
  func.func @transform_3(%arg0: i32, %arg1: i32) -> (i32, i32, i32) {
    %c0_i32 = arith.constant 0 : i32
    %c0_i32_0 = arith.constant 0 : i32
    %c0_i32_1 = arith.constant 0 : i32
    return %arg0, %c0_i32, %c0_i32_0 : i32, i32, i32
  }
  func.func @transform_4(%arg0: i32, %arg1: i32) -> (i32, i32, i32) {
    %c0_i32 = arith.constant 0 : i32
    %c0_i32_0 = arith.constant 0 : i32
    %c0_i32_1 = arith.constant 0 : i32
    return %arg0, %c0_i32, %c0_i32_0 : i32, i32, i32
  }
  func.func @transform_5(%arg0: i32, %arg1: i32) -> (i32, i32) {
    %c0_i32 = arith.constant 0 : i32
    %c0_i32_0 = arith.constant 0 : i32
    %c0_i32_1 = arith.constant 0 : i32
    return %c0_i32, %c0_i32_0 : i32, i32
  }
  func.func @transform_6(%arg0: i32, %arg1: i32) -> (i32, i32) {
    %c0_i32 = arith.constant 0 : i32
    %c0_i32_0 = arith.constant 0 : i32
    %c0_i32_1 = arith.constant 0 : i32
    return %c0_i32, %c0_i32_0 : i32, i32
  }
  func.func @transform_7(%arg0: i32, %arg1: i32) -> (i32, i32) {
    %c0_i32 = arith.constant 0 : i32
    %c0_i32_0 = arith.constant 0 : i32
    %c0_i32_1 = arith.constant 0 : i32
    return %c0_i32, %c0_i32_0 : i32, i32
  }
  func.func @transform_8(%arg0: i32, %arg1: i32) -> (i32, i32) {
    %c0_i32 = arith.constant 0 : i32
    %c0_i32_0 = arith.constant 0 : i32
    %c0_i32_1 = arith.constant 0 : i32
    return %c0_i32, %c0_i32_0 : i32, i32
  }
  func.func @transform_9(%arg0: i32, %arg1: i32) -> (i32, i32, i32) {
    %c0_i32 = arith.constant 0 : i32
    %c0_i32_0 = arith.constant 0 : i32
    return %arg0, %arg1, %c0_i32 : i32, i32, i32
  }
}

module attributes {stable_mosaic.version = 11 : i64} {
  func.func @_sanet_kernel(%arg0: i32, %arg1: i32, %arg2: memref<1x256x128xf32, #tpu.memory_space<vmem>>, %arg3: memref<1x1x128xf32, #tpu.memory_space<vmem>>, %arg4: memref<1x1x128xf32, #tpu.memory_space<vmem>>, %arg5: memref<1x256x128xbf16, #tpu.memory_space<vmem>>, %arg6: memref<1x256x128xbf16, #tpu.memory_space<vmem>>, %arg7: memref<128x128xbf16, #tpu.memory_space<vmem>>, %arg8: memref<1x128xf32, #tpu.memory_space<vmem>>, %arg9: memref<128x128xbf16, #tpu.memory_space<vmem>>, %arg10: memref<1x128xf32, #tpu.memory_space<vmem>>, %arg11: memref<1x256x128xf32, #tpu.memory_space<vmem>>) attributes {dimension_semantics = [#tpu.dimension_semantics<parallel>, #tpu.dimension_semantics<parallel>], iteration_bounds = array<i64: 2, 1>, scalar_prefetch = 0 : i64, scratch_operands = 0 : i64, tpu.core_type = #tpu.core_type<tc>, window_params = [{transform_indices = @transform_0, window_bounds = array<i64: 1, 256, 128>}, {transform_indices = @transform_1, window_bounds = array<i64: 1, 1, 128>}, {transform_indices = @transform_2, window_bounds = array<i64: 1, 1, 128>}, {transform_indices = @transform_3, window_bounds = array<i64: 1, 256, 128>}, {transform_indices = @transform_4, window_bounds = array<i64: 1, 256, 128>}, {pipeline_mode = #tpu.pipeline_mode<synchronous>, transform_indices = @transform_5, window_bounds = array<i64: 128, 128>}, {pipeline_mode = #tpu.pipeline_mode<synchronous>, transform_indices = @transform_6, window_bounds = array<i64: 1, 128>}, {pipeline_mode = #tpu.pipeline_mode<synchronous>, transform_indices = @transform_7, window_bounds = array<i64: 128, 128>}, {pipeline_mode = #tpu.pipeline_mode<synchronous>, transform_indices = @transform_8, window_bounds = array<i64: 1, 128>}, {transform_indices = @transform_9, window_bounds = array<i64: 1, 256, 128>}]} {
    %c0 = arith.constant 0 : index
    %c0_0 = arith.constant 0 : index
    %c0_1 = arith.constant 0 : index
    %0 = vector.load %arg2[%c0, %c0_0, %c0_1] : memref<1x256x128xf32, #tpu.memory_space<vmem>>, vector<1x256x128xf32>
    %1 = vector.shape_cast %0 : vector<1x256x128xf32> to vector<256x128xf32>
    %c0_2 = arith.constant 0 : index
    %c0_3 = arith.constant 0 : index
    %c0_4 = arith.constant 0 : index
    %2 = vector.load %arg3[%c0_2, %c0_3, %c0_4] : memref<1x1x128xf32, #tpu.memory_space<vmem>>, vector<1x1x128xf32>
    %3 = vector.shape_cast %2 : vector<1x1x128xf32> to vector<1x128xf32>
    %4 = vector.broadcast %3 : vector<1x128xf32> to vector<256x128xf32>
    %5 = arith.subf %1, %4 : vector<256x128xf32>
    %c0_5 = arith.constant 0 : index
    %c0_6 = arith.constant 0 : index
    %c0_7 = arith.constant 0 : index
    %6 = vector.load %arg4[%c0_5, %c0_6, %c0_7] : memref<1x1x128xf32, #tpu.memory_space<vmem>>, vector<1x1x128xf32>
    %7 = vector.shape_cast %6 : vector<1x1x128xf32> to vector<1x128xf32>
    %8 = vector.broadcast %7 : vector<1x128xf32> to vector<256x128xf32>
    %9 = arith.mulf %5, %8 : vector<256x128xf32>
    %10 = arith.truncf %9 : vector<256x128xf32> to vector<256x128xbf16>
    %c0_8 = arith.constant 0 : index
    %c0_9 = arith.constant 0 : index
    %11 = vector.load %arg7[%c0_8, %c0_9] : memref<128x128xbf16, #tpu.memory_space<vmem>>, vector<128x128xbf16>
    %cst = arith.constant dense<0.000000e+00> : vector<256x128xf32>
    %12 = tpu.matmul %10, %11, %cst {dimension_numbers = #tpu.dot_dimension_numbers<[1], [0], [0], [1], [0, 0, 1, 1], [], []>} : vector<256x128xbf16>, vector<128x128xbf16>, vector<256x128xf32> -> vector<256x128xf32>
    %c0_10 = arith.constant 0 : index
    %c0_11 = arith.constant 0 : index
    %13 = vector.load %arg8[%c0_10, %c0_11] : memref<1x128xf32, #tpu.memory_space<vmem>>, vector<1x128xf32>
    %14 = vector.broadcast %13 : vector<1x128xf32> to vector<256x128xf32>
    %15 = arith.addf %12, %14 : vector<256x128xf32>
    %16 = arith.truncf %15 : vector<256x128xf32> to vector<256x128xbf16>
    %c0_12 = arith.constant 0 : index
    %c0_13 = arith.constant 0 : index
    %c0_14 = arith.constant 0 : index
    %17 = vector.load %arg5[%c0_12, %c0_13, %c0_14] : memref<1x256x128xbf16, #tpu.memory_space<vmem>>, vector<1x256x128xbf16>
    %18 = vector.shape_cast %17 : vector<1x256x128xbf16> to vector<256x128xbf16>
    %cst_15 = arith.constant dense<0.000000e+00> : vector<256x256xf32>
    %19 = tpu.matmul %16, %18, %cst_15 {dimension_numbers = #tpu.dot_dimension_numbers<[1], [1], [0], [0], [0, 0, 1, 0], [], []>} : vector<256x128xbf16>, vector<256x128xbf16>, vector<256x256xf32> -> vector<256x256xf32>
    %cst_16 = arith.constant dense<0xFF800000> : vector<256xf32>
    %20 = vector.multi_reduction <maximumf>, %19, %cst_16 [1] : vector<256x256xf32> to vector<256xf32>
    %21 = vector.shape_cast %20 : vector<256xf32> to vector<256x1xf32>
    %22 = vector.broadcast %21 : vector<256x1xf32> to vector<256x256xf32>
    %23 = arith.subf %19, %22 : vector<256x256xf32>
    %24 = arith.truncf %23 : vector<256x256xf32> to vector<256x256xbf16>
    %25 = math.exp %24 : vector<256x256xbf16>
    %26 = arith.extf %25 : vector<256x256xbf16> to vector<256x256xf32>
    %cst_17 = arith.constant dense<0.000000e+00> : vector<256xf32>
    %27 = vector.multi_reduction <add>, %26, %cst_17 [1] : vector<256x256xf32> to vector<256xf32>
    %28 = vector.shape_cast %27 : vector<256xf32> to vector<256x1xf32>
    %c0_18 = arith.constant 0 : index
    %c0_19 = arith.constant 0 : index
    %c0_20 = arith.constant 0 : index
    %29 = vector.load %arg6[%c0_18, %c0_19, %c0_20] : memref<1x256x128xbf16, #tpu.memory_space<vmem>>, vector<1x256x128xbf16>
    %30 = vector.shape_cast %29 : vector<1x256x128xbf16> to vector<256x128xbf16>
    %cst_21 = arith.constant dense<0.000000e+00> : vector<256x128xf32>
    %31 = tpu.matmul %25, %30, %cst_21 {dimension_numbers = #tpu.dot_dimension_numbers<[1], [0], [0], [1], [0, 0, 1, 1], [], []>} : vector<256x256xbf16>, vector<256x128xbf16>, vector<256x128xf32> -> vector<256x128xf32>
    %32 = tpu.reciprocal %28 {approx = true} : vector<256x1xf32> -> vector<256x1xf32>
    %33 = vector.broadcast %32 : vector<256x1xf32> to vector<256x128xf32>
    %34 = arith.mulf %31, %33 : vector<256x128xf32>
    %35 = arith.truncf %34 : vector<256x128xf32> to vector<256x128xbf16>
    %c0_22 = arith.constant 0 : index
    %c0_23 = arith.constant 0 : index
    %36 = vector.load %arg9[%c0_22, %c0_23] : memref<128x128xbf16, #tpu.memory_space<vmem>>, vector<128x128xbf16>
    %cst_24 = arith.constant dense<0.000000e+00> : vector<256x128xf32>
    %37 = tpu.matmul %35, %36, %cst_24 {dimension_numbers = #tpu.dot_dimension_numbers<[1], [0], [0], [1], [0, 0, 1, 1], [], []>} : vector<256x128xbf16>, vector<128x128xbf16>, vector<256x128xf32> -> vector<256x128xf32>
    %c0_25 = arith.constant 0 : index
    %c0_26 = arith.constant 0 : index
    %38 = vector.load %arg10[%c0_25, %c0_26] : memref<1x128xf32, #tpu.memory_space<vmem>>, vector<1x128xf32>
    %39 = vector.broadcast %38 : vector<1x128xf32> to vector<256x128xf32>
    %40 = arith.addf %37, %39 : vector<256x128xf32>
    %41 = arith.addf %40, %1 : vector<256x128xf32>
    %c0_27 = arith.constant 0 : index
    %c0_28 = arith.constant 0 : index
    %c0_29 = arith.constant 0 : index
    %42 = vector.load %arg11[%c0_27, %c0_28, %c0_29] : memref<1x256x128xf32, #tpu.memory_space<vmem>>, vector<1x256x128xf32>
    %43 = vector.shape_cast %42 : vector<1x256x128xf32> to vector<256x128xf32>
    %44 = vector.shape_cast %41 : vector<256x128xf32> to vector<1x256x128xf32>
    tpu.vector_store %arg11[%c0_27, %c0_28, %c0_29], %44 {strides = array<i32>} : memref<1x256x128xf32, #tpu.memory_space<vmem>>, vector<1x256x128xf32>,
    return
  }
  func.func @transform_0(%arg0: i32, %arg1: i32) -> (i32, i32, i32) {
    %c0_i32 = arith.constant 0 : i32
    %c0_i32_0 = arith.constant 0 : i32
    return %arg0, %arg1, %c0_i32 : i32, i32, i32
  }
  func.func @transform_1(%arg0: i32, %arg1: i32) -> (i32, i32, i32) {
    %c0_i32 = arith.constant 0 : i32
    %c0_i32_0 = arith.constant 0 : i32
    %c0_i32_1 = arith.constant 0 : i32
    return %arg0, %c0_i32, %c0_i32_0 : i32, i32, i32
  }
  func.func @transform_2(%arg0: i32, %arg1: i32) -> (i32, i32, i32) {
    %c0_i32 = arith.constant 0 : i32
    %c0_i32_0 = arith.constant 0 : i32
    %c0_i32_1 = arith.constant 0 : i32
    return %arg0, %c0_i32, %c0_i32_0 : i32, i32, i32
  }
  func.func @transform_3(%arg0: i32, %arg1: i32) -> (i32, i32, i32) {
    %c0_i32 = arith.constant 0 : i32
    %c0_i32_0 = arith.constant 0 : i32
    %c0_i32_1 = arith.constant 0 : i32
    return %arg0, %c0_i32, %c0_i32_0 : i32, i32, i32
  }
  func.func @transform_4(%arg0: i32, %arg1: i32) -> (i32, i32, i32) {
    %c0_i32 = arith.constant 0 : i32
    %c0_i32_0 = arith.constant 0 : i32
    %c0_i32_1 = arith.constant 0 : i32
    return %arg0, %c0_i32, %c0_i32_0 : i32, i32, i32
  }
  func.func @transform_5(%arg0: i32, %arg1: i32) -> (i32, i32) {
    %c0_i32 = arith.constant 0 : i32
    %c0_i32_0 = arith.constant 0 : i32
    %c0_i32_1 = arith.constant 0 : i32
    return %c0_i32, %c0_i32_0 : i32, i32
  }
  func.func @transform_6(%arg0: i32, %arg1: i32) -> (i32, i32) {
    %c0_i32 = arith.constant 0 : i32
    %c0_i32_0 = arith.constant 0 : i32
    %c0_i32_1 = arith.constant 0 : i32
    return %c0_i32, %c0_i32_0 : i32, i32
  }
  func.func @transform_7(%arg0: i32, %arg1: i32) -> (i32, i32) {
    %c0_i32 = arith.constant 0 : i32
    %c0_i32_0 = arith.constant 0 : i32
    %c0_i32_1 = arith.constant 0 : i32
    return %c0_i32, %c0_i32_0 : i32, i32
  }
  func.func @transform_8(%arg0: i32, %arg1: i32) -> (i32, i32) {
    %c0_i32 = arith.constant 0 : i32
    %c0_i32_0 = arith.constant 0 : i32
    %c0_i32_1 = arith.constant 0 : i32
    return %c0_i32, %c0_i32_0 : i32, i32
  }
  func.func @transform_9(%arg0: i32, %arg1: i32) -> (i32, i32, i32) {
    %c0_i32 = arith.constant 0 : i32
    %c0_i32_0 = arith.constant 0 : i32
    return %arg0, %arg1, %c0_i32 : i32, i32, i32
  }
}

</mosaic_0001>

<bundles_post_ra>
// kernel: tpu_custom_call.1
= control target key start
LH: loop header
LB: loop body
LE: loop exit
PB: predicated region body
PF: predicated region fallthrough
CT: control target
= control target key end

     0   :  { %s4327_s0 = inlined_call_operand.hbm [shape: f32[2,256,128], index: 0, kind: input, shape index: {}]   ;;  %s4328_s1 = inlined_call_operand.vmem [shape: f32[2,1,128], index: 1, kind: input, shape index: {}]   ;;  %s4329_s2 = inlined_call_operand.vmem [shape: f32[2,1,128], index: 2, kind: input, shape index: {}]   ;;  %s4330_s3 = inlined_call_operand.hbm [shape: bf16[2,256,128], index: 3, kind: input, shape index: {}]   ;;  %s4331_s4 = inlined_call_operand.hbm [shape: bf16[2,256,128], index: 4, kind: input, shape index: {}]   ;;  %s4332_s5 = inlined_call_operand.hbm [shape: bf16[128,128], index: 5, kind: input, shape index: {}]   ;;  %s4333_s6 = inlined_call_operand.vmem [shape: f32[1,128], index: 6, kind: input, shape index: {}]   ;;  %s4334_s7 = inlined_call_operand.hbm [shape: bf16[128,128], index: 7, kind: input, shape index: {}]   ;;  %s4335_s8 = inlined_call_operand.vmem [shape: f32[1,128], index: 8, kind: input, shape index: {}]   ;;  %s4336_s9 = inlined_call_operand.hbm [shape: f32[2,256,128], index: 9, kind: output, shape index: {}]  }
   0x1   :  { %4368 = sst [smem:[#allocation33_spill]] %s4330_s3 }
   0x2   :  { %4369 = sst [smem:[#allocation34_spill]] %s4335_s8 }
   0x3   :  { %4370 = sst [smem:[#allocation35_spill]] %s4336_s9 }
   0x4   :  { %14 = vsyncpa [#allocation3], 0 }
   0x5   :  { %16 = vsyncpa [#allocation3 + $0x1], 0 }
   0x6   :  { %17 = vsyncpa [#allocation6], 0 }
   0x7   :  { %18 = vsyncpa [#allocation9], 0 }
   0x8   :  { %19 = vsyncpa [#allocation4], 0 }
   0x9   :  { %21 = vsyncpa [#allocation4 + $0x1], 0  ;;  %s3459_s30 = smov 0   ;;  %s3461_s10 = smov 0  }
   0xa   :  { %s3463_s11 = smov 0   ;;  %s3465_s12 = smov 0  }
   0xb   :  { %s3467_s13 = smov 0   ;;  %s3469_s14 = smov 0  }
   0xc LB: > { %4371 = sst [smem:[#allocation16_spill]] %s3375_s30  ;;  %s2451_s15 = sadd.s32 4294967295, %s3395_s14   ;;  %s3395_s14 = sphi %s3469_s14, %s27_s14   ;;  %s3391_s13 = sphi %s3467_s13, %s4437_s13   ;;  %s3387_s12 = sphi %s3465_s12, %s4436_s12   ;;  %s3383_s11 = sphi %s3463_s11, %s4435_s11   ;;  %s3379_s10 = sphi %s3461_s10, %s4434_s10   ;;  %s3375_s30 = sphi %s3459_s30, %s4433_s30  }
   0xd   : > { %s2452_s16 = sadd.s32 4294967294, %s3395_s14   ;;  %p61_p0 = scmp.ne.s32.totalorder %s3379_s10, %s3375_s30 }
   0xe   : > { %p3493_p1 = scmp.eq.s32.totalorder %s2451_s15, 0  ;;  %p3497_p2 = scmp.eq.s32.totalorder %s2451_s15, 1 }
   0xf   : > { %p281_p3 = scmp.eq.s32.totalorder %s2452_s16, 1  ;;  %p2453_p5 = scmp.ge.s32.totalorder %s3395_s14, 1 }
  0x10   : > { %s4372_s17 = scalar_select %p3493_p1, 1, 0 }
  0x11   : > { %s4373_s18 = scalar_select %p3497_p2, 1, 0 }
  0x12   : > { %p3503_p4 = por %p3493_p1, %p61_p0  ;;  %p3508_p6 = por %p281_p3, %p61_p0 }
  0x13   : > { %p288_p7 = scmp.lt.s32.totalorder %s3395_s14, 3  ;;  %s2526_s21 = sshll.u32 %s3387_s12, 11 }
  0x14   : > { %s4374_s19 = scalar_select %p3503_p4, 1, 0 }
  0x15   : > { %s4375_s20 = scalar_select %p3508_p6, 1, 0 }
  0x16   : > { %p3514_p8 = pnand %p2453_p5, %p288_p7  ;;  %s4378_s3 = sld [smem:[#allocation33_spill]] }
  0x17   : > { %4376 = sst [smem:[#allocation17_spill]] %s4375_s20  ;;  %s3397_s26 = smov [#allocation5]  }
  0x18   : > { %s4377_s22 = scalar_select %p3514_p8, 1, 0 }
  0x19   : > { %s315_s27 = sshll.u32 %s3397_s26, 4  ;;  %p4339_p9 = pneg %p3514_p8  ;;  %s3525_s27 = int_to_ptr.vmem [resolvable:$true] %s315_s27 }
  0x1a   : > { %s3530_s15 = scalar_lea.hbm %s4331_s4, %s2526_s21  ;;  %s3398_s23 = smov [#allocation8]  }
  0x1b   : > { %p3537_p10 = pnand %p4339_p9, %p3503_p4  ;;  %s3542_s24 = sshll.u32 %s3398_s23, 4  ;;  %s345_s24 = int_to_ptr.vmem [resolvable:$true] %s3542_s24 }
  0x1c   : > { %s3521_s25 = scalar_lea.hbm %s4378_s3, %s2526_s21  ;;  %s3164_s29 = scalar_lea.hbm %s4378_s3, 4096 }
  0x1d   : > { %s4379_s16 = scalar_select %p3537_p10, 1, 0 }
  0x1e   : > { %s3159_s26 = scalar_lea.hbm %s3521_s25, 2048  ;;  %p4347_p13 = pneg %p3537_p10 }
  0x1f   : > { %p3160_p12 = scmp.ne.s32.totalorder %s3521_s25, %s3159_s26  ;;  %p3165_p5 = scmp.lt.u32.totalorder %s3521_s25, %s4378_s3 }
  0x20   : > { %p3166_p7 = scmp.lt.u32.totalorder %s3164_s29, %s3159_s26  ;;  %p3168_p9 = scmp.lt.u32.totalorder %s3159_s26, %s3521_s25 }
  0x21   : > { %p3162_p0 = pnand %p4347_p13, %p3160_p12 }
  0x22   : > { %p3167_p11 = por %p3166_p7, %p3165_p5 }
  0x23   : > { %p3163_p3 = pneg %p3162_p0 }
  0x24   : > { %p3169_p6 = por %p3168_p9, %p3167_p11 }
  0x26   : > { %p3170_p4 = pnand %p3169_p6, %p3163_p3 }
  0x28   : > { %3173 = shalt.err (!%p3170_p4)
}
  0x29   : > { %s3174_s23 = scalar_lea.vmem %s3525_s27, 2048  ;;  %p3182_p8 = scmp.lt.s32.totalorder %s3525_s27, %s3525_s27 }
  0x2a   : > { %p3175_p12 = scmp.ne.s32.totalorder %s3525_s27, %s3174_s23  ;;  %p3183_p1 = scmp.lt.s32.totalorder %s3174_s23, %s3174_s23 }
  0x2c   : > { %p3177_p0 = pnand %p3175_p12, %p4347_p13  ;;  %p3184_p5 = por %p3183_p1, %p3182_p8 }
  0x2e   : > { %p3178_p2 = pneg %p3177_p0 }
  0x30   : > { %p3185_p7 = pnand %p3184_p5, %p3178_p2 }
  0x32   : > { %3188 = shalt.err (!%p3185_p7)
}
  0x33   : > { %s3399_s30 = smov 64   ;;  %s3400_s20 = smov 4  }
  0x34   : > { %2869 = dma.hbm_to_vmem [thread:$0]  (!%p3537_p10), %s3521_s25, 2048, %s3525_s27, [#allocation6], %s3399_s30, %s3399_s30, %s3400_s20  }
  0x35   : > { %p4380_p4 = scmp.ne.s32.totalorder %s4372_s17, 0  ;;  %p4381_p6 = scmp.ne.s32.totalorder %s4377_s22, 0 }
  0x36   : > { %s3401_s21 = smov [#allocation7]   ;;  %s3189_s3 = scalar_lea.hbm %s4332_s5, 1024 }
  0x37   : > { %p4382_p9 = pneg %p4381_p6  ;;  %s331_s28 = sshll.u32 %s3401_s21, 4  ;;  %s332_s28 = int_to_ptr.vmem [resolvable:$true] %s331_s28 }
  0x38   : > { %p3190_p2 = scmp.ne.s32.totalorder %s4332_s5, %s3189_s3  ;;  %p3196_p12 = scmp.lt.u32.totalorder %s3189_s3, %s4332_s5 }
  0x39   : > { %p3579_p1 = pnand %p4382_p9, %p4380_p4 }
  0x3b   : > { %s4383_s26 = scalar_select %p3579_p1, 1, 0 }
  0x3c   : > { %p4350_p8 = pneg %p3579_p1 }
  0x3e   : > { %p3192_p11 = pnand %p4350_p8, %p3190_p2 }
  0x40   : > { %p3193_p3 = pneg %p3192_p11 }
  0x42   : > { %p3198_p0 = pnand %p3196_p12, %p3193_p3 }
  0x44   : > { %3201 = shalt.err (!%p3198_p0)
}
  0x45   : > { %s3202_s21 = scalar_lea.vmem %s345_s24, 1024  ;;  %p3210_p9 = scmp.lt.s32.totalorder %s345_s24, %s345_s24 }
  0x46   : > { %p3203_p5 = scmp.ne.s32.totalorder %s345_s24, %s3202_s21  ;;  %p3211_p13 = scmp.lt.s32.totalorder %s3202_s21, %s3202_s21 }
  0x48   : > { %p3205_p7 = pnand %p3203_p5, %p4350_p8  ;;  %p3212_p6 = por %p3211_p13, %p3210_p9 }
  0x4a   : > { %p3206_p4 = pneg %p3205_p7 }
  0x4c   : > { %p3213_p10 = pnand %p3212_p6, %p3206_p4 }
  0x4e   : > { %3216 = shalt.err (!%p3213_p10)
}
  0x4f   : > { %2875 = dma.hbm_to_vmem [thread:$0]  (!%p3579_p1), %s4332_s5, 1024, %s345_s24, [#allocation9], %s3399_s30, %s3399_s30, %s3400_s20  }
  0x50   : > { %s3402_s9 = smov [#allocation10]   ;;  %s3217_s23 = scalar_lea.hbm %s3530_s15, 2048 }
  0x51   : > { %s360_s29 = sshll.u32 %s3402_s9, 4  ;;  %p3218_p13 = scmp.ne.s32.totalorder %s3530_s15, %s3217_s23  ;;  %s361_s29 = int_to_ptr.vmem [resolvable:$true] %s360_s29 }
  0x52   : > { %p4384_p10 = scmp.ne.s32.totalorder %s4379_s16, 0  ;;  %s3222_s21 = scalar_lea.hbm %s4331_s4, 4096 }
  0x53   : > { %p3223_p3 = scmp.lt.u32.totalorder %s3530_s15, %s4331_s4  ;;  %p3224_p12 = scmp.lt.u32.totalorder %s3222_s21, %s3217_s23 }
  0x54   : > { %p4385_p6 = pneg %p4384_p10  ;;  %p3226_p5 = scmp.lt.u32.totalorder %s3217_s23, %s3530_s15 }
  0x55   : > { %p3225_p0 = por %p3224_p12, %p3223_p3 }
  0x56   : > { %p3220_p2 = pnand %p3218_p13, %p4385_p6 }
  0x57   : > { %p3227_p7 = por %p3226_p5, %p3225_p0 }
  0x58   : > { %p3221_p11 = pneg %p3220_p2 }
  0x5a   : > { %p3228_p4 = pnand %p3227_p7, %p3221_p11 }
  0x5c   : > { %3231 = shalt.err (!%p3228_p4)
}
  0x5d   : > { %s3232_s24 = scalar_lea.vmem %s332_s28, 2048  ;;  %p4386_p13 = pmov %p4385_p6 }
  0x5e   : > { %p3233_p9 = scmp.ne.s32.totalorder %s332_s28, %s3232_s24  ;;  %p3240_p8 = scmp.lt.s32.totalorder %s332_s28, %s332_s28 }
  0x5f   : > { %p3241_p1 = scmp.lt.s32.totalorder %s3232_s24, %s3232_s24 }
  0x60   : > { %p3235_p6 = pnand %p3233_p9, %p4386_p13 }
  0x61   : > { %p3242_p3 = por %p3241_p1, %p3240_p8 }
  0x62   : > { %p3236_p2 = pneg %p3235_p6 }
  0x64   : > { %p3243_p12 = pnand %p3242_p3, %p3236_p2 }
  0x66   : > { %3246 = shalt.err (!%p3243_p12)
}
  0x67   : > { %2872 = dma.hbm_to_vmem [thread:$0]  (!%p4384_p10), %s3530_s15, 2048, %s332_s28, [#allocation6], %s3399_s30, %s3399_s30, %s3400_s20  }
  0x68   : > { %s3247_s25 = scalar_lea.hbm %s4334_s7, 1024  ;;  %p4387_p1 = scmp.ne.s32.totalorder %s4383_s26, 0 }
  0x69   : > { %p3248_p11 = scmp.ne.s32.totalorder %s4334_s7, %s3247_s25  ;;  %p3254_p7 = scmp.lt.u32.totalorder %s3247_s25, %s4334_s7 }
  0x6a   : > { %p4388_p8 = pneg %p4387_p1 }
  0x6c   : > { %p3250_p0 = pnand %p3248_p11, %p4388_p8 }
  0x6e   : > { %p3251_p5 = pneg %p3250_p0 }
  0x70   : > { %p3256_p4 = pnand %p3254_p7, %p3251_p5 }
  0x72   : > { %3259 = shalt.err (!%p3256_p4)
}
  0x73   : > { %s3260_s15 = scalar_lea.vmem %s361_s29, 1024  ;;  %p4389_p9 = pmov %p4388_p8 }
  0x74   : > { %p3261_p10 = scmp.ne.s32.totalorder %s361_s29, %s3260_s15  ;;  %p3268_p2 = scmp.lt.s32.totalorder %s361_s29, %s361_s29 }
  0x75   : > { %p3269_p3 = scmp.lt.s32.totalorder %s3260_s15, %s3260_s15 }
  0x76   : > { %p3263_p13 = pnand %p3261_p10, %p4389_p9 }
  0x77   : > { %p3270_p12 = por %p3269_p3, %p3268_p2 }
  0x78   : > { %p3264_p6 = pneg %p3263_p13 }
  0x7a   : > { %p3271_p8 = pnand %p3270_p12, %p3264_p6 }
  0x7c   : > { %3274 = shalt.err (!%p3271_p8)
}
  0x7d   : > { %2878 = dma.hbm_to_vmem [thread:$0]  (!%p4387_p1), %s4334_s7, 1024, %s361_s29, [#allocation9], %s3399_s30, %s3399_s30, %s3400_s20  }
  0x7e   : > { %s48_s24 = sadd.s32 1, %s3383_s11  ;;  %s39_s26 = sadd.s32 1, %s3391_s13 }
  0x7f   : > { %p55_p11 = scmp.ne.s32.totalorder %s3383_s11, %s3379_s10  ;;  %p41_p0 = scmp.ge.s32.totalorder %s39_s26, 2 }
  0x80   : > { %p56_p5 = scmp.eq.s32.totalorder %s3395_s14, 0  ;;  %p4390_p7 = scmp.ne.s32.totalorder %s4373_s18, 0 }
  0x81   : > { %p2889_p10 = scmp.lt.s32.totalorder %s3395_s14, 2  ;;  %s4439_s26 = smov (%p41_p0, %s39_s26), 0 }
  0x82   : > { %p3660_p4 = por %p4390_p7, %p55_p11  ;;  %p57_p9 = por %p56_p5, %p55_p11 }
  0x83   : > { %s377_s23 = sand.u32 1, %s3383_s11   ;;  %s43_s25 = ssub.s32 %s3391_s13, %s4439_s26 }
  0x84   : > { %p46_p13 = scmp.eq.s32.totalorder %s43_s25, 0  ;;  %s2461_s30 = sshll.u32 %s377_s23, 8 }
  0x85   : > { %s2528_s20 = sshll.u32 %s3391_s13, 12  ;;  %s381_s16 = scalar_lea.vmem [#allocation2], %s2461_s30 }
  0x86   : > { %s3672_s29 = scalar_select %p46_p13, %s3383_s11, %s48_s24  }
  0x87   : > { %s3677_s18 = scalar_lea.hbm %s4327_s0, %s2528_s20  ;;  %s390_s3 = sshll.u32 %s381_s16, 4  ;;  %s3679_s3 = int_to_ptr.vmem [resolvable:$true] %s390_s3 }
  0x88   : > { %p3683_p1 = pnand %p2889_p10, %p57_p9  ;;  %s3687_s28 = scalar_lea.sflag [#allocation3], %s377_s23 }
  0x89   : > { %s3275_s8 = scalar_lea.hbm %s3677_s18, 4096  ;;  %s3280_s30 = scalar_lea.hbm %s4327_s0, 8192 }
  0x8a   : > { %p3276_p6 = scmp.ne.s32.totalorder %s3677_s18, %s3275_s8  ;;  %p3277_p2 = pneg %p3683_p1 }
  0x8b   : > { %p3281_p8 = scmp.lt.u32.totalorder %s3677_s18, %s4327_s0  ;;  %p3282_p11 = scmp.lt.u32.totalorder %s3280_s30, %s3275_s8 }
  0x8c   : > { %p3278_p3 = pnand %p3277_p2, %p3276_p6  ;;  %p3284_p5 = scmp.lt.u32.totalorder %s3275_s8, %s3677_s18 }
  0x8d   : > { %p3283_p0 = por %p3282_p11, %p3281_p8 }
  0x8e   : > { %p3279_p12 = pneg %p3278_p3 }
  0x8f   : > { %p3285_p7 = por %p3284_p5, %p3283_p0 }
  0x91   : > { %p3286_p10 = pnand %p3285_p7, %p3279_p12 }
  0x93   : > { %3289 = shalt.err (!%p3286_p10)
}
  0x94   : > { %s3290_s23 = scalar_lea.vmem %s3679_s3, 4096  ;;  %s3403_s21 = smov [#allocation2]  }
  0x95   : > { %p3291_p9 = scmp.ne.s32.totalorder %s3679_s3, %s3290_s23  ;;  %s3295_s16 = sshll.u32 %s3403_s21, 4  ;;  %s3296_s16 = int_to_ptr.vmem [resolvable:$false] %s3295_s16 }
  0x96   : > { %s3297_s24 = scalar_lea.vmem %s3296_s16, 8192  ;;  %p3298_p3 = scmp.lt.s32.totalorder %s3679_s3, %s3296_s16 }
  0x97   : > { %p3293_p13 = pnand %p3291_p9, %p3277_p2  ;;  %p3299_p8 = scmp.lt.s32.totalorder %s3297_s24, %s3290_s23 }
  0x99   : > { %p3294_p6 = pneg %p3293_p13  ;;  %p3300_p11 = por %p3299_p8, %p3298_p3 }
  0x9b   : > { %p3301_p0 = pnand %p3300_p11, %p3294_p6 }
  0x9d   : > { %3304 = shalt.err (!%p3301_p0)
}
  0x9e   : > { %s3404_s8 = smov 128   ;;  %s3405_s25 = smov 8  }
  0x9f   : > { %2882 = dma.hbm_to_vmem [thread:$0]  (!%p3683_p1), %s3677_s18, 4096, %s3679_s3, %s3687_s28, %s3404_s8, %s3404_s8, %s3405_s25  }
  0xa0   : > { %p4393_p2 = scmp.ne.s32.totalorder %s4377_s22, 0 }
  0xa2   : > { %402 = sbr.rel (%p4393_p2) target bundleno = 1387 (0x56b), region = 56 }
  0xa9   : > { %s3718_s30 = sand.u32 1, %s3379_s10   ;;  %p4394_p12 = scmp.ne.s32.totalorder %s4374_s19, 0 }
  0xaa   : > { %s2465_s20 = sshll.u32 %s3718_s30, 8  ;;  %s405_s27 = scalar_lea.sflag [#allocation3], %s3718_s30 }
  0xab   : > { %s3724_s23 = scalar_lea.vmem [#allocation2], %s2465_s20 }
  0xac   : > { %3358 = dma.done.wait (%p4394_p12), %s405_s27, 4096  }
  0xad   : > { %3360 = vsyncadd (%p4394_p12), %s405_s27, 4294963200 }
  0xae   : > { %3362 = dma.done.wait (%p4394_p12), [#allocation6], 4096  }
  0xaf   : > { %3364 = vsyncadd (%p4394_p12), [#allocation6], 4294963200  ;;  %p4395_p1 = scmp.ne.s32.totalorder %s4372_s17, 0 }
  0xb1   : > { %3366 = dma.done.wait (%p4395_p1), [#allocation9], 2048  }
  0xb2   : > { %3368 = vsyncadd (%p4395_p1), [#allocation9], 4294965248  ;;  %p466_p5 = scmp.lt.s32.totalorder %s3387_s12, 1  ;;  %v2951_v0 = vld [vmem:[#allocation8] sm:$0xff]   ;;  %v2952_v1 = vld [vmem:[#allocation8 + $0x8] sm:$0xff]   ;;  %s4426_s25 = sld [smem:[#allocation34_spill]] }
  0xb3   : > { %2738 = vmatprep.subr.bf16.mxu0 %v2951_v0  ;;  %v2953_v2 = vld [vmem:[#allocation8 + $0x10] sm:$0xff]   ;;  %v2954_v3 = vld [vmem:[#allocation8 + $0x18] sm:$0xff]   ;;  %v474_v4 = vld [vmem:[%s3724_s23] sm:$0xff]  ;;  %s4179_s27 = scalar_lea.vmem [#allocation11], %s2465_s20  ;;  %s2529_s20 = sshll.u32 %s3387_s12, 12 }
  0xb4   : > { %s467_s22 = scalar_select %p466_p5, %s3387_s12, 1  ;;  %2739 = vmatpush3.bf16.msra.mxu0 %v2951_v0  ;;  %v475_v5 = vld [vmem:[%s3724_s23 + $0x8] sm:$0xff]  ;;  %v2955_v12 = vld [vmem:[#allocation8 + $0x20] sm:$0xff]   ;;  %v2957_v15 = vld [vmem:[#allocation8 + $0x30] sm:$0xff]  }
  0xb5   : > { %2740 = vmatprep.subr.bf16.mxu0 %v2952_v1  ;;  %v2956_v14 = vld [vmem:[#allocation8 + $0x28] sm:$0xff]   ;;  %v476_v16 = vld [vmem:[%s3724_s23 + $0x10] sm:$0xff]  ;;  %v477_v17 = vld [vmem:[%s3724_s23 + $0x18] sm:$0xff]  ;;  %s4427_s12 = sld [smem:[#allocation35_spill]]  ;;  %s2283_s28 = scalar_lea.sflag [#allocation4], %s3718_s30 }
  0xb6   : > { %s468_s3 = scalar_lea.vmem %s4328_s1, %s467_s22  ;;  %s471_s17 = scalar_lea.vmem %s4329_s2, %s467_s22  ;;  %v478_v18 = vld [vmem:[%s3724_s23 + $0x20] sm:$0xff]  ;;  %v479_v19 = vld [vmem:[%s3724_s23 + $0x28] sm:$0xff]  ;;  %v500_v20 = vld [vmem:[%s3724_s23 + $0xd0] sm:$0xff] }
  0xb7   : > { %v3748_v6 = vld [vmem:[%s468_s3] ss:$0 sm:$0xff]  ;;  %v501_v21 = vld [vmem:[%s3724_s23 + $0xd8] sm:$0xff]  ;;  %v2961_v29 = vld [vmem:[#allocation5 + $0x48] sm:$0xff]   ;;  %s2298_s22 = sshll.u32 %s4179_s27, 4  ;;  %s3406_s21 = smov [#allocation11]   ;;  %s4274_s22 = int_to_ptr.vmem [resolvable:$true] %s2298_s22 }
  0xb8   : > { %2741 = vmatpush3.bf16.msra.mxu0 %v2952_v1  ;;  %v513_v7 = vsub.f32 %v474_v4, %v3748_v6  ;;  %v514_v8 = vsub.f32 %v475_v5, %v3748_v6  ;;  %v3752_v9 = vld [vmem:[%s471_s17] ss:$0 sm:$0xff]  ;;  %v515_v23 = vsub.f32 %v476_v16, %v3748_v6  ;;  %v2958_v26 = vld [vmem:[#allocation8 + $0x38] sm:$0xff]   ;;  %v516_v27 = vsub.f32 %v477_v17, %v3748_v6  ;;  %v503_v31 = vld [vmem:[%s3724_s23 + $0xe8] sm:$0xff]  ;;  %s3305_s17 = scalar_lea.vmem %s4274_s22, 4096  ;;  %s3309_s16 = sshll.u32 %s3406_s21, 4  ;;  %s3310_s16 = int_to_ptr.vmem [resolvable:$false] %s3309_s16 }
  0xb9   : > { %2742 = vmatprep.subr.bf16.mxu0 %v2953_v2  ;;  %v2959_v22 = vld [vmem:[#allocation5 + $0x40] sm:$0xff]   ;;  %v517_v28 = vsub.f32 %v478_v18, %v3748_v6  ;;  %v518_v30 = vsub.f32 %v479_v19, %v3748_v6  ;;  %v480_v32 = vld [vmem:[%s3724_s23 + $0x30] sm:$0xff]  ;;  %v539_v35 = vsub.f32 %v500_v20, %v3748_v6  ;;  %v540_v36 = vsub.f32 %v501_v21, %v3748_v6  ;;  %v505_v37 = vld [vmem:[%s3724_s23 + $0xf8] sm:$0xff]  ;;  %p3306_p7 = scmp.ne.s32.totalorder %s4274_s22, %s3305_s17  ;;  %s3311_s24 = scalar_lea.vmem %s3310_s16, 8192 }
  0xba   : > { %v552_v10 = vmul.f32 %v3752_v9, %v513_v7  ;;  %v553_v11 = vmul.f32 %v3752_v9, %v514_v8  ;;  %v502_v24 = vld [vmem:[%s3724_s23 + $0xe0] sm:$0xff]  ;;  %2554 = vmatprep.subr.bf16.mxu1 %v2959_v22  ;;  %v504_v33 = vld [vmem:[%s3724_s23 + $0xf0] sm:$0xff]  ;;  %v554_v34 = vmul.f32 %v3752_v9, %v515_v23  ;;  %v555_v38 = vmul.f32 %v3752_v9, %v516_v27  ;;  %v481_v40 = vld [vmem:[%s3724_s23 + $0x38] sm:$0xff]  ;;  %p3312_p13 = scmp.lt.s32.totalorder %s4274_s22, %s3310_s16  ;;  %p3313_p6 = scmp.lt.s32.totalorder %s3311_s24, %s3305_s17 }
  0xbb   : > { %v2960_v25 = vld [vmem:[#allocation5] sm:$0xff]   ;;  %v556_v39 = vmul.f32 %v3752_v9, %v517_v28  ;;  %v541_v41 = vsub.f32 %v502_v24, %v3748_v6  ;;  %v542_v42 = vsub.f32 %v503_v31, %v3748_v6  ;;  %v557_v43 = vmul.f32 %v3752_v9, %v518_v30  ;;  %v483_v48 = vld [vmem:[%s3724_s23 + $0x48] sm:$0xff]  ;;  %v2963_v60 = vld [vmem:[#allocation5 + $0x50] sm:$0xff]   ;;  %s4428_s3 = smov %s4427_s12  ;;  %s4272_s15 = scalar_lea.hbm %s4427_s12, %s2529_s20 }
  0xbc   : > { %2743 = vmatpush3.bf16.msra.mxu0 %v2953_v2  ;;  %v584_v13 = vpack.c.bf16 %v553_v11, %v552_v10  ;;  %2555 = vmatpush3.bf16.xpose.msra.mxu1 %v2960_v25  ;;  %v482_v44 = vld [vmem:[%s3724_s23 + $0x40] sm:$0xff]  ;;  %v3782_v45 = vmul.f32 %v3752_v9, %v539_v35  ;;  %v3785_v46 = vmul.f32 %v3752_v9, %v540_v36  ;;  %v2962_v55 = vld [vmem:[#allocation5 + $0x8] sm:$0xff]   ;;  %v484_v1 = vld [vmem:[%s3724_s23 + $0x50] sm:$0xff]  ;;  %p3307_p10 = pnand %p3306_p7, %p3660_p4  ;;  %p3314_p3 = por %p3313_p6, %p3312_p13 }
  0xbd   : > { %2744 = vmatprep.subr.bf16.mxu0 %v2954_v3  ;;  %2556 = vmatprep.subr.bf16.mxu1 %v2961_v29  ;;  %v543_v47 = vsub.f32 %v504_v33, %v3748_v6  ;;  %v3790_v49 = vmul.f32 %v3752_v9, %v541_v41  ;;  %v3793_v50 = vmul.f32 %v3752_v9, %v542_v42  ;;  %v485_v2 = vld [vmem:[%s3724_s23 + $0x58] sm:$0xff]  ;;  %v486_v5 = vld [vmem:[%s3724_s23 + $0x60] sm:$0xff]  ;;  %v487_v7 = vld [vmem:[%s3724_s23 + $0x68] sm:$0xff] }
  0xbe   : > { %2754 = vmatprep.mubr.bf16.mxu0 %v584_v13  ;;  %v544_v51 = vsub.f32 %v505_v37, %v3748_v6  ;;  %v519_v52 = vsub.f32 %v480_v32, %v3748_v6  ;;  %v597_v53 = vpack.c.bf16 %v3785_v46, %v3782_v45  ;;  %v585_v56 = vpack.c.bf16 %v555_v38, %v554_v34  ;;  %v2964_v11 = vld [vmem:[#allocation5 + $0x10] sm:$0xff]   ;;  %v489_v20 = vld [vmem:[%s3724_s23 + $0x78] sm:$0xff]  ;;  %v490_v23 = vld [vmem:[%s3724_s23 + $0x80] sm:$0xff]  ;;  %p3308_p9 = pneg %p3307_p10 }
  0xbf   : > { %v3800_v54 = vmul.f32 %v3752_v9, %v543_v47  ;;  %v520_v57 = vsub.f32 %v481_v40, %v3748_v6  ;;  %v598_v58 = vpack.c.bf16 %v3793_v50, %v3790_v49  ;;  %v586_v61 = vpack.c.bf16 %v557_v43, %v556_v39  ;;  %v488_v19 = vld [vmem:[%s3724_s23 + $0x70] sm:$0xff]  ;;  %v491_v24 = vld [vmem:[%s3724_s23 + $0x88] sm:$0xff]  ;;  %v2966_v27 = vld [vmem:[#allocation5 + $0x18] sm:$0xff]  }
  0xc0   : > { %2745 = vmatpush3.bf16.msra.mxu0 %v2954_v3  ;;  %v3806_v59 = vmul.f32 %v3752_v9, %v544_v51  ;;  %v521_v62 = vsub.f32 %v482_v44, %v3748_v6  ;;  %v522_v63 = vsub.f32 %v483_v48, %v3748_v6  ;;  %v558_v3 = vmul.f32 %v3752_v9, %v519_v52  ;;  %v2967_v28 = vld [vmem:[#allocation5 + $0x60] sm:$0xff]   ;;  %v492_v39 = vld [vmem:[%s3724_s23 + $0x90] sm:$0xff]  ;;  %v493_v40 = vld [vmem:[%s3724_s23 + $0x98] sm:$0xff]  ;;  %p3315_p8 = pnand %p3314_p3, %p3308_p9 }
  0xc1   : > { %2746 = vmatprep.subr.bf16.mxu0 %v2955_v12  ;;  %v559_v4 = vmul.f32 %v3752_v9, %v520_v57  ;;  %v525_v17 = vsub.f32 %v486_v5, %v3748_v6  ;;  %v526_v18 = vsub.f32 %v487_v7, %v3748_v6  ;;  %v527_v30 = vsub.f32 %v488_v19, %v3748_v6  ;;  %v494_v41 = vld [vmem:[%s3724_s23 + $0xa0] sm:$0xff]  ;;  %v495_v42 = vld [vmem:[%s3724_s23 + $0xa8] sm:$0xff] }
  0xc2   : > { %v599_v0 = vpack.c.bf16 %v3806_v59, %v3800_v54  ;;  %v560_v8 = vmul.f32 %v3752_v9, %v521_v62  ;;  %v561_v10 = vmul.f32 %v3752_v9, %v522_v63  ;;  %v528_v31 = vsub.f32 %v489_v20, %v3748_v6  ;;  %v2968_v43 = vld [vmem:[#allocation5 + $0x20] sm:$0xff]   ;;  %v2969_v51 = vld [vmem:[#allocation5 + $0x68] sm:$0xff]   ;;  %v496_v63 = vld [vmem:[%s3724_s23 + $0xb0] sm:$0xff] }
  0xc3   : > { %v587_v13 = vpack.c.bf16 %v559_v4, %v558_v3  ;;  %v564_v25 = vmul.f32 %v3752_v9, %v525_v17  ;;  %v529_v33 = vsub.f32 %v490_v23, %v3748_v6  ;;  %v530_v34 = vsub.f32 %v491_v24, %v3748_v6  ;;  %v499_v3 = vld [vmem:[%s3724_s23 + $0xc8] sm:$0xff] }
  0xc4   : > { %2747 = vmatpush3.bf16.msra.mxu0 %v2955_v12  ;;  %2557 = vmatpush3.bf16.xpose.msra.mxu1 %v2962_v55  ;;  %v2965_v12 = vld [vmem:[#allocation5 + $0x58] sm:$0xff]   ;;  %v588_v16 = vpack.c.bf16 %v561_v10, %v560_v8  ;;  %v566_v35 = vmul.f32 %v3752_v9, %v527_v30  ;;  %v567_v36 = vmul.f32 %v3752_v9, %v528_v31  ;;  %v2970_v4 = vld [vmem:[#allocation5 + $0x28] sm:$0xff]   ;;  %v2971_v10 = vld [vmem:[#allocation5 + $0x70] sm:$0xff]  }
  0xc5   : > { %2748 = vmatprep.subr.bf16.mxu0 %v2956_v14  ;;  %2558 = vmatprep.subr.bf16.mxu1 %v2963_v60  ;;  %v568_v37 = vmul.f32 %v3752_v9, %v529_v33  ;;  %v569_v38 = vmul.f32 %v3752_v9, %v530_v34  ;;  %v531_v47 = vsub.f32 %v492_v39, %v3748_v6 }
  0xc6   : > { %v591_v44 = vpack.c.bf16 %v567_v36, %v566_v35  ;;  %v532_v48 = vsub.f32 %v493_v40, %v3748_v6  ;;  %v533_v55 = vsub.f32 %v494_v41, %v3748_v6  ;;  %v535_v7 = vsub.f32 %v496_v63, %v3748_v6 }
  0xc7   : > { %v592_v52 = vpack.c.bf16 %v569_v38, %v568_v37  ;;  %v570_v57 = vmul.f32 %v3752_v9, %v531_v47 }
  0xc8   : > { %2749 = vmatpush3.bf16.msra.mxu0 %v2956_v14  ;;  %v523_v14 = vsub.f32 %v484_v1, %v3748_v6  ;;  %v571_v60 = vmul.f32 %v3752_v9, %v532_v48  ;;  %v497_v1 = vld [vmem:[%s3724_s23 + $0xb8] sm:$0xff] }
  0xc9   : > { %2750 = vmatprep.subr.bf16.mxu0 %v2957_v15  ;;  %v536_v8 = vsub.f32 %v497_v1, %v3748_v6 }
  0xca   : > { %v562_v21 = vmul.f32 %v3752_v9, %v523_v14  ;;  %v593_v5 = vpack.c.bf16 %v571_v60, %v570_v57  ;;  %v574_v14 = vmul.f32 %v3752_v9, %v535_v7 }
  0xcc   : > { %2751 = vmatpush3.bf16.msra.mxu0 %v2957_v15  ;;  %v524_v15 = vsub.f32 %v485_v2, %v3748_v6  ;;  %2559 = vmatpush3.bf16.xpose.msra.mxu1 %v2964_v11  ;;  %v498_v2 = vld [vmem:[%s3724_s23 + $0xc0] sm:$0xff] }
  0xcd   : > { %2752 = vmatprep.subr.bf16.mxu0 %v2958_v26  ;;  %2560 = vmatprep.subr.bf16.mxu1 %v2965_v12  ;;  %v537_v12 = vsub.f32 %v498_v2, %v3748_v6 }
  0xce   : > { %v563_v22 = vmul.f32 %v3752_v9, %v524_v15  ;;  %v575_v15 = vmul.f32 %v3752_v9, %v536_v8 }
  0xd0   : > { %2753 = vmatpush3.bf16.msra.mxu0 %v2958_v26  ;;  %v565_v26 = vmul.f32 %v3752_v9, %v526_v18  ;;  %v589_v29 = vpack.c.bf16 %v563_v22, %v562_v21  ;;  %v2972_v18 = vld [vmem:[#allocation5 + $0x30] sm:$0xff]   ;;  %v595_v19 = vpack.c.bf16 %v575_v15, %v574_v14  ;;  %v3876_v22 = vld [vmem:[%s4333_s6] ss:$0 sm:$0xff] }
  0xd2   : > { %v590_v32 = vpack.c.bf16 %v565_v26, %v564_v25 }
  0xd3   : > { %2755 = vmatmul.mubr.bf16.vlgmr.msra.gmra.mrb[0].mxu0 %v585_v56  ;;  %v534_v56 = vsub.f32 %v495_v42, %v3748_v6 }
  0xd4   : > { %2758 = vmatprep.mubr.bf16.mxu0 %v586_v61  ;;  %2561 = vmatpush3.bf16.xpose.msra.mxu1 %v2966_v27  ;;  %v572_v61 = vmul.f32 %v3752_v9, %v533_v55 }
  0xd5   : > { %2562 = vmatprep.subr.bf16.mxu1 %v2967_v28  ;;  %v573_v62 = vmul.f32 %v3752_v9, %v534_v56 }
  0xd7   : > { %v594_v11 = vpack.c.bf16 %v573_v62, %v572_v61 }
  0xdb   : > { %2759 = vmatmul.mubr.bf16.gmra.mrb[4].mxu0 %v587_v13  ;;  %v538_v13 = vsub.f32 %v499_v3, %v3748_v6  ;;  %v2973_v6 = vld [vmem:[#allocation5 + $0x78] sm:$0xff]  }
  0xdc   : > { %2762 = vmatprep.mubr.bf16.mxu0 %v588_v16  ;;  %2563 = vmatpush3.bf16.xpose.msra.mxu1 %v2968_v43  ;;  %v576_v16 = vmul.f32 %v3752_v9, %v537_v12 }
  0xdd   : > { %2564 = vmatprep.subr.bf16.mxu1 %v2969_v51  ;;  %v577_v17 = vmul.f32 %v3752_v9, %v538_v13  ;;  %v2974_v9 = vld [vmem:[#allocation5 + $0x38] sm:$0xff]  }
  0xdf   : > { %v596_v20 = vpack.c.bf16 %v577_v17, %v576_v16 }
  0xe3   : > { %2763 = vmatmul.mubr.bf16.gmra.mrb[8].mxu0 %v589_v29 }
  0xe4   : > { %2766 = vmatprep.mubr.bf16.mxu0 %v590_v32  ;;  %2565 = vmatpush3.bf16.xpose.msra.mxu1 %v2970_v4 }
  0xe5   : > { %2566 = vmatprep.subr.bf16.mxu1 %v2971_v10 }
  0xeb   : > { %2767 = vmatmul.mubr.bf16.gmra.mrb[12].mxu0 %v591_v44 }
  0xec   : > { %2770 = vmatprep.mubr.bf16.mxu0 %v592_v52  ;;  %2567 = vmatpush3.bf16.xpose.msra.mxu1 %v2972_v18 }
  0xed   : > { %2568 = vmatprep.subr.bf16.mxu1 %v2973_v6 }
  0xf3   : > { %2771 = vmatmul.mubr.bf16.gmra.mrb[16].mxu0 %v593_v5 }
  0xf4   : > { %2774 = vmatprep.mubr.bf16.mxu0 %v594_v11  ;;  %2569 = vmatpush3.bf16.xpose.msra.mxu1 %v2974_v9 }
  0xfb   : > { %2775 = vmatmul.mubr.bf16.gmra.mrb[20].mxu0 %v595_v19 }
  0xfc   : > { %2778 = vmatprep.mubr.bf16.mxu0 %v596_v20 }
 0x103   : > { %2779 = vmatmul.mubr.bf16.gmra.mrb[24].mxu0 %v597_v53 }
 0x104   : > { %2782 = vmatprep.mubr.bf16.mxu0 %v598_v58 }
 0x10b   : > { %2783 = vmatmul.mubr.bf16.gmra.mrb[28].mxu0 %v599_v0 }
 0x1a6   : > { %v2756_v21 = vpop.f32.mrb[0].mxu0 }
 0x1a7   : > { %v705_v45 = vpop.f32.mrb[1].mxu0  ;;  %v714_v53 = vadd.f32 %v2756_v21, %v3876_v22 }
 0x1a8   : > { %v2757_v46 = vpop.f32.mrb[2].mxu0  ;;  %v706_v54 = vadd.f32 %v3876_v22, %v705_v45 }
 0x1a9   : > { %v717_v49 = vadd.f32 %v2757_v46, %v3876_v22  ;;  %v708_v50 = vpop.f32.mrb[3].mxu0 }
 0x1aa   : > { %v709_v58 = vadd.f32 %v3876_v22, %v708_v50 }
 0x1ab   : > { %v833_v59 = vpack.c.bf16 %v717_v49, %v714_v53 }
 0x1ac   : > { %v832_v0 = vpack.c.bf16 %v709_v58, %v706_v54 }
 0x1ae   : > { %2570 = vmatprep.mubr.bf16.mxu1 %v832_v0  ;;  %v2760_v23 = vpop.f32.mrb[4].mxu0 }
 0x1af   : > { %2571 = vmatmul.mubr.bf16.vlgmr.msra.gmra.mrb[0].mxu1 %v832_v0  ;;  %v730_v24 = vadd.f32 %v2760_v23, %v3876_v22  ;;  %v721_v25 = vpop.f32.mrb[5].mxu0 }
 0x1b0   : > { %2572 = vmatprep.mubr.bf16.mxu1 %v833_v59  ;;  %v722_v26 = vadd.f32 %v3876_v22, %v721_v25  ;;  %v2761_v27 = vpop.f32.mrb[6].mxu0 }
 0x1b1   : > { %v733_v28 = vadd.f32 %v2761_v27, %v3876_v22  ;;  %v724_v29 = vpop.f32.mrb[7].mxu0 }
 0x1b2   : > { %v725_v30 = vadd.f32 %v3876_v22, %v724_v29 }
 0x1b3   : > { %v835_v31 = vpack.c.bf16 %v733_v28, %v730_v24 }
 0x1b4   : > { %v834_v32 = vpack.c.bf16 %v725_v30, %v722_v26  ;;  %v2976_v30 = vld [vmem:[#allocation7] sm:$0xff]  }
 0x1b6   : > { %v2764_v33 = vpop.f32.mrb[8].mxu0 }
 0x1b7   : > { %2573 = vmatmul.mubr.bf16.gmra.mrb[4].mxu1 %v833_v59  ;;  %v746_v34 = vadd.f32 %v2764_v33, %v3876_v22  ;;  %v737_v35 = vpop.f32.mrb[9].mxu0  ;;  %v2979_v33 = vld [vmem:[#allocation7 + $0x50] sm:$0xff]  }
 0x1b8   : > { %2574 = vmatprep.mubr.bf16.mxu1 %v834_v32  ;;  %v738_v36 = vadd.f32 %v3876_v22, %v737_v35  ;;  %v2765_v37 = vpop.f32.mrb[10].mxu0  ;;  %v2981_v35 = vld [vmem:[#allocation7 + $0x58] sm:$0xff]  }
 0x1b9   : > { %v749_v38 = vadd.f32 %v2765_v37, %v3876_v22  ;;  %v740_v39 = vpop.f32.mrb[11].mxu0  ;;  %v2983_v37 = vld [vmem:[#allocation7 + $0x60] sm:$0xff]  }
 0x1ba   : > { %v741_v40 = vadd.f32 %v3876_v22, %v740_v39 }
 0x1bb   : > { %v837_v41 = vpack.c.bf16 %v749_v38, %v746_v34  ;;  %v2980_v34 = vld [vmem:[#allocation7 + $0x10] sm:$0xff]  }
 0x1bc   : > { %v836_v42 = vpack.c.bf16 %v741_v40, %v738_v36  ;;  %v2982_v36 = vld [vmem:[#allocation7 + $0x18] sm:$0xff]   ;;  %v2984_v40 = vld [vmem:[#allocation7 + $0x20] sm:$0xff]  }
 0x1be   : > { %v2768_v43 = vpop.f32.mrb[12].mxu0 }
 0x1bf   : > { %2575 = vmatmul.mubr.bf16.gmra.mrb[8].mxu1 %v834_v32  ;;  %v762_v44 = vadd.f32 %v2768_v43, %v3876_v22  ;;  %v753_v47 = vpop.f32.mrb[13].mxu0  ;;  %v2978_v32 = vld [vmem:[#allocation7 + $0x8] sm:$0xff]  }
 0x1c0   : > { %2576 = vmatprep.mubr.bf16.mxu1 %v835_v31  ;;  %v754_v48 = vadd.f32 %v3876_v22, %v753_v47  ;;  %v2769_v51 = vpop.f32.mrb[14].mxu0  ;;  %v2985_v43 = vld [vmem:[#allocation7 + $0x68] sm:$0xff]  }
 0x1c1   : > { %v765_v52 = vadd.f32 %v2769_v51, %v3876_v22  ;;  %v756_v55 = vpop.f32.mrb[15].mxu0 }
 0x1c2   : > { %v757_v56 = vadd.f32 %v3876_v22, %v756_v55 }
 0x1c3   : > { %v839_v57 = vpack.c.bf16 %v765_v52, %v762_v44 }
 0x1c4   : > { %v838_v60 = vpack.c.bf16 %v757_v56, %v754_v48  ;;  %v2986_v48 = vld [vmem:[#allocation7 + $0x28] sm:$0xff]  }
 0x1c6   : > { %v2772_v61 = vpop.f32.mrb[16].mxu0 }
 0x1c7   : > { %2577 = vmatmul.mubr.bf16.gmra.mrb[12].mxu1 %v835_v31  ;;  %v778_v62 = vadd.f32 %v2772_v61, %v3876_v22  ;;  %v769_v63 = vpop.f32.mrb[17].mxu0  ;;  %v2977_v31 = vld [vmem:[#allocation7 + $0x48] sm:$0xff]  }
 0x1c8   : > { %2578 = vmatprep.mubr.bf16.mxu1 %v836_v42  ;;  %v770_v1 = vadd.f32 %v3876_v22, %v769_v63  ;;  %v2773_v2 = vpop.f32.mrb[18].mxu0 }
 0x1c9   : > { %v781_v3 = vadd.f32 %v2773_v2, %v3876_v22  ;;  %v772_v4 = vpop.f32.mrb[19].mxu0 }
 0x1ca   : > { %v773_v5 = vadd.f32 %v3876_v22, %v772_v4 }
 0x1cb   : > { %v841_v7 = vpack.c.bf16 %v781_v3, %v778_v62 }
 0x1cc   : > { %v840_v8 = vpack.c.bf16 %v773_v5, %v770_v1 }
 0x1ce   : > { %v2776_v10 = vpop.f32.mrb[20].mxu0 }
 0x1cf   : > { %2579 = vmatmul.mubr.bf16.gmra.mrb[16].mxu1 %v836_v42  ;;  %v794_v11 = vadd.f32 %v2776_v10, %v3876_v22  ;;  %v785_v12 = vpop.f32.mrb[21].mxu0 }
 0x1d0   : > { %2580 = vmatprep.mubr.bf16.mxu1 %v837_v41  ;;  %v786_v13 = vadd.f32 %v3876_v22, %v785_v12  ;;  %v2777_v14 = vpop.f32.mrb[22].mxu0  ;;  %v2987_v12 = vld [vmem:[#allocation7 + $0x70] sm:$0xff]  }
 0x1d1   : > { %v797_v15 = vadd.f32 %v2777_v14, %v3876_v22  ;;  %v788_v16 = vpop.f32.mrb[23].mxu0 }
 0x1d2   : > { %v789_v17 = vadd.f32 %v3876_v22, %v788_v16 }
 0x1d3   : > { %v843_v18 = vpack.c.bf16 %v797_v15, %v794_v11 }
 0x1d4   : > { %v842_v19 = vpack.c.bf16 %v789_v17, %v786_v13  ;;  %v2988_v13 = vld [vmem:[#allocation7 + $0x30] sm:$0xff]  }
 0x1d6   : > { %v2780_v20 = vpop.f32.mrb[24].mxu0 }
 0x1d7   : > { %2581 = vmatmul.mubr.bf16.gmra.mrb[20].mxu1 %v837_v41  ;;  %v810_v6 = vadd.f32 %v2780_v20, %v3876_v22  ;;  %v801_v9 = vpop.f32.mrb[25].mxu0  ;;  %v2989_v20 = vld [vmem:[#allocation7 + $0x78] sm:$0xff]  }
 0x1d8   : > { %2582 = vmatprep.mubr.bf16.mxu1 %v838_v60  ;;  %v802_v21 = vadd.f32 %v3876_v22, %v801_v9  ;;  %v2781_v45 = vpop.f32.mrb[26].mxu0 }
 0x1d9   : > { %v813_v46 = vadd.f32 %v2781_v45, %v3876_v22  ;;  %v804_v53 = vpop.f32.mrb[27].mxu0 }
 0x1da   : > { %v805_v49 = vadd.f32 %v3876_v22, %v804_v53 }
 0x1db   : > { %v845_v50 = vpack.c.bf16 %v813_v46, %v810_v6  ;;  %v2990_v6 = vld [vmem:[#allocation7 + $0x38] sm:$0xff]  }
 0x1dc   : > { %v844_v54 = vpack.c.bf16 %v805_v49, %v802_v21 }
 0x1de   : > { %v2784_v58 = vpop.f32.mrb[28].mxu0 }
 0x1df   : > { %2583 = vmatmul.mubr.bf16.gmra.mrb[24].mxu1 %v838_v60  ;;  %v826_v59 = vadd.f32 %v2784_v58, %v3876_v22  ;;  %v817_v0 = vpop.f32.mrb[29].mxu0 }
 0x1e0   : > { %2584 = vmatprep.mubr.bf16.mxu1 %v839_v57  ;;  %v818_v23 = vadd.f32 %v3876_v22, %v817_v0  ;;  %v2785_v24 = vpop.f32.mrb[30].mxu0 }
 0x1e1   : > { %v829_v25 = vadd.f32 %v2785_v24, %v3876_v22  ;;  %v820_v26 = vpop.f32.mrb[31].mxu0 }
 0x1e2   : > { %v821_v27 = vadd.f32 %v3876_v22, %v820_v26  ;;  %v2975_v22 = vld [vmem:[#allocation7 + $0x40] sm:$0xff]  }
 0x1e3   : > { %v847_v28 = vpack.c.bf16 %v829_v25, %v826_v59  ;;  %2602 = vmatprep.subr.bf16.mxu0 %v2975_v22 }
 0x1e4   : > { %v846_v29 = vpack.c.bf16 %v821_v27, %v818_v23  ;;  %2603 = vmatpush3.bf16.msra.mxu0 %v2976_v30 }
 0x1e5   : > { %2604 = vmatprep.subr.bf16.mxu0 %v2977_v31 }
 0x1e7   : > { %2585 = vmatmul.mubr.bf16.gmra.mrb[28].mxu1 %v839_v57 }
 0x1e8   : > { %2586 = vmatprep.mubr.bf16.mxu1 %v840_v8  ;;  %2605 = vmatpush3.bf16.msra.mxu0 %v2978_v32 }
 0x1e9   : > { %2606 = vmatprep.subr.bf16.mxu0 %v2979_v33 }
 0x1ec   : > { %2607 = vmatpush3.bf16.msra.mxu0 %v2980_v34 }
 0x1ed   : > { %2608 = vmatprep.subr.bf16.mxu0 %v2981_v35 }
 0x1ef   : > { %2587 = vmatmul.mubr.bf16.gmra.mrb[32].mxu1 %v840_v8 }
 0x1f0   : > { %2588 = vmatprep.mubr.bf16.mxu1 %v841_v7  ;;  %2609 = vmatpush3.bf16.msra.mxu0 %v2982_v36 }
 0x1f1   : > { %2610 = vmatprep.subr.bf16.mxu0 %v2983_v37 }
 0x1f4   : > { %2611 = vmatpush3.bf16.msra.mxu0 %v2984_v40 }
 0x1f5   : > { %2612 = vmatprep.subr.bf16.mxu0 %v2985_v43 }
 0x1f7   : > { %2589 = vmatmul.mubr.bf16.gmra.mrb[36].mxu1 %v841_v7 }
 0x1f8   : > { %2590 = vmatprep.mubr.bf16.mxu1 %v842_v19  ;;  %2613 = vmatpush3.bf16.msra.mxu0 %v2986_v48 }
 0x1f9   : > { %2614 = vmatprep.subr.bf16.mxu0 %v2987_v12 }
 0x1fc   : > { %2615 = vmatpush3.bf16.msra.mxu0 %v2988_v13 }
 0x1fd   : > { %2616 = vmatprep.subr.bf16.mxu0 %v2989_v20 }
 0x1ff   : > { %2591 = vmatmul.mubr.bf16.gmra.mrb[40].mxu1 %v842_v19 }
 0x200   : > { %2592 = vmatprep.mubr.bf16.mxu1 %v843_v18  ;;  %2617 = vmatpush3.bf16.msra.mxu0 %v2990_v6 }
 0x207   : > { %2593 = vmatmul.mubr.bf16.gmra.mrb[44].mxu1 %v843_v18 }
 0x208   : > { %2594 = vmatprep.mubr.bf16.mxu1 %v844_v54 }
 0x20f   : > { %2595 = vmatmul.mubr.bf16.gmra.mrb[48].mxu1 %v844_v54 }
 0x210   : > { %2596 = vmatprep.mubr.bf16.mxu1 %v845_v50 }
 0x217   : > { %2597 = vmatmul.mubr.bf16.gmra.mrb[52].mxu1 %v845_v50 }
 0x218   : > { %2598 = vmatprep.mubr.bf16.mxu1 %v846_v29 }
 0x21f   : > { %2599 = vmatmul.mubr.bf16.gmra.mrb[56].mxu1 %v846_v29 }
 0x220   : > { %2600 = vmatprep.mubr.bf16.mxu1 %v847_v28 }
 0x227   : > { %2601 = vmatmul.mubr.bf16.gmra.mrb[60].mxu1 %v847_v28 }
 0x282   : > { %v3910_v38 = vpop.f32.mrb[0].mxu1 }
 0x283   : > { %v3912_v39 = vpop.f32.mrb[1].mxu1 }
 0x284   : > { %v3914_v41 = vpop.f32.mrb[2].mxu1  ;;  %v1169_v42 = vmax.f32 %v3910_v38, %v3912_v39 }
 0x285   : > { %v3918_v44 = vpop.f32.mrb[3].mxu1 }
 0x286   : > { %1170 = vmax.xlane.f32.xlu0 %v1169_v42  ;;  %v1172_v47 = vmax.f32 %v3914_v41, %v3918_v44 }
 0x28a   : > { %1173 = vmax.xlane.f32.xlu0 %v1172_v47  ;;  %v3922_v51 = vpop.f32.mrb[4].mxu1 }
 0x28b   : > { %v3924_v52 = vpop.f32.mrb[5].mxu1 }
 0x28c   : > { %v3926_v55 = vpop.f32.mrb[6].mxu1  ;;  %v1175_v56 = vmax.f32 %v3922_v51, %v3924_v52 }
 0x28d   : > { %v3930_v57 = vpop.f32.mrb[7].mxu1 }
 0x28e   : > { %1176 = vmax.xlane.f32.xlu1 %v1175_v56  ;;  %v1178_v60 = vmax.f32 %v3926_v55, %v3930_v57 }
 0x292   : > { %1179 = vmax.xlane.f32.xlu1 %v1178_v60  ;;  %v3934_v61 = vpop.f32.mrb[8].mxu1 }
 0x293   : > { %v3936_v62 = vpop.f32.mrb[9].mxu1 }
 0x294   : > { %v3938_v63 = vpop.f32.mrb[10].mxu1  ;;  %v1181_v1 = vmax.f32 %v3934_v61, %v3936_v62 }
 0x295   : > { %v3942_v2 = vpop.f32.mrb[11].mxu1 }
 0x296   : > { %1182 = vmax.xlane.f32.xlu0 %v1181_v1  ;;  %v1184_v3 = vmax.f32 %v3938_v63, %v3942_v2 }
 0x298   : > { %1185 = vmax.xlane.f32.xlu1 %v1184_v3 }
 0x29a   : > { %v3946_v4 = vpop.f32.mrb[12].mxu1 }
 0x29b   : > { %v3948_v5 = vpop.f32.mrb[13].mxu1 }
 0x29c   : > { %v3950_v7 = vpop.f32.mrb[14].mxu1  ;;  %v1187_v8 = vmax.f32 %v3946_v4, %v3948_v5 }
 0x29d   : > { %v3954_v10 = vpop.f32.mrb[15].mxu1 }
 0x29e   : > { %1188 = vmax.xlane.f32.xlu0 %v1187_v8  ;;  %v1190_v11 = vmax.f32 %v3950_v7, %v3954_v10 }
 0x2a0   : > { %1191 = vmax.xlane.f32.xlu1 %v1190_v11 }
 0x2a2   : > { %v3958_v14 = vpop.f32.mrb[16].mxu1 }
 0x2a3   : > { %v3960_v15 = vpop.f32.mrb[17].mxu1 }
 0x2a4   : > { %v3962_v16 = vpop.f32.mrb[18].mxu1  ;;  %v1193_v17 = vmax.f32 %v3958_v14, %v3960_v15 }
 0x2a5   : > { %v3966_v18 = vpop.f32.mrb[19].mxu1 }
 0x2a6   : > { %1194 = vmax.xlane.f32.xlu0 %v1193_v17  ;;  %v1196_v19 = vmax.f32 %v3962_v16, %v3966_v18 }
 0x2a8   : > { %1197 = vmax.xlane.f32.xlu1 %v1196_v19 }
 0x2aa   : > { %v3970_v9 = vpop.f32.mrb[20].mxu1 }
 0x2ab   : > { %v3972_v21 = vpop.f32.mrb[21].mxu1 }
 0x2ac   : > { %v3974_v45 = vpop.f32.mrb[22].mxu1  ;;  %v1199_v46 = vmax.f32 %v3970_v9, %v3972_v21 }
 0x2ad   : > { %v3978_v53 = vpop.f32.mrb[23].mxu1 }
 0x2ae   : > { %1200 = vmax.xlane.f32.xlu0 %v1199_v46  ;;  %v1202_v49 = vmax.f32 %v3974_v45, %v3978_v53 }
 0x2b0   : > { %1203 = vmax.xlane.f32.xlu1 %v1202_v49 }
 0x2b2   : > { %v3982_v50 = vpop.f32.mrb[24].mxu1 }
 0x2b3   : > { %v3984_v54 = vpop.f32.mrb[25].mxu1 }
 0x2b4   : > { %v3986_v58 = vpop.f32.mrb[26].mxu1  ;;  %v1205_v59 = vmax.f32 %v3982_v50, %v3984_v54 }
 0x2b5   : > { %v3990_v0 = vpop.f32.mrb[27].mxu1 }
 0x2b6   : > { %1206 = vmax.xlane.f32.xlu0 %v1205_v59  ;;  %v1208_v23 = vmax.f32 %v3986_v58, %v3990_v0 }
 0x2b8   : > { %1209 = vmax.xlane.f32.xlu1 %v1208_v23 }
 0x2ba   : > { %v3994_v24 = vpop.f32.mrb[28].mxu1 }
 0x2bb   : > { %v3996_v25 = vpop.f32.mrb[29].mxu1 }
 0x2bc   : > { %v3998_v26 = vpop.f32.mrb[30].mxu1  ;;  %v1211_v27 = vmax.f32 %v3994_v24, %v3996_v25 }
 0x2bd   : > { %v4002_v28 = vpop.f32.mrb[31].mxu1 }
 0x2be   : > { %1212 = vmax.xlane.f32.xlu0 %v1211_v27  ;;  %v1214_v29 = vmax.f32 %v3998_v26, %v4002_v28 }
 0x2c0   : > { %1215 = vmax.xlane.f32.xlu1 %v1214_v29 }
 0x2c2   : > { %v4006_v22 = vpop.f32.mrb[32].mxu1 }
 0x2c3   : > { %v4008_v30 = vpop.f32.mrb[33].mxu1 }
 0x2c4   : > { %v4010_v31 = vpop.f32.mrb[34].mxu1  ;;  %v1217_v32 = vmax.f32 %v4006_v22, %v4008_v30 }
 0x2c5   : > { %v4014_v33 = vpop.f32.mrb[35].mxu1 }
 0x2c6   : > { %1218 = vmax.xlane.f32.xlu0 %v1217_v32  ;;  %v1220_v34 = vmax.f32 %v4010_v31, %v4014_v33 }
 0x2c8   : > { %1221 = vmax.xlane.f32.xlu1 %v1220_v34 }
 0x2ca   : > { %v4018_v35 = vpop.f32.mrb[36].mxu1 }
 0x2cb   : > { %v4020_v36 = vpop.f32.mrb[37].mxu1 }
 0x2cc   : > { %v4022_v37 = vpop.f32.mrb[38].mxu1  ;;  %v1223_v40 = vmax.f32 %v4018_v35, %v4020_v36 }
 0x2cd   : > { %v4026_v42 = vpop.f32.mrb[39].mxu1 }
 0x2ce   : > { %1224 = vmax.xlane.f32.xlu0 %v1223_v40  ;;  %v1226_v43 = vmax.f32 %v4022_v37, %v4026_v42 }
 0x2d0   : > { %1227 = vmax.xlane.f32.xlu1 %v1226_v43 }
 0x2d2   : > { %v4030_v47 = vpop.f32.mrb[40].mxu1 }
 0x2d3   : > { %v4032_v48 = vpop.f32.mrb[41].mxu1 }
 0x2d4   : > { %v4034_v56 = vpop.f32.mrb[42].mxu1  ;;  %v1229_v60 = vmax.f32 %v4030_v47, %v4032_v48 }
 0x2d5   : > { %v4038_v1 = vpop.f32.mrb[43].mxu1 }
 0x2d6   : > { %1230 = vmax.xlane.f32.xlu0 %v1229_v60  ;;  %v1232_v3 = vmax.f32 %v4034_v56, %v4038_v1 }
 0x2d8   : > { %1233 = vmax.xlane.f32.xlu1 %v1232_v3 }
 0x2da   : > { %v4042_v8 = vpop.f32.mrb[44].mxu1 }
 0x2db   : > { %v4044_v11 = vpop.f32.mrb[45].mxu1 }
 0x2dc   : > { %v4046_v12 = vpop.f32.mrb[46].mxu1  ;;  %v1235_v13 = vmax.f32 %v4042_v8, %v4044_v11 }
 0x2dd   : > { %v4050_v17 = vpop.f32.mrb[47].mxu1 }
 0x2de   : > { %1236 = vmax.xlane.f32.xlu0 %v1235_v13  ;;  %v1238_v19 = vmax.f32 %v4046_v12, %v4050_v17 }
 0x2e0   : > { %1239 = vmax.xlane.f32.xlu1 %v1238_v19 }
 0x2e2   : > { %v4054_v20 = vpop.f32.mrb[48].mxu1 }
 0x2e3   : > { %v4056_v6 = vpop.f32.mrb[49].mxu1 }
 0x2e4   : > { %4396 = vst [vmem:[#allocation18_spill] sm:$0xff] %v4056_v6  ;;  %v4058_v46 = vpop.f32.mrb[50].mxu1  ;;  %v1241_v49 = vmax.f32 %v4054_v20, %v4056_v6 }
 0x2e5   : > { %4397 = vst [vmem:[#allocation19_spill] sm:$0xff] %v4058_v46  ;;  %v4062_v59 = vpop.f32.mrb[51].mxu1 }
 0x2e6   : > { %4398 = vst [vmem:[#allocation20_spill] sm:$0xff] %v4062_v59  ;;  %1242 = vmax.xlane.f32.xlu0 %v1241_v49  ;;  %v1244_v23 = vmax.f32 %v4058_v46, %v4062_v59 }
 0x2e8   : > { %1245 = vmax.xlane.f32.xlu1 %v1244_v23 }
 0x2ea   : > { %v4066_v27 = vpop.f32.mrb[52].mxu1 }
 0x2eb   : > { %4399 = vst [vmem:[#allocation21_spill] sm:$0xff] %v4066_v27  ;;  %v4068_v29 = vpop.f32.mrb[53].mxu1 }
 0x2ec   : > { %4400 = vst [vmem:[#allocation22_spill] sm:$0xff] %v4068_v29  ;;  %v4070_v32 = vpop.f32.mrb[54].mxu1  ;;  %v1247_v34 = vmax.f32 %v4066_v27, %v4068_v29 }
 0x2ed   : > { %4401 = vst [vmem:[#allocation23_spill] sm:$0xff] %v4070_v32  ;;  %v4074_v40 = vpop.f32.mrb[55].mxu1 }
 0x2ee   : > { %4402 = vst [vmem:[#allocation24_spill] sm:$0xff] %v4074_v40  ;;  %1248 = vmax.xlane.f32.xlu0 %v1247_v34  ;;  %v1250_v43 = vmax.f32 %v4070_v32, %v4074_v40 }
 0x2f0   : > { %1251 = vmax.xlane.f32.xlu1 %v1250_v43 }
 0x2f2   : > { %v4078_v60 = vpop.f32.mrb[56].mxu1 }
 0x2f3   : > { %4403 = vst [vmem:[#allocation25_spill] sm:$0xff] %v4078_v60  ;;  %v4080_v3 = vpop.f32.mrb[57].mxu1 }
 0x2f4   : > { %4404 = vst [vmem:[#allocation26_spill] sm:$0xff] %v4080_v3  ;;  %v4082_v13 = vpop.f32.mrb[58].mxu1  ;;  %v1253_v19 = vmax.f32 %v4078_v60, %v4080_v3 }
 0x2f5   : > { %4405 = vst [vmem:[#allocation27_spill] sm:$0xff] %v4082_v13  ;;  %v4086_v49 = vpop.f32.mrb[59].mxu1 }
 0x2f6   : > { %4406 = vst [vmem:[#allocation28_spill] sm:$0xff] %v4086_v49  ;;  %1254 = vmax.xlane.f32.xlu0 %v1253_v19  ;;  %v1256_v23 = vmax.f32 %v4082_v13, %v4086_v49 }
 0x2f8   : > { %1257 = vmax.xlane.f32.xlu1 %v1256_v23 }
 0x2fa   : > { %v4090_v34 = vpop.f32.mrb[60].mxu1 }
 0x2fb   : > { %4407 = vst [vmem:[#allocation29_spill] sm:$0xff] %v4090_v34  ;;  %v4092_v40 = vpop.f32.mrb[61].mxu1 }
 0x2fc   : > { %4408 = vst [vmem:[#allocation30_spill] sm:$0xff] %v4092_v40  ;;  %v4094_v43 = vpop.f32.mrb[62].mxu1  ;;  %v1259_v32 = vmax.f32 %v4090_v34, %v4092_v40 }
 0x2fd   : > { %4409 = vst [vmem:[#allocation31_spill] sm:$0xff] %v4094_v43  ;;  %v4098_v29 = vpop.f32.mrb[63].mxu1 }
 0x2fe   : > { %4410 = vst [vmem:[#allocation32_spill] sm:$0xff] %v4098_v29  ;;  %1260 = vmax.xlane.f32.xlu0 %v1259_v32  ;;  %v1262_v3 = vmax.f32 %v4094_v43, %v4098_v29 }
 0x300   : > { %1263 = vmax.xlane.f32.xlu1 %v1262_v3 }
 0x313   : > { %v1171_v19 = vpop.xlane.xlu0 %1170 }
 0x314   : > { %v1265_v23 = vsub.f32 %v3910_v38, %v1171_v19  ;;  %v1266_v49 = vsub.f32 %v3912_v39, %v1171_v19 }
 0x317   : > { %v1174_v60 = vpop.xlane.xlu0 %1173 }
 0x318   : > { %v1267_v13 = vsub.f32 %v3914_v41, %v1174_v60  ;;  %v1268_v27 = vsub.f32 %v3918_v44, %v1174_v60 }
 0x31a   : > { %v1329_v59 = vpack.c.bf16 %v1267_v13, %v1265_v23  ;;  %v1330_v46 = vpack.c.bf16 %v1268_v27, %v1266_v49 }
 0x31b   : > { %v1177_v40 = vpop.xlane.xlu1 %1176 }
 0x31c   : > { %v1362_v34 = vmul.bf16 1069105081, %v1329_v59  ;;  %v1365_v6 = vmul.bf16 1069105081, %v1330_v46  ;;  %v1269_v3 = vsub.f32 %v3922_v51, %v1177_v40  ;;  %v1270_v29 = vsub.f32 %v3924_v52, %v1177_v40 }
 0x31e   : > { %2999 = vpow.bf16 %v1362_v34 }
 0x31f   : > { %3001 = vpow.bf16 %v1365_v6  ;;  %v1180_v32 = vpop.xlane.xlu1 %1179 }
 0x320   : > { %v1271_v38 = vsub.f32 %v3926_v55, %v1180_v32  ;;  %v1272_v39 = vsub.f32 %v3930_v57, %v1180_v32 }
 0x322   : > { %v1331_v19 = vpack.c.bf16 %v1271_v38, %v1269_v3  ;;  %v1332_v41 = vpack.c.bf16 %v1272_v39, %v1270_v29 }
 0x323   : > { %v1183_v43 = vpop.xlane.xlu0 %1182 }
 0x324   : > { %v1368_v44 = vmul.bf16 1069105081, %v1331_v19  ;;  %v1371_v60 = vmul.bf16 1069105081, %v1332_v41  ;;  %v1273_v27 = vsub.f32 %v3934_v61, %v1183_v43  ;;  %v1274_v6 = vsub.f32 %v3936_v62, %v1183_v43 }
 0x325   : > { %v1186_v59 = vpop.xlane.xlu1 %1185 }
 0x326   : > { %3003 = vpow.bf16 %v1368_v44  ;;  %v1275_v46 = vsub.f32 %v3938_v63, %v1186_v59  ;;  %v1276_v51 = vsub.f32 %v3942_v2, %v1186_v59 }
 0x327   : > { %3005 = vpow.bf16 %v1371_v60 }
 0x328   : > { %v1333_v52 = vpack.c.bf16 %v1275_v46, %v1273_v27  ;;  %v1334_v55 = vpack.c.bf16 %v1276_v51, %v1274_v6 }
 0x329   : > { %v3000_v40 = vpop.eup %2999 }
 0x32a   : > { %v3002_v57 = vpop.eup %3001  ;;  %v1374_v13 = vmul.bf16 1069105081, %v1333_v52  ;;  %v1377_v29 = vmul.bf16 1069105081, %v1334_v55  ;;  %v1457_v49 = vunpack.c.l.bf16 %v3000_v40  ;;  %v1459_v34 = vunpack.c.h.bf16 %v3000_v40 }
 0x32b   : > { %1777 = vmatprep.mubr.bf16.mxu0 %v3002_v57  ;;  %v1189_v23 = vpop.xlane.xlu0 %1188  ;;  %v1458_v61 = vunpack.c.l.bf16 %v3002_v57  ;;  %v1460_v32 = vunpack.c.h.bf16 %v3002_v57 }
 0x32c   : > { %3007 = vpow.bf16 %v1374_v13  ;;  %1778 = vmatmul.mubr.bf16.vlgmr.msra.gmra.mrb[32].mxu0 %v3000_v40  ;;  %v1277_v2 = vsub.f32 %v3946_v4, %v1189_v23  ;;  %v1278_v3 = vsub.f32 %v3948_v5, %v1189_v23 }
 0x32d   : > { %3009 = vpow.bf16 %v1377_v29  ;;  %v1192_v62 = vpop.xlane.xlu1 %1191  ;;  %v1521_v63 = vadd.f32 %v1458_v61, %v1457_v49  ;;  %v1524_v43 = vadd.f32 %v1460_v32, %v1459_v34 }
 0x32e   : > { %v1279_v38 = vsub.f32 %v3950_v7, %v1192_v62  ;;  %v1280_v39 = vsub.f32 %v3954_v10, %v1192_v62 }
 0x32f   : > { %1522 = vadd.xlane.f32.xlu0 %v1521_v63  ;;  %1525 = vadd.xlane.f32.xlu1 %v1524_v43 }
 0x330   : > { %v1335_v19 = vpack.c.bf16 %v1279_v38, %v1277_v2  ;;  %v1336_v41 = vpack.c.bf16 %v1280_v39, %v1278_v3 }
 0x331   : > { %v3004_v44 = vpop.eup %3003 }
 0x332   : > { %v3006_v60 = vpop.eup %3005  ;;  %v1380_v27 = vmul.bf16 1069105081, %v1335_v19  ;;  %v1383_v59 = vmul.bf16 1069105081, %v1336_v41  ;;  %v1461_v6 = vunpack.c.l.bf16 %v3004_v44  ;;  %v1463_v46 = vunpack.c.h.bf16 %v3004_v44 }
 0x333   : > { %1785 = vmatprep.mubr.bf16.mxu0 %v3006_v60  ;;  %v1195_v51 = vpop.xlane.xlu0 %1194  ;;  %v1462_v52 = vunpack.c.l.bf16 %v3006_v60  ;;  %v1464_v4 = vunpack.c.h.bf16 %v3006_v60 }
 0x334   : > { %3011 = vpow.bf16 %v1380_v27  ;;  %1786 = vmatmul.mubr.bf16.gmra.mrb[36].mxu0 %v3004_v44  ;;  %v1281_v55 = vsub.f32 %v3958_v14, %v1195_v51  ;;  %v1282_v40 = vsub.f32 %v3960_v15, %v1195_v51 }
 0x335   : > { %3013 = vpow.bf16 %v1383_v59  ;;  %v1198_v5 = vpop.xlane.xlu1 %1197  ;;  %v1527_v7 = vadd.f32 %v1462_v52, %v1461_v6  ;;  %v1530_v10 = vadd.f32 %v1464_v4, %v1463_v46 }
 0x336   : > { %v1283_v57 = vsub.f32 %v3962_v16, %v1198_v5  ;;  %v1284_v13 = vsub.f32 %v3966_v18, %v1198_v5 }
 0x337   : > { %v3008_v29 = vpop.eup %3007  ;;  %1528 = vadd.xlane.f32.xlu0 %v1527_v7  ;;  %1531 = vadd.xlane.f32.xlu1 %v1530_v10 }
 0x338   : > { %v3010_v49 = vpop.eup %3009  ;;  %v1337_v34 = vpack.c.bf16 %v1283_v57, %v1281_v55  ;;  %v1338_v23 = vpack.c.bf16 %v1284_v13, %v1282_v40  ;;  %v1465_v61 = vunpack.c.l.bf16 %v3008_v29  ;;  %v1467_v32 = vunpack.c.h.bf16 %v3008_v29 }
 0x339   : > { %1793 = vmatprep.mubr.bf16.mxu0 %v3010_v49  ;;  %v1466_v62 = vunpack.c.l.bf16 %v3010_v49  ;;  %v1468_v63 = vunpack.c.h.bf16 %v3010_v49 }
 0x33a   : > { %v1386_v43 = vmul.bf16 1069105081, %v1337_v34  ;;  %v1389_v2 = vmul.bf16 1069105081, %v1338_v23 }
 0x33b   : > { %v1201_v14 = vpop.xlane.xlu0 %1200  ;;  %v1533_v3 = vadd.f32 %v1466_v62, %v1465_v61  ;;  %v1536_v15 = vadd.f32 %v1468_v63, %v1467_v32 }
 0x33c   : > { %3015 = vpow.bf16 %v1386_v43  ;;  %1794 = vmatmul.mubr.bf16.gmra.mrb[40].mxu0 %v3008_v29  ;;  %v1285_v18 = vsub.f32 %v3970_v9, %v1201_v14  ;;  %v1286_v38 = vsub.f32 %v3972_v21, %v1201_v14 }
 0x33d   : > { %3017 = vpow.bf16 %v1389_v2  ;;  %1534 = vadd.xlane.f32.xlu0 %v1533_v3  ;;  %1537 = vadd.xlane.f32.xlu1 %v1536_v15  ;;  %v1204_v16 = vpop.xlane.xlu1 %1203 }
 0x33e   : > { %v1287_v39 = vsub.f32 %v3974_v45, %v1204_v16  ;;  %v1288_v19 = vsub.f32 %v3978_v53, %v1204_v16 }
 0x33f   : > { %v3012_v41 = vpop.eup %3011 }
 0x340   : > { %v3014_v44 = vpop.eup %3013  ;;  %v1339_v60 = vpack.c.bf16 %v1287_v39, %v1285_v18  ;;  %v1340_v27 = vpack.c.bf16 %v1288_v19, %v1286_v38  ;;  %v1469_v59 = vunpack.c.l.bf16 %v3012_v41  ;;  %v1471_v6 = vunpack.c.h.bf16 %v3012_v41 }
 0x341   : > { %1801 = vmatprep.mubr.bf16.mxu0 %v3014_v44  ;;  %v1470_v46 = vunpack.c.l.bf16 %v3014_v44  ;;  %v1472_v51 = vunpack.c.h.bf16 %v3014_v44 }
 0x342   : > { %v1392_v52 = vmul.bf16 1069105081, %v1339_v60  ;;  %v1395_v4 = vmul.bf16 1069105081, %v1340_v27 }
 0x343   : > { %v1207_v5 = vpop.xlane.xlu0 %1206  ;;  %v1539_v7 = vadd.f32 %v1470_v46, %v1469_v59  ;;  %v1542_v9 = vadd.f32 %v1472_v51, %v1471_v6 }
 0x344   : > { %3019 = vpow.bf16 %v1392_v52  ;;  %1802 = vmatmul.mubr.bf16.gmra.mrb[44].mxu0 %v3012_v41  ;;  %v1289_v45 = vsub.f32 %v3982_v50, %v1207_v5  ;;  %v1290_v53 = vsub.f32 %v3984_v54, %v1207_v5 }
 0x345   : > { %3021 = vpow.bf16 %v1395_v4  ;;  %1540 = vadd.xlane.f32.xlu0 %v1539_v7  ;;  %1543 = vadd.xlane.f32.xlu1 %v1542_v9  ;;  %v1210_v21 = vpop.xlane.xlu1 %1209 }
 0x346   : > { %v1291_v10 = vsub.f32 %v3986_v58, %v1210_v21  ;;  %v1292_v55 = vsub.f32 %v3990_v0, %v1210_v21 }
 0x347   : > { %v3016_v40 = vpop.eup %3015 }
 0x348   : > { %v3018_v57 = vpop.eup %3017  ;;  %v1341_v13 = vpack.c.bf16 %v1291_v10, %v1289_v45  ;;  %v1342_v29 = vpack.c.bf16 %v1292_v55, %v1290_v53  ;;  %v1473_v49 = vunpack.c.l.bf16 %v3016_v40  ;;  %v1475_v34 = vunpack.c.h.bf16 %v3016_v40 }
 0x349   : > { %1809 = vmatprep.mubr.bf16.mxu0 %v3018_v57  ;;  %v1474_v23 = vunpack.c.l.bf16 %v3018_v57  ;;  %v1476_v61 = vunpack.c.h.bf16 %v3018_v57 }
 0x34a   : > { %v1398_v32 = vmul.bf16 1069105081, %v1341_v13  ;;  %v1401_v62 = vmul.bf16 1069105081, %v1342_v29 }
 0x34b   : > { %v1213_v63 = vpop.xlane.xlu0 %1212  ;;  %v1545_v43 = vadd.f32 %v1474_v23, %v1473_v49  ;;  %v1548_v50 = vadd.f32 %v1476_v61, %v1475_v34 }
 0x34c   : > { %3023 = vpow.bf16 %v1398_v32  ;;  %1810 = vmatmul.mubr.bf16.gmra.mrb[48].mxu0 %v3016_v40  ;;  %v1293_v58 = vsub.f32 %v3994_v24, %v1213_v63  ;;  %v1294_v0 = vsub.f32 %v3996_v25, %v1213_v63  ;;  %v2991_v25 = vld [vmem:[#allocation10] sm:$0xff]  }
 0x34d   : > { %3025 = vpow.bf16 %v1401_v62  ;;  %1546 = vadd.xlane.f32.xlu0 %v1545_v43  ;;  %1549 = vadd.xlane.f32.xlu1 %v1548_v50  ;;  %v1216_v54 = vpop.xlane.xlu1 %1215 }
 0x34e   : > { %v1295_v2 = vsub.f32 %v3998_v26, %v1216_v54  ;;  %v1296_v14 = vsub.f32 %v4002_v28, %v1216_v54  ;;  %2834 = vmatprep.subr.bf16.mxu1 %v2991_v25  ;;  %2786 = vmatprep.subr.bf16.mxu0 %v2991_v25 }
 0x34f   : > { %v3020_v3 = vpop.eup %3019  ;;  %2842 = vmatpush3.bf16.msra.mxu1 %v2991_v25  ;;  %2787 = vmatpush3.bf16.msra.mxu0 %v2991_v25 }
 0x350   : > { %v3022_v15 = vpop.eup %3021  ;;  %v1343_v16 = vpack.c.bf16 %v1295_v2, %v1293_v58  ;;  %v1344_v18 = vpack.c.bf16 %v1296_v14, %v1294_v0  ;;  %v1477_v38 = vunpack.c.l.bf16 %v3020_v3  ;;  %v1479_v39 = vunpack.c.h.bf16 %v3020_v3 }
 0x351   : > { %1817 = vmatprep.mubr.bf16.mxu0 %v3022_v15  ;;  %v1478_v19 = vunpack.c.l.bf16 %v3022_v15  ;;  %v1480_v41 = vunpack.c.h.bf16 %v3022_v15 }
 0x352   : > { %v1404_v44 = vmul.bf16 1069105081, %v1343_v16  ;;  %v1407_v60 = vmul.bf16 1069105081, %v1344_v18 }
 0x353   : > { %v1219_v27 = vpop.xlane.xlu0 %1218  ;;  %v1551_v59 = vadd.f32 %v1478_v19, %v1477_v38  ;;  %v1554_v24 = vadd.f32 %v1480_v41, %v1479_v39 }
 0x354   : > { %3027 = vpow.bf16 %v1404_v44  ;;  %1818 = vmatmul.mubr.bf16.gmra.mrb[52].mxu0 %v3020_v3  ;;  %v1297_v26 = vsub.f32 %v4006_v22, %v1219_v27  ;;  %v1298_v6 = vsub.f32 %v4008_v30, %v1219_v27 }
 0x355   : > { %3029 = vpow.bf16 %v1407_v60  ;;  %1552 = vadd.xlane.f32.xlu0 %v1551_v59  ;;  %1555 = vadd.xlane.f32.xlu1 %v1554_v24  ;;  %v1222_v28 = vpop.xlane.xlu1 %1221 }
 0x356   : > { %v1299_v46 = vsub.f32 %v4010_v31, %v1222_v28  ;;  %v1300_v51 = vsub.f32 %v4014_v33, %v1222_v28 }
 0x357   : > { %v3024_v52 = vpop.eup %3023 }
 0x358   : > { %v3026_v4 = vpop.eup %3025  ;;  %v1345_v5 = vpack.c.bf16 %v1299_v46, %v1297_v26  ;;  %v1346_v7 = vpack.c.bf16 %v1300_v51, %v1298_v6  ;;  %v1481_v9 = vunpack.c.l.bf16 %v3024_v52  ;;  %v1483_v21 = vunpack.c.h.bf16 %v3024_v52 }
 0x359   : > { %1825 = vmatprep.mubr.bf16.mxu0 %v3026_v4  ;;  %v1482_v22 = vunpack.c.l.bf16 %v3026_v4  ;;  %v1484_v45 = vunpack.c.h.bf16 %v3026_v4 }
 0x35a   : > { %v1410_v53 = vmul.bf16 1069105081, %v1345_v5  ;;  %v1413_v10 = vmul.bf16 1069105081, %v1346_v7 }
 0x35b   : > { %v1225_v30 = vpop.xlane.xlu0 %1224  ;;  %v1557_v55 = vadd.f32 %v1482_v22, %v1481_v9  ;;  %v1560_v31 = vadd.f32 %v1484_v45, %v1483_v21 }
 0x35c   : > { %3031 = vpow.bf16 %v1410_v53  ;;  %1826 = vmatmul.mubr.bf16.gmra.mrb[56].mxu0 %v3024_v52  ;;  %v1301_v40 = vsub.f32 %v4018_v35, %v1225_v30  ;;  %v1302_v57 = vsub.f32 %v4020_v36, %v1225_v30  ;;  %v2992_v36 = vld [vmem:[#allocation10 + $0x8] sm:$0xff]   ;;  %v4411_v53 = vld [vmem:[#allocation18_spill] sm:$0xff] }
 0x35d   : > { %3033 = vpow.bf16 %v1413_v10  ;;  %1558 = vadd.xlane.f32.xlu0 %v1557_v55  ;;  %1561 = vadd.xlane.f32.xlu1 %v1560_v31  ;;  %v1228_v33 = vpop.xlane.xlu1 %1227  ;;  %v4412_v30 = vld [vmem:[#allocation19_spill] sm:$0xff]  ;;  %v4413_v31 = vld [vmem:[#allocation20_spill] sm:$0xff] }
 0x35e   : > { %v1303_v13 = vsub.f32 %v4022_v37, %v1228_v33  ;;  %v1304_v29 = vsub.f32 %v4026_v42, %v1228_v33  ;;  %2835 = vmatprep.subr.bf16.mxu1 %v2992_v36  ;;  %2788 = vmatprep.subr.bf16.mxu0 %v2992_v36 }
 0x35f   : > { %v3028_v49 = vpop.eup %3027  ;;  %2843 = vmatpush3.bf16.msra.mxu1 %v2992_v36  ;;  %2789 = vmatpush3.bf16.msra.mxu0 %v2992_v36 }
 0x360   : > { %v3030_v34 = vpop.eup %3029  ;;  %v1347_v23 = vpack.c.bf16 %v1303_v13, %v1301_v40  ;;  %v1348_v61 = vpack.c.bf16 %v1304_v29, %v1302_v57  ;;  %v1485_v32 = vunpack.c.l.bf16 %v3028_v49  ;;  %v1487_v62 = vunpack.c.h.bf16 %v3028_v49 }
 0x361   : > { %1833 = vmatprep.mubr.bf16.mxu0 %v3030_v34  ;;  %v1486_v63 = vunpack.c.l.bf16 %v3030_v34  ;;  %v1488_v43 = vunpack.c.h.bf16 %v3030_v34 }
 0x362   : > { %v1416_v50 = vmul.bf16 1069105081, %v1347_v23  ;;  %v1419_v54 = vmul.bf16 1069105081, %v1348_v61 }
 0x363   : > { %v1231_v58 = vpop.xlane.xlu0 %1230  ;;  %v1563_v0 = vadd.f32 %v1486_v63, %v1485_v32  ;;  %v1566_v35 = vadd.f32 %v1488_v43, %v1487_v62 }
 0x364   : > { %3035 = vpow.bf16 %v1416_v50  ;;  %1834 = vmatmul.mubr.bf16.gmra.mrb[60].mxu0 %v3028_v49  ;;  %v1305_v37 = vsub.f32 %v4030_v47, %v1231_v58  ;;  %v1306_v2 = vsub.f32 %v4032_v48, %v1231_v58  ;;  %v2994_v50 = vld [vmem:[#allocation10 + $0x18] sm:$0xff]  }
 0x365   : > { %3037 = vpow.bf16 %v1419_v54  ;;  %1564 = vadd.xlane.f32.xlu0 %v1563_v0  ;;  %1567 = vadd.xlane.f32.xlu1 %v1566_v35  ;;  %v1234_v42 = vpop.xlane.xlu1 %1233  ;;  %v4414_v54 = vld [vmem:[#allocation21_spill] sm:$0xff]  ;;  %v4415_v35 = vld [vmem:[#allocation22_spill] sm:$0xff] }
 0x366   : > { %v1307_v14 = vsub.f32 %v4034_v56, %v1234_v42  ;;  %v1308_v3 = vsub.f32 %v4038_v1, %v1234_v42 }
 0x367   : > { %v3032_v15 = vpop.eup %3031 }
 0x368   : > { %v3034_v16 = vpop.eup %3033  ;;  %v1349_v18 = vpack.c.bf16 %v1307_v14, %v1305_v37  ;;  %v1350_v38 = vpack.c.bf16 %v1308_v3, %v1306_v2  ;;  %v1489_v39 = vunpack.c.l.bf16 %v3032_v15  ;;  %v1491_v19 = vunpack.c.h.bf16 %v3032_v15  ;;  %v4416_v37 = vld [vmem:[#allocation23_spill] sm:$0xff]  ;;  %v4417_v2 = vld [vmem:[#allocation24_spill] sm:$0xff] }
 0x369   : > { %1841 = vmatprep.mubr.bf16.mxu0 %v3034_v16  ;;  %v1490_v47 = vunpack.c.l.bf16 %v3034_v16  ;;  %v1492_v41 = vunpack.c.h.bf16 %v3034_v16 }
 0x36a   : > { %v1422_v44 = vmul.bf16 1069105081, %v1349_v18  ;;  %v1425_v60 = vmul.bf16 1069105081, %v1350_v38 }
 0x36b   : > { %v1237_v48 = vpop.xlane.xlu0 %1236  ;;  %v1569_v27 = vadd.f32 %v1490_v47, %v1489_v39  ;;  %v1572_v56 = vadd.f32 %v1492_v41, %v1491_v19  ;;  %v2995_v19 = vld [vmem:[#allocation10 + $0x20] sm:$0xff]  }
 0x36c   : > { %3039 = vpow.bf16 %v1422_v44  ;;  %1842 = vmatmul.mubr.bf16.gmra.mrb[64].mxu0 %v3032_v15  ;;  %v1309_v59 = vsub.f32 %v4042_v8, %v1237_v48  ;;  %v1310_v24 = vsub.f32 %v4044_v11, %v1237_v48  ;;  %v2993_v11 = vld [vmem:[#allocation10 + $0x10] sm:$0xff]  }
 0x36d   : > { %3041 = vpow.bf16 %v1425_v60  ;;  %1570 = vadd.xlane.f32.xlu0 %v1569_v27  ;;  %1573 = vadd.xlane.f32.xlu1 %v1572_v56  ;;  %v1240_v1 = vpop.xlane.xlu1 %1239 }
 0x36e   : > { %v1311_v25 = vsub.f32 %v4046_v12, %v1240_v1  ;;  %v1312_v26 = vsub.f32 %v4050_v17, %v1240_v1  ;;  %2836 = vmatprep.subr.bf16.mxu1 %v2993_v11  ;;  %2790 = vmatprep.subr.bf16.mxu0 %v2993_v11  ;;  %v2996_v1 = vld [vmem:[#allocation10 + $0x28] sm:$0xff]  }
 0x36f   : > { %v3036_v28 = vpop.eup %3035  ;;  %2844 = vmatpush3.bf16.msra.mxu1 %v2993_v11  ;;  %2791 = vmatpush3.bf16.msra.mxu0 %v2993_v11 }
 0x370   : > { %v3038_v6 = vpop.eup %3037  ;;  %v1351_v46 = vpack.c.bf16 %v1311_v25, %v1309_v59  ;;  %v1352_v51 = vpack.c.bf16 %v1312_v26, %v1310_v24  ;;  %v1493_v52 = vunpack.c.l.bf16 %v3036_v28  ;;  %v1495_v4 = vunpack.c.h.bf16 %v3036_v28  ;;  %2792 = vmatprep.subr.bf16.mxu0 %v2994_v50  ;;  %2837 = vmatprep.subr.bf16.mxu1 %v2994_v50  ;;  %v4418_v59 = vld [vmem:[#allocation25_spill] sm:$0xff]  ;;  %v4419_v26 = vld [vmem:[#allocation26_spill] sm:$0xff] }
 0x371   : > { %1849 = vmatprep.mubr.bf16.mxu0 %v3038_v6  ;;  %v1494_v5 = vunpack.c.l.bf16 %v3038_v6  ;;  %v1496_v7 = vunpack.c.h.bf16 %v3038_v6  ;;  %v4420_v6 = vld [vmem:[#allocation27_spill] sm:$0xff] }
 0x372   : > { %v1428_v9 = vmul.bf16 1069105081, %v1351_v46  ;;  %v1431_v21 = vmul.bf16 1069105081, %v1352_v51  ;;  %v4421_v51 = vld [vmem:[#allocation28_spill] sm:$0xff] }
 0x373   : > { %v1243_v22 = vpop.xlane.xlu0 %1242  ;;  %v1575_v45 = vadd.f32 %v1494_v5, %v1493_v52  ;;  %v1578_v8 = vadd.f32 %v1496_v7, %v1495_v4  ;;  %2793 = vmatpush3.bf16.msra.mxu0 %v2994_v50  ;;  %2845 = vmatpush3.bf16.msra.mxu1 %v2994_v50 }
 0x374   : > { %3043 = vpow.bf16 %v1428_v9  ;;  %1850 = vmatmul.mubr.bf16.gmra.mrb[68].mxu0 %v3036_v28  ;;  %v1313_v12 = vsub.f32 %v4054_v20, %v1243_v22  ;;  %v1314_v10 = vsub.f32 %v4411_v53, %v1243_v22  ;;  %2794 = vmatprep.subr.bf16.mxu0 %v2995_v19 }
 0x375   : > { %3045 = vpow.bf16 %v1431_v21  ;;  %1576 = vadd.xlane.f32.xlu0 %v1575_v45  ;;  %1579 = vadd.xlane.f32.xlu1 %v1578_v8  ;;  %v1246_v17 = vpop.xlane.xlu1 %1245  ;;  %v2997_v45 = vld [vmem:[#allocation10 + $0x30] sm:$0xff]  }
 0x376   : > { %v1315_v55 = vsub.f32 %v4412_v30, %v1246_v17  ;;  %v1316_v33 = vsub.f32 %v4413_v31, %v1246_v17  ;;  %2838 = vmatprep.subr.bf16.mxu1 %v2995_v19  ;;  %v4422_v31 = vld [vmem:[#allocation29_spill] sm:$0xff] }
 0x377   : > { %v3040_v40 = vpop.eup %3039  ;;  %2795 = vmatpush3.bf16.msra.mxu0 %v2995_v19  ;;  %2846 = vmatpush3.bf16.msra.mxu1 %v2995_v19 }
 0x378   : > { %v3042_v57 = vpop.eup %3041  ;;  %v1353_v13 = vpack.c.bf16 %v1315_v55, %v1313_v12  ;;  %v1354_v29 = vpack.c.bf16 %v1316_v33, %v1314_v10  ;;  %v1497_v49 = vunpack.c.l.bf16 %v3040_v40  ;;  %v1499_v34 = vunpack.c.h.bf16 %v3040_v40  ;;  %2796 = vmatprep.subr.bf16.mxu0 %v2996_v1  ;;  %2839 = vmatprep.subr.bf16.mxu1 %v2996_v1  ;;  %v2998_v55 = vld [vmem:[#allocation10 + $0x38] sm:$0xff]  }
 0x379   : > { %1857 = vmatprep.mubr.bf16.mxu0 %v3042_v57  ;;  %v1498_v20 = vunpack.c.l.bf16 %v3042_v57  ;;  %v1500_v23 = vunpack.c.h.bf16 %v3042_v57  ;;  %v4423_v57 = vld [vmem:[#allocation30_spill] sm:$0xff] }
 0x37a   : > { %v1434_v61 = vmul.bf16 1069105081, %v1353_v13  ;;  %v1437_v32 = vmul.bf16 1069105081, %v1354_v29  ;;  %v4424_v29 = vld [vmem:[#allocation31_spill] sm:$0xff] }
 0x37b   : > { %v1249_v62 = vpop.xlane.xlu0 %1248  ;;  %v1581_v63 = vadd.f32 %v1498_v20, %v1497_v49  ;;  %v1584_v43 = vadd.f32 %v1500_v23, %v1499_v34  ;;  %2797 = vmatpush3.bf16.msra.mxu0 %v2996_v1  ;;  %2847 = vmatpush3.bf16.msra.mxu1 %v2996_v1  ;;  %v4425_v34 = vld [vmem:[#allocation32_spill] sm:$0xff] }
 0x37c   : > { %3047 = vpow.bf16 %v1434_v61  ;;  %1858 = vmatmul.mubr.bf16.gmra.mrb[72].mxu0 %v3040_v40  ;;  %v1317_v58 = vsub.f32 %v4414_v54, %v1249_v62  ;;  %v1318_v36 = vsub.f32 %v4415_v35, %v1249_v62  ;;  %2798 = vmatprep.subr.bf16.mxu0 %v2997_v45 }
 0x37d   : > { %3049 = vpow.bf16 %v1437_v32  ;;  %1582 = vadd.xlane.f32.xlu0 %v1581_v63  ;;  %1585 = vadd.xlane.f32.xlu1 %v1584_v43  ;;  %v1252_v0 = vpop.xlane.xlu1 %1251 }
 0x37e   : > { %v1319_v42 = vsub.f32 %v4416_v37, %v1252_v0  ;;  %v1320_v14 = vsub.f32 %v4417_v2, %v1252_v0  ;;  %2840 = vmatprep.subr.bf16.mxu1 %v2997_v45 }
 0x37f   : > { %v3044_v3 = vpop.eup %3043  ;;  %2799 = vmatpush3.bf16.msra.mxu0 %v2997_v45  ;;  %2848 = vmatpush3.bf16.msra.mxu1 %v2997_v45 }
 0x380   : > { %v3046_v15 = vpop.eup %3045  ;;  %v1355_v16 = vpack.c.bf16 %v1319_v42, %v1317_v58  ;;  %v1356_v18 = vpack.c.bf16 %v1320_v14, %v1318_v36  ;;  %v1501_v38 = vunpack.c.l.bf16 %v3044_v3  ;;  %v1503_v39 = vunpack.c.h.bf16 %v3044_v3  ;;  %2800 = vmatprep.subr.bf16.mxu0 %v2998_v55  ;;  %2841 = vmatprep.subr.bf16.mxu1 %v2998_v55 }
 0x381   : > { %1865 = vmatprep.mubr.bf16.mxu0 %v3046_v15  ;;  %v1502_v47 = vunpack.c.l.bf16 %v3046_v15  ;;  %v1504_v41 = vunpack.c.h.bf16 %v3046_v15 }
 0x382   : > { %v1440_v44 = vmul.bf16 1069105081, %v1355_v16  ;;  %v1443_v60 = vmul.bf16 1069105081, %v1356_v18 }
 0x383   : > { %v1255_v48 = vpop.xlane.xlu0 %1254  ;;  %v1587_v27 = vadd.f32 %v1502_v47, %v1501_v38  ;;  %v1590_v56 = vadd.f32 %v1504_v41, %v1503_v39  ;;  %2801 = vmatpush3.bf16.msra.mxu0 %v2998_v55  ;;  %2849 = vmatpush3.bf16.msra.mxu1 %v2998_v55 }
 0x384   : > { %3051 = vpow.bf16 %v1440_v44  ;;  %1866 = vmatmul.mubr.bf16.gmra.mrb[76].mxu0 %v3044_v3  ;;  %v1321_v24 = vsub.f32 %v4418_v59, %v1255_v48  ;;  %v1322_v28 = vsub.f32 %v4419_v26, %v1255_v48 }
 0x385   : > { %3053 = vpow.bf16 %v1443_v60  ;;  %1588 = vadd.xlane.f32.xlu0 %v1587_v27  ;;  %1591 = vadd.xlane.f32.xlu1 %v1590_v56  ;;  %v1258_v25 = vpop.xlane.xlu1 %1257 }
 0x386   : > { %v1323_v46 = vsub.f32 %v4420_v6, %v1258_v25  ;;  %v1324_v52 = vsub.f32 %v4421_v51, %v1258_v25 }
 0x387   : > { %v3048_v4 = vpop.eup %3047 }
 0x388   : > { %v3050_v5 = vpop.eup %3049  ;;  %v1357_v7 = vpack.c.bf16 %v1323_v46, %v1321_v24  ;;  %v1358_v9 = vpack.c.bf16 %v1324_v52, %v1322_v28  ;;  %v1505_v21 = vunpack.c.l.bf16 %v3048_v4  ;;  %v1507_v22 = vunpack.c.h.bf16 %v3048_v4 }
 0x389   : > { %1873 = vmatprep.mubr.bf16.mxu0 %v3050_v5  ;;  %v1506_v8 = vunpack.c.l.bf16 %v3050_v5  ;;  %v1508_v11 = vunpack.c.h.bf16 %v3050_v5 }
 0x38a   : > { %v1446_v12 = vmul.bf16 1069105081, %v1357_v7  ;;  %v1449_v17 = vmul.bf16 1069105081, %v1358_v9 }
 0x38b   : > { %v1261_v53 = vpop.xlane.xlu0 %1260  ;;  %v1593_v10 = vadd.f32 %v1506_v8, %v1505_v21  ;;  %v1596_v30 = vadd.f32 %v1508_v11, %v1507_v22 }
 0x38c   : > { %3055 = vpow.bf16 %v1446_v12  ;;  %1874 = vmatmul.mubr.bf16.gmra.mrb[80].mxu0 %v3048_v4  ;;  %v1325_v33 = vsub.f32 %v4422_v31, %v1261_v53  ;;  %v1326_v13 = vsub.f32 %v4423_v57, %v1261_v53 }
 0x38d   : > { %3057 = vpow.bf16 %v1449_v17  ;;  %1594 = vadd.xlane.f32.xlu0 %v1593_v10  ;;  %1597 = vadd.xlane.f32.xlu1 %v1596_v30  ;;  %v1264_v40 = vpop.xlane.xlu1 %1263 }
 0x38e   : > { %v1327_v49 = vsub.f32 %v4424_v29, %v1264_v40  ;;  %v1328_v20 = vsub.f32 %v4425_v34, %v1264_v40 }
 0x38f   : > { %v3052_v23 = vpop.eup %3051 }
 0x390   : > { %v3054_v61 = vpop.eup %3053  ;;  %v1359_v32 = vpack.c.bf16 %v1327_v49, %v1325_v33  ;;  %v1360_v62 = vpack.c.bf16 %v1328_v20, %v1326_v13  ;;  %v1509_v63 = vunpack.c.l.bf16 %v3052_v23  ;;  %v1511_v43 = vunpack.c.h.bf16 %v3052_v23 }
 0x391   : > { %1881 = vmatprep.mubr.bf16.mxu0 %v3054_v61  ;;  %v1510_v50 = vunpack.c.l.bf16 %v3054_v61  ;;  %v1512_v54 = vunpack.c.h.bf16 %v3054_v61 }
 0x392   : > { %v1452_v58 = vmul.bf16 1069105081, %v1359_v32  ;;  %v1455_v0 = vmul.bf16 1069105081, %v1360_v62 }
 0x393   : > { %v1599_v35 = vadd.f32 %v1510_v50, %v1509_v63  ;;  %v1602_v36 = vadd.f32 %v1512_v54, %v1511_v43 }
 0x394   : > { %3059 = vpow.bf16 %v1452_v58  ;;  %1882 = vmatmul.mubr.bf16.gmra.mrb[84].mxu0 %v3052_v23 }
 0x395   : > { %3061 = vpow.bf16 %v1455_v0  ;;  %1600 = vadd.xlane.f32.xlu0 %v1599_v35  ;;  %1603 = vadd.xlane.f32.xlu1 %v1602_v36 }
 0x397   : > { %v3056_v37 = vpop.eup %3055 }
 0x398   : > { %v3058_v42 = vpop.eup %3057  ;;  %v1513_v2 = vunpack.c.l.bf16 %v3056_v37  ;;  %v1515_v14 = vunpack.c.h.bf16 %v3056_v37 }
 0x399   : > { %1889 = vmatprep.mubr.bf16.mxu0 %v3058_v42  ;;  %v1514_v3 = vunpack.c.l.bf16 %v3058_v42  ;;  %v1516_v15 = vunpack.c.h.bf16 %v3058_v42 }
 0x39b   : > { %v1605_v16 = vadd.f32 %v1514_v3, %v1513_v2  ;;  %v1608_v18 = vadd.f32 %v1516_v15, %v1515_v14 }
 0x39c   : > { %1890 = vmatmul.mubr.bf16.gmra.mrb[88].mxu0 %v3056_v37 }
 0x39d   : > { %1606 = vadd.xlane.f32.xlu0 %v1605_v16  ;;  %1609 = vadd.xlane.f32.xlu1 %v1608_v18 }
 0x39f   : > { %v3060_v38 = vpop.eup %3059 }
 0x3a0   : > { %v3062_v39 = vpop.eup %3061  ;;  %v1519_v19 = vunpack.c.h.bf16 %v3060_v38  ;;  %v1517_v47 = vunpack.c.l.bf16 %v3060_v38 }
 0x3a1   : > { %1897 = vmatprep.mubr.bf16.mxu0 %v3062_v39  ;;  %v1520_v41 = vunpack.c.h.bf16 %v3062_v39  ;;  %v1518_v44 = vunpack.c.l.bf16 %v3062_v39 }
 0x3a3   : > { %v1614_v60 = vadd.f32 %v1520_v41, %v1519_v19  ;;  %v1611_v48 = vadd.f32 %v1518_v44, %v1517_v47 }
 0x3a4   : > { %1898 = vmatmul.mubr.bf16.gmra.mrb[92].mxu0 %v3060_v38 }
 0x3a5   : > { %1615 = vadd.xlane.f32.xlu1 %v1614_v60  ;;  %1612 = vadd.xlane.f32.xlu0 %v1611_v48 }
 0x3bc   : > { %v1523_v27 = vpop.xlane.xlu0 %1522  ;;  %v1526_v56 = vpop.xlane.xlu1 %1525 }
 0x3bd   : > { %3063 = vrcp.f32 %v1523_v27 }
 0x3be   : > { %3065 = vrcp.f32 %v1526_v56 }
 0x3c4   : > { %v1529_v1 = vpop.xlane.xlu0 %1528  ;;  %v1532_v59 = vpop.xlane.xlu1 %1531 }
 0x3c5   : > { %3067 = vrcp.f32 %v1529_v1 }
 0x3c6   : > { %3069 = vrcp.f32 %v1532_v59 }
 0x3c7   : > { %v3064_v46 = vpop.eup %3063 }
 0x3c8   : > { %v3066_v52 = vpop.eup %3065 }
 0x3ca   : > { %v1535_v7 = vpop.xlane.xlu0 %1534  ;;  %v1538_v9 = vpop.xlane.xlu1 %1537 }
 0x3cb   : > { %3071 = vrcp.f32 %v1535_v7 }
 0x3cc   : > { %3073 = vrcp.f32 %v1538_v9 }
 0x3cf   : > { %v3068_v17 = vpop.eup %3067 }
 0x3d0   : > { %v3070_v10 = vpop.eup %3069 }
 0x3d2   : > { %v1541_v31 = vpop.xlane.xlu0 %1540  ;;  %v1544_v33 = vpop.xlane.xlu1 %1543 }
 0x3d3   : > { %3075 = vrcp.f32 %v1541_v31 }
 0x3d4   : > { %3077 = vrcp.f32 %v1544_v33 }
 0x3d5   : > { %v3072_v20 = vpop.eup %3071 }
 0x3d6   : > { %v3074_v61 = vpop.eup %3073 }
 0x3da   : > { %v1547_v63 = vpop.xlane.xlu0 %1546  ;;  %v1550_v43 = vpop.xlane.xlu1 %1549 }
 0x3db   : > { %3079 = vrcp.f32 %v1547_v63 }
 0x3dc   : > { %3081 = vrcp.f32 %v1550_v43 }
 0x3dd   : > { %v3076_v37 = vpop.eup %3075 }
 0x3de   : > { %v3078_v2 = vpop.eup %3077 }
 0x3e2   : > { %v1553_v15 = vpop.xlane.xlu0 %1552  ;;  %v1556_v16 = vpop.xlane.xlu1 %1555 }
 0x3e3   : > { %3083 = vrcp.f32 %v1553_v15 }
 0x3e4   : > { %3085 = vrcp.f32 %v1556_v16 }
 0x3e5   : > { %v3080_v44 = vpop.eup %3079 }
 0x3e6   : > { %v3082_v48 = vpop.eup %3081 }
 0x3ea   : > { %v1559_v1 = vpop.xlane.xlu0 %1558  ;;  %v1562_v59 = vpop.xlane.xlu1 %1561 }
 0x3eb   : > { %3087 = vrcp.f32 %v1559_v1 }
 0x3ec   : > { %3089 = vrcp.f32 %v1562_v59 }
 0x3f2   : > { %v1565_v9 = vpop.xlane.xlu0 %1564 }
 0x3f3   : > { %3091 = vrcp.f32 %v1565_v9 }
 0x3fa   : > { %v1571_v33 = vpop.xlane.xlu0 %1570 }
 0x3ff   : > { %v2618_v24 = vpop.f32.mrb[32].mxu0 }
 0x400   : > { %v2619_v25 = vpop.f32.mrb[33].mxu0 }
 0x401   : > { %v2620_v26 = vadd.f32 %v2619_v25, %v2618_v24  ;;  %v2621_v28 = vpop.f32.mrb[34].mxu0 }
 0x402   : > { %v2622_v6 = vpop.f32.mrb[35].mxu0  ;;  %v1577_v43 = vpop.xlane.xlu0 %1576 }
 0x403   : > { %v2623_v51 = vadd.f32 %v2622_v6, %v2621_v28  ;;  %v1938_v4 = vmul.f32 %v3064_v46, %v2620_v26 }
 0x405   : > { %v1939_v5 = vmul.f32 %v3066_v52, %v2623_v51  ;;  %v3084_v51 = vpop.eup %3083 }
 0x407   : > { %v2624_v21 = vpop.f32.mrb[36].mxu0  ;;  %v1970_v22 = vpack.c.bf16 %v1939_v5, %v1938_v4  ;;  %v3086_v4 = vpop.eup %3085 }
 0x408   : > { %v2625_v45 = vpop.f32.mrb[37].mxu0 }
 0x409   : > { %v2626_v8 = vadd.f32 %v2625_v45, %v2624_v21  ;;  %v2627_v11 = vpop.f32.mrb[38].mxu0  ;;  %2802 = vmatprep.mubr.bf16.mxu0 %v1970_v22  ;;  %v1568_v21 = vpop.xlane.xlu1 %1567 }
 0x40a   : > { %v2628_v12 = vpop.f32.mrb[39].mxu0  ;;  %3093 = vrcp.f32 %v1568_v21  ;;  %v1583_v16 = vpop.xlane.xlu0 %1582 }
 0x40b   : > { %v2629_v53 = vadd.f32 %v2628_v12, %v2627_v11  ;;  %v1940_v30 = vmul.f32 %v3068_v17, %v2626_v8  ;;  %3095 = vrcp.f32 %v1571_v33 }
 0x40d   : > { %v1941_v55 = vmul.f32 %v3070_v10, %v2629_v53  ;;  %v3088_v53 = vpop.eup %3087 }
 0x40f   : > { %v1971_v40 = vpack.c.bf16 %v1941_v55, %v1940_v30  ;;  %v2630_v57 = vpop.f32.mrb[40].mxu0  ;;  %v3090_v30 = vpop.eup %3089 }
 0x410   : > { %v2631_v13 = vpop.f32.mrb[41].mxu0 }
 0x411   : > { %v2632_v29 = vadd.f32 %v2631_v13, %v2630_v57  ;;  %v2633_v49 = vpop.f32.mrb[42].mxu0  ;;  %2803 = vmatmul.mubr.bf16.vlgmr.msra.gmra.mrb[96].mxu0 %v1971_v40  ;;  %v1574_v40 = vpop.xlane.xlu1 %1573 }
 0x412   : > { %v2634_v34 = vpop.f32.mrb[43].mxu0  ;;  %3097 = vrcp.f32 %v1574_v40  ;;  %v1589_v59 = vpop.xlane.xlu0 %1588 }
 0x413   : > { %v2635_v23 = vadd.f32 %v2634_v34, %v2633_v49  ;;  %v1942_v32 = vmul.f32 %v3072_v20, %v2632_v29  ;;  %3099 = vrcp.f32 %v1577_v43 }
 0x415   : > { %v1943_v62 = vmul.f32 %v3074_v61, %v2635_v23  ;;  %v3092_v23 = vpop.eup %3091 }
 0x417   : > { %v2636_v50 = vpop.f32.mrb[44].mxu0  ;;  %v1972_v54 = vpack.c.bf16 %v1943_v62, %v1942_v32  ;;  %v3094_v32 = vpop.eup %3093 }
 0x418   : > { %v2637_v58 = vpop.f32.mrb[45].mxu0 }
 0x419   : > { %v2638_v0 = vadd.f32 %v2637_v58, %v2636_v50  ;;  %v2639_v35 = vpop.f32.mrb[46].mxu0  ;;  %2806 = vmatprep.mubr.bf16.mxu0 %v1972_v54  ;;  %v1580_v50 = vpop.xlane.xlu1 %1579 }
 0x41a   : > { %v2640_v36 = vpop.f32.mrb[47].mxu0  ;;  %3101 = vrcp.f32 %v1580_v50  ;;  %v1595_v21 = vpop.xlane.xlu0 %1594 }
 0x41b   : > { %v2641_v42 = vadd.f32 %v2640_v36, %v2639_v35  ;;  %v1944_v14 = vmul.f32 %v3076_v37, %v2638_v0  ;;  %3103 = vrcp.f32 %v1583_v16 }
 0x41d   : > { %v1945_v3 = vmul.f32 %v3078_v2, %v2641_v42  ;;  %v3096_v42 = vpop.eup %3095 }
 0x41f   : > { %v2642_v18 = vpop.f32.mrb[48].mxu0  ;;  %v1973_v38 = vpack.c.bf16 %v1945_v3, %v1944_v14  ;;  %v3098_v14 = vpop.eup %3097 }
 0x420   : > { %v2643_v39 = vpop.f32.mrb[49].mxu0 }
 0x421   : > { %v2644_v19 = vadd.f32 %v2643_v39, %v2642_v18  ;;  %v2645_v47 = vpop.f32.mrb[50].mxu0  ;;  %2807 = vmatmul.mubr.bf16.gmra.mrb[100].mxu0 %v1973_v38  ;;  %v1586_v18 = vpop.xlane.xlu1 %1585 }
 0x422   : > { %v2646_v41 = vpop.f32.mrb[51].mxu0  ;;  %3105 = vrcp.f32 %v1586_v18  ;;  %v1601_v40 = vpop.xlane.xlu0 %1600 }
 0x423   : > { %v2647_v60 = vadd.f32 %v2646_v41, %v2645_v47  ;;  %v1946_v27 = vmul.f32 %v3080_v44, %v2644_v19  ;;  %3107 = vrcp.f32 %v1589_v59 }
 0x425   : > { %v1947_v56 = vmul.f32 %v3082_v48, %v2647_v60  ;;  %v3100_v60 = vpop.eup %3099 }
 0x427   : > { %v2648_v24 = vpop.f32.mrb[52].mxu0  ;;  %v1974_v25 = vpack.c.bf16 %v1947_v56, %v1946_v27  ;;  %v3102_v27 = vpop.eup %3101 }
 0x428   : > { %v2649_v26 = vpop.f32.mrb[53].mxu0 }
 0x429   : > { %v2650_v28 = vadd.f32 %v2649_v26, %v2648_v24  ;;  %v2651_v6 = vpop.f32.mrb[54].mxu0  ;;  %2810 = vmatprep.mubr.bf16.mxu1 %v1974_v25  ;;  %v1592_v24 = vpop.xlane.xlu1 %1591 }
 0x42a   : > { %v2652_v46 = vpop.f32.mrb[55].mxu0  ;;  %3109 = vrcp.f32 %v1592_v24  ;;  %v1607_v50 = vpop.xlane.xlu0 %1606 }
 0x42b   : > { %v2653_v52 = vadd.f32 %v2652_v46, %v2651_v6  ;;  %v1948_v5 = vmul.f32 %v3084_v51, %v2650_v28  ;;  %3111 = vrcp.f32 %v1595_v21  ;;  %v4169_v21 = vld [vmem:[%s4426_s25] ss:$0 sm:$0xff] }
 0x42d   : > { %v1949_v7 = vmul.f32 %v3086_v4, %v2653_v52  ;;  %v3104_v52 = vpop.eup %3103 }
 0x42f   : > { %v1975_v22 = vpack.c.bf16 %v1949_v7, %v1948_v5  ;;  %v2654_v45 = vpop.f32.mrb[56].mxu0  ;;  %v3106_v5 = vpop.eup %3105 }
 0x430   : > { %v2655_v8 = vpop.f32.mrb[57].mxu0 }
 0x431   : > { %v2656_v11 = vadd.f32 %v2655_v8, %v2654_v45  ;;  %v2657_v12 = vpop.f32.mrb[58].mxu0  ;;  %2811 = vmatmul.mubr.bf16.vlgmr.msra.gmra.mrb[64].mxu1 %v1975_v22  ;;  %v1598_v22 = vpop.xlane.xlu1 %1597 }
 0x432   : > { %v2658_v17 = vpop.f32.mrb[59].mxu0  ;;  %3113 = vrcp.f32 %v1598_v22  ;;  %v1613_v18 = vpop.xlane.xlu0 %1612 }
 0x433   : > { %v2659_v10 = vadd.f32 %v2658_v17, %v2657_v12  ;;  %v1950_v55 = vmul.f32 %v3088_v53, %v2656_v11  ;;  %3115 = vrcp.f32 %v1601_v40  ;;  %v3129_v40 = vld [vmem:[%s3724_s23 + $0x18] sm:$0xff] }
 0x435   : > { %v1951_v31 = vmul.f32 %v3090_v30, %v2659_v10  ;;  %v3108_v10 = vpop.eup %3107 }
 0x437   : > { %v2660_v57 = vpop.f32.mrb[60].mxu0  ;;  %v1976_v13 = vpack.c.bf16 %v1951_v31, %v1950_v55  ;;  %v3110_v55 = vpop.eup %3109 }
 0x438   : > { %v2661_v29 = vpop.f32.mrb[61].mxu0 }
 0x439   : > { %v2662_v49 = vadd.f32 %v2661_v29, %v2660_v57  ;;  %v2663_v34 = vpop.f32.mrb[62].mxu0  ;;  %2814 = vmatprep.mubr.bf16.mxu1 %v1976_v13  ;;  %v1604_v57 = vpop.xlane.xlu1 %1603 }
 0x43a   : > { %v2664_v20 = vpop.f32.mrb[63].mxu0  ;;  %3117 = vrcp.f32 %v1604_v57 }
 0x43b   : > { %v2665_v61 = vadd.f32 %v2664_v20, %v2663_v34  ;;  %v1952_v62 = vmul.f32 %v3092_v23, %v2662_v49  ;;  %3119 = vrcp.f32 %v1607_v50  ;;  %v3132_v50 = vld [vmem:[%s3724_s23 + $0x20] sm:$0xff] }
 0x43d   : > { %v1953_v63 = vmul.f32 %v3094_v32, %v2665_v61  ;;  %v3112_v61 = vpop.eup %3111 }
 0x43f   : > { %v2666_v54 = vpop.f32.mrb[64].mxu0  ;;  %v1977_v58 = vpack.c.bf16 %v1953_v63, %v1952_v62  ;;  %v3114_v62 = vpop.eup %3113 }
 0x440   : > { %v2667_v0 = vpop.f32.mrb[65].mxu0 }
 0x441   : > { %v2668_v35 = vadd.f32 %v2667_v0, %v2666_v54  ;;  %v2669_v36 = vpop.f32.mrb[66].mxu0  ;;  %2815 = vmatmul.mubr.bf16.gmra.mrb[68].mxu1 %v1977_v58  ;;  %v1610_v54 = vpop.xlane.xlu1 %1609 }
 0x442   : > { %v2670_v37 = vpop.f32.mrb[67].mxu0  ;;  %3121 = vrcp.f32 %v1610_v54 }
 0x443   : > { %v2671_v2 = vadd.f32 %v2670_v37, %v2669_v36  ;;  %v1954_v3 = vmul.f32 %v3096_v42, %v2668_v35  ;;  %3123 = vrcp.f32 %v1613_v18 }
 0x445   : > { %v1955_v15 = vmul.f32 %v3098_v14, %v2671_v2  ;;  %v3116_v2 = vpop.eup %3115 }
 0x447   : > { %v2672_v38 = vpop.f32.mrb[68].mxu0  ;;  %v1978_v39 = vpack.c.bf16 %v1955_v15, %v1954_v3  ;;  %v3118_v3 = vpop.eup %3117 }
 0x448   : > { %v2673_v19 = vpop.f32.mrb[69].mxu0 }
 0x449   : > { %v2674_v47 = vadd.f32 %v2673_v19, %v2672_v38  ;;  %v2675_v41 = vpop.f32.mrb[70].mxu0  ;;  %2818 = vmatprep.mubr.bf16.mxu1 %v1978_v39  ;;  %v1616_v38 = vpop.xlane.xlu1 %1615 }
 0x44a   : > { %v2676_v44 = vpop.f32.mrb[71].mxu0  ;;  %3125 = vrcp.f32 %v1616_v38 }
 0x44b   : > { %v2677_v48 = vadd.f32 %v2676_v44, %v2675_v41  ;;  %v1956_v56 = vmul.f32 %v3100_v60, %v2674_v47 }
 0x44d   : > { %v1957_v1 = vmul.f32 %v3102_v27, %v2677_v48  ;;  %v3120_v48 = vpop.eup %3119 }
 0x44f   : > { %v2678_v25 = vpop.f32.mrb[72].mxu0  ;;  %v1979_v26 = vpack.c.bf16 %v1957_v1, %v1956_v56  ;;  %v3122_v56 = vpop.eup %3121 }
 0x450   : > { %v2679_v28 = vpop.f32.mrb[73].mxu0 }
 0x451   : > { %v2680_v6 = vadd.f32 %v2679_v28, %v2678_v25  ;;  %v2681_v46 = vpop.f32.mrb[74].mxu0  ;;  %2819 = vmatmul.mubr.bf16.gmra.mrb[72].mxu1 %v1979_v26 }
 0x452   : > { %v2682_v51 = vpop.f32.mrb[75].mxu0 }
 0x453   : > { %v2683_v4 = vadd.f32 %v2682_v51, %v2681_v46  ;;  %v1958_v7 = vmul.f32 %v3104_v52, %v2680_v6  ;;  %v3124_v51 = vpop.eup %3123 }
 0x455   : > { %v1959_v9 = vmul.f32 %v3106_v5, %v2683_v4  ;;  %v3126_v4 = vpop.eup %3125 }
 0x457   : > { %v2684_v45 = vpop.f32.mrb[76].mxu0  ;;  %v1980_v8 = vpack.c.bf16 %v1959_v9, %v1958_v7 }
 0x458   : > { %v2685_v11 = vpop.f32.mrb[77].mxu0 }
 0x459   : > { %v2686_v12 = vadd.f32 %v2685_v11, %v2684_v45  ;;  %v2687_v17 = vpop.f32.mrb[78].mxu0  ;;  %2822 = vmatprep.mubr.bf16.mxu1 %v1980_v8 }
 0x45a   : > { %v2688_v53 = vpop.f32.mrb[79].mxu0 }
 0x45b   : > { %v2689_v30 = vadd.f32 %v2688_v53, %v2687_v17  ;;  %v1960_v31 = vmul.f32 %v3108_v10, %v2686_v12  ;;  %v3127_v17 = vld [vmem:[%s3724_s23 + $0x10] sm:$0xff] }
 0x45d   : > { %v1961_v33 = vmul.f32 %v3110_v55, %v2689_v30  ;;  %v3128_v55 = vld [vmem:[%s3724_s23] sm:$0xff] }
 0x45f   : > { %v2690_v13 = vpop.f32.mrb[80].mxu0  ;;  %v1981_v29 = vpack.c.bf16 %v1961_v33, %v1960_v31 }
 0x460   : > { %v2691_v49 = vpop.f32.mrb[81].mxu0 }
 0x461   : > { %v2692_v34 = vadd.f32 %v2691_v49, %v2690_v13  ;;  %v2693_v20 = vpop.f32.mrb[82].mxu0  ;;  %2823 = vmatmul.mubr.bf16.gmra.mrb[76].mxu1 %v1981_v29  ;;  %v3130_v13 = vld [vmem:[%s3724_s23 + $0x8] sm:$0xff] }
 0x462   : > { %v2694_v23 = vpop.f32.mrb[83].mxu0 }
 0x463   : > { %v2695_v32 = vadd.f32 %v2694_v23, %v2693_v20  ;;  %v1962_v63 = vmul.f32 %v3112_v61, %v2692_v34 }
 0x465   : > { %v1963_v43 = vmul.f32 %v3114_v62, %v2695_v32  ;;  %v3131_v32 = vld [vmem:[%s3724_s23 + $0x30] sm:$0xff] }
 0x467   : > { %v2696_v58 = vpop.f32.mrb[84].mxu0  ;;  %v1982_v0 = vpack.c.bf16 %v1963_v43, %v1962_v63 }
 0x468   : > { %v2697_v35 = vpop.f32.mrb[85].mxu0 }
 0x469   : > { %v2698_v36 = vadd.f32 %v2697_v35, %v2696_v58  ;;  %v2699_v37 = vpop.f32.mrb[86].mxu0  ;;  %2826 = vmatprep.mubr.bf16.mxu1 %v1982_v0  ;;  %v3133_v0 = vld [vmem:[%s3724_s23 + $0x38] sm:$0xff] }
 0x46a   : > { %v2700_v42 = vpop.f32.mrb[87].mxu0 }
 0x46b   : > { %v2701_v14 = vadd.f32 %v2700_v42, %v2699_v37  ;;  %v1964_v15 = vmul.f32 %v3116_v2, %v2698_v36  ;;  %v3134_v36 = vld [vmem:[%s3724_s23 + $0x28] sm:$0xff] }
 0x46d   : > { %v1965_v16 = vmul.f32 %v3118_v3, %v2701_v14 }
 0x46f   : > { %v2702_v39 = vpop.f32.mrb[88].mxu0  ;;  %v1983_v19 = vpack.c.bf16 %v1965_v16, %v1964_v15  ;;  %v3135_v16 = vld [vmem:[%s3724_s23 + $0x50] sm:$0xff] }
 0x470   : > { %v2703_v47 = vpop.f32.mrb[89].mxu0 }
 0x471   : > { %v2704_v41 = vadd.f32 %v2703_v47, %v2702_v39  ;;  %v2705_v44 = vpop.f32.mrb[90].mxu0  ;;  %2827 = vmatmul.mubr.bf16.gmra.mrb[80].mxu1 %v1983_v19  ;;  %v3136_v19 = vld [vmem:[%s3724_s23 + $0x40] sm:$0xff] }
 0x472   : > { %v2706_v60 = vpop.f32.mrb[91].mxu0 }
 0x473   : > { %v2707_v27 = vadd.f32 %v2706_v60, %v2705_v44  ;;  %v1966_v1 = vmul.f32 %v3120_v48, %v2704_v41  ;;  %v3137_v44 = vld [vmem:[%s3724_s23 + $0x58] sm:$0xff]  ;;  %v3138_v48 = vld [vmem:[%s3724_s23 + $0x48] sm:$0xff] }
 0x475   : > { %v1967_v59 = vmul.f32 %v3122_v56, %v2707_v27 }
 0x477   : > { %v2708_v24 = vpop.f32.mrb[92].mxu0  ;;  %v1984_v25 = vpack.c.bf16 %v1967_v59, %v1966_v1 }
 0x478   : > { %v2709_v26 = vpop.f32.mrb[93].mxu0 }
 0x479   : > { %v2710_v28 = vadd.f32 %v2709_v26, %v2708_v24  ;;  %v2711_v6 = vpop.f32.mrb[94].mxu0  ;;  %2830 = vmatprep.mubr.bf16.mxu1 %v1984_v25  ;;  %v3139_v26 = vld [vmem:[%s3724_s23 + $0x70] sm:$0xff] }
 0x47a   : > { %v2712_v46 = vpop.f32.mrb[95].mxu0 }
 0x47b   : > { %v2713_v52 = vadd.f32 %v2712_v46, %v2711_v6  ;;  %v1968_v5 = vmul.f32 %v3124_v51, %v2710_v28  ;;  %v3140_v51 = vld [vmem:[%s3724_s23 + $0x60] sm:$0xff] }
 0x47d   : > { %v1969_v7 = vmul.f32 %v3126_v4, %v2713_v52 }
 0x47f   : > { %v1985_v9 = vpack.c.bf16 %v1969_v7, %v1968_v5  ;;  %v3141_v5 = vld [vmem:[%s3724_s23 + $0x78] sm:$0xff] }
 0x481   : > { %2831 = vmatmul.mubr.bf16.gmra.mrb[84].mxu1 %v1985_v9  ;;  %v3142_v9 = vld [vmem:[%s3724_s23 + $0x68] sm:$0xff] }
 0x4e4   : > { %v2804_v22 = vpop.f32.mrb[96].mxu0 }
 0x4e5   : > { %v2100_v45 = vadd.f32 %v2804_v22, %v4169_v21  ;;  %v2091_v8 = vpop.f32.mrb[97].mxu0 }
 0x4e6   : > { %v2092_v11 = vadd.f32 %v4169_v21, %v2091_v8  ;;  %v2805_v12 = vpop.f32.mrb[98].mxu0 }
 0x4e7   : > { %v2220_v53 = vadd.f32 %v3127_v17, %v2100_v45  ;;  %v2103_v10 = vadd.f32 %v2805_v12, %v4169_v21  ;;  %v2094_v30 = vpop.f32.mrb[99].mxu0 }
 0x4e8   : > { %v2218_v31 = vadd.f32 %v3128_v55, %v2092_v11  ;;  %v2095_v33 = vadd.f32 %v4169_v21, %v2094_v30 }
 0x4e9   : > { %2252 = vst [vmem:[%s4179_s27 + $0x10] sm:$0xff] %v2220_v53  ;;  %v2221_v57 = vadd.f32 %v3129_v40, %v2103_v10  ;;  %v3143_v53 = vld [vmem:[%s3724_s23 + $0x90] sm:$0xff] }
 0x4ea   : > { %2250 = vst [vmem:[%s4179_s27] sm:$0xff] %v2218_v31  ;;  %v2219_v29 = vadd.f32 %v3130_v13, %v2095_v33  ;;  %v3144_v31 = vld [vmem:[%s3724_s23 + $0x80] sm:$0xff] }
 0x4eb   : > { %2253 = vst [vmem:[%s4179_s27 + $0x18] sm:$0xff] %v2221_v57  ;;  %v3145_v57 = vld [vmem:[%s3724_s23 + $0x98] sm:$0xff] }
 0x4ec   : > { %2251 = vst [vmem:[%s4179_s27 + $0x8] sm:$0xff] %v2219_v29  ;;  %v3146_v29 = vld [vmem:[%s3724_s23 + $0x88] sm:$0xff] }
 0x4f4   : > { %v2808_v49 = vpop.f32.mrb[100].mxu0 }
 0x4f5   : > { %v2116_v34 = vadd.f32 %v2808_v49, %v4169_v21  ;;  %v2107_v20 = vpop.f32.mrb[101].mxu0 }
 0x4f6   : > { %v2108_v23 = vadd.f32 %v4169_v21, %v2107_v20  ;;  %v2809_v61 = vpop.f32.mrb[102].mxu0 }
 0x4f7   : > { %v2224_v62 = vadd.f32 %v3131_v32, %v2116_v34  ;;  %v2119_v63 = vadd.f32 %v2809_v61, %v4169_v21  ;;  %v2110_v43 = vpop.f32.mrb[103].mxu0 }
 0x4f8   : > { %v2222_v54 = vadd.f32 %v3132_v50, %v2108_v23  ;;  %v2111_v58 = vadd.f32 %v4169_v21, %v2110_v43 }
 0x4f9   : > { %2256 = vst [vmem:[%s4179_s27 + $0x30] sm:$0xff] %v2224_v62  ;;  %v2225_v35 = vadd.f32 %v3133_v0, %v2119_v63  ;;  %v3147_v62 = vld [vmem:[%s3724_s23 + $0xb0] sm:$0xff] }
 0x4fa   : > { %2254 = vst [vmem:[%s4179_s27 + $0x20] sm:$0xff] %v2222_v54  ;;  %v2223_v37 = vadd.f32 %v3134_v36, %v2111_v58  ;;  %v3148_v54 = vld [vmem:[%s3724_s23 + $0xa0] sm:$0xff] }
 0x4fb   : > { %2257 = vst [vmem:[%s4179_s27 + $0x38] sm:$0xff] %v2225_v35  ;;  %v3149_v35 = vld [vmem:[%s3724_s23 + $0xb8] sm:$0xff] }
 0x4fc   : > { %2255 = vst [vmem:[%s4179_s27 + $0x28] sm:$0xff] %v2223_v37  ;;  %v3150_v37 = vld [vmem:[%s3724_s23 + $0xa8] sm:$0xff] }
 0x504   : > { %v2812_v42 = vpop.f32.mrb[64].mxu1 }
 0x505   : > { %v2132_v2 = vadd.f32 %v2812_v42, %v4169_v21  ;;  %v2123_v14 = vpop.f32.mrb[65].mxu1 }
 0x506   : > { %v2124_v3 = vadd.f32 %v4169_v21, %v2123_v14  ;;  %v2813_v15 = vpop.f32.mrb[66].mxu1 }
 0x507   : > { %v2228_v18 = vadd.f32 %v3135_v16, %v2132_v2  ;;  %v2135_v38 = vadd.f32 %v2813_v15, %v4169_v21  ;;  %v2126_v39 = vpop.f32.mrb[67].mxu1 }
 0x508   : > { %v2226_v47 = vadd.f32 %v3136_v19, %v2124_v3  ;;  %v2127_v41 = vadd.f32 %v4169_v21, %v2126_v39 }
 0x509   : > { %2260 = vst [vmem:[%s4179_s27 + $0x50] sm:$0xff] %v2228_v18  ;;  %v2229_v60 = vadd.f32 %v3137_v44, %v2135_v38  ;;  %v3151_v18 = vld [vmem:[%s3724_s23 + $0xd0] sm:$0xff] }
 0x50a   : > { %2258 = vst [vmem:[%s4179_s27 + $0x40] sm:$0xff] %v2226_v47  ;;  %v2227_v27 = vadd.f32 %v3138_v48, %v2127_v41  ;;  %v3152_v47 = vld [vmem:[%s3724_s23 + $0xc0] sm:$0xff] }
 0x50b   : > { %2261 = vst [vmem:[%s4179_s27 + $0x58] sm:$0xff] %v2229_v60  ;;  %v3153_v60 = vld [vmem:[%s3724_s23 + $0xd8] sm:$0xff] }
 0x50c   : > { %2259 = vst [vmem:[%s4179_s27 + $0x48] sm:$0xff] %v2227_v27  ;;  %v3154_v27 = vld [vmem:[%s3724_s23 + $0xc8] sm:$0xff] }
 0x514   : > { %v2816_v56 = vpop.f32.mrb[68].mxu1 }
 0x515   : > { %v2148_v1 = vadd.f32 %v2816_v56, %v4169_v21  ;;  %v2139_v59 = vpop.f32.mrb[69].mxu1 }
 0x516   : > { %v2140_v24 = vadd.f32 %v4169_v21, %v2139_v59  ;;  %v2817_v25 = vpop.f32.mrb[70].mxu1 }
 0x517   : > { %v2232_v28 = vadd.f32 %v3139_v26, %v2148_v1  ;;  %v2151_v6 = vadd.f32 %v2817_v25, %v4169_v21  ;;  %v2142_v46 = vpop.f32.mrb[71].mxu1 }
 0x518   : > { %v2230_v52 = vadd.f32 %v3140_v51, %v2140_v24  ;;  %v2143_v4 = vadd.f32 %v4169_v21, %v2142_v46 }
 0x519   : > { %2264 = vst [vmem:[%s4179_s27 + $0x70] sm:$0xff] %v2232_v28  ;;  %v2233_v7 = vadd.f32 %v3141_v5, %v2151_v6  ;;  %v3155_v28 = vld [vmem:[%s3724_s23 + $0xf0] sm:$0xff] }
 0x51a   : > { %2262 = vst [vmem:[%s4179_s27 + $0x60] sm:$0xff] %v2230_v52  ;;  %v2231_v22 = vadd.f32 %v3142_v9, %v2143_v4  ;;  %v3156_v52 = vld [vmem:[%s3724_s23 + $0xe0] sm:$0xff] }
 0x51b   : > { %2265 = vst [vmem:[%s4179_s27 + $0x78] sm:$0xff] %v2233_v7  ;;  %v3157_v7 = vld [vmem:[%s3724_s23 + $0xf8] sm:$0xff] }
 0x51c   : > { %2263 = vst [vmem:[%s4179_s27 + $0x68] sm:$0xff] %v2231_v22  ;;  %v3158_v22 = vld [vmem:[%s3724_s23 + $0xe8] sm:$0xff] }
 0x524   : > { %v2820_v45 = vpop.f32.mrb[72].mxu1 }
 0x525   : > { %v2164_v8 = vadd.f32 %v2820_v45, %v4169_v21  ;;  %v2155_v11 = vpop.f32.mrb[73].mxu1 }
 0x526   : > { %v2156_v12 = vadd.f32 %v4169_v21, %v2155_v11  ;;  %v2821_v17 = vpop.f32.mrb[74].mxu1 }
 0x527   : > { %v2236_v10 = vadd.f32 %v3143_v53, %v2164_v8  ;;  %v2167_v30 = vadd.f32 %v2821_v17, %v4169_v21  ;;  %v2158_v55 = vpop.f32.mrb[75].mxu1 }
 0x528   : > { %v2234_v33 = vadd.f32 %v3144_v31, %v2156_v12  ;;  %v2159_v40 = vadd.f32 %v4169_v21, %v2158_v55 }
 0x529   : > { %2268 = vst [vmem:[%s4179_s27 + $0x90] sm:$0xff] %v2236_v10  ;;  %v2237_v13 = vadd.f32 %v3145_v57, %v2167_v30 }
 0x52a   : > { %2266 = vst [vmem:[%s4179_s27 + $0x80] sm:$0xff] %v2234_v33  ;;  %v2235_v49 = vadd.f32 %v3146_v29, %v2159_v40 }
 0x52b   : > { %2269 = vst [vmem:[%s4179_s27 + $0x98] sm:$0xff] %v2237_v13 }
 0x52c   : > { %2267 = vst [vmem:[%s4179_s27 + $0x88] sm:$0xff] %v2235_v49 }
 0x534   : > { %v2824_v34 = vpop.f32.mrb[76].mxu1 }
 0x535   : > { %v2180_v20 = vadd.f32 %v2824_v34, %v4169_v21  ;;  %v2171_v23 = vpop.f32.mrb[77].mxu1 }
 0x536   : > { %v2172_v61 = vadd.f32 %v4169_v21, %v2171_v23  ;;  %v2825_v32 = vpop.f32.mrb[78].mxu1 }
 0x537   : > { %v2240_v63 = vadd.f32 %v3147_v62, %v2180_v20  ;;  %v2183_v43 = vadd.f32 %v2825_v32, %v4169_v21  ;;  %v2174_v50 = vpop.f32.mrb[79].mxu1 }
 0x538   : > { %v2238_v58 = vadd.f32 %v3148_v54, %v2172_v61  ;;  %v2175_v0 = vadd.f32 %v4169_v21, %v2174_v50 }
 0x539   : > { %2272 = vst [vmem:[%s4179_s27 + $0xb0] sm:$0xff] %v2240_v63  ;;  %v2241_v36 = vadd.f32 %v3149_v35, %v2183_v43 }
 0x53a   : > { %2270 = vst [vmem:[%s4179_s27 + $0xa0] sm:$0xff] %v2238_v58  ;;  %v2239_v42 = vadd.f32 %v3150_v37, %v2175_v0 }
 0x53b   : > { %2273 = vst [vmem:[%s4179_s27 + $0xb8] sm:$0xff] %v2241_v36 }
 0x53c   : > { %2271 = vst [vmem:[%s4179_s27 + $0xa8] sm:$0xff] %v2239_v42 }
 0x544   : > { %v2828_v2 = vpop.f32.mrb[80].mxu1 }
 0x545   : > { %v2196_v14 = vadd.f32 %v2828_v2, %v4169_v21  ;;  %v2187_v3 = vpop.f32.mrb[81].mxu1 }
 0x546   : > { %v2188_v15 = vadd.f32 %v4169_v21, %v2187_v3  ;;  %v2829_v16 = vpop.f32.mrb[82].mxu1 }
 0x547   : > { %v2244_v38 = vadd.f32 %v3151_v18, %v2196_v14  ;;  %v2199_v39 = vadd.f32 %v2829_v16, %v4169_v21  ;;  %v2190_v19 = vpop.f32.mrb[83].mxu1 }
 0x548   : > { %v2242_v41 = vadd.f32 %v3152_v47, %v2188_v15  ;;  %v2191_v44 = vadd.f32 %v4169_v21, %v2190_v19 }
 0x549   : > { %2276 = vst [vmem:[%s4179_s27 + $0xd0] sm:$0xff] %v2244_v38  ;;  %v2245_v48 = vadd.f32 %v3153_v60, %v2199_v39 }
 0x54a   : > { %2274 = vst [vmem:[%s4179_s27 + $0xc0] sm:$0xff] %v2242_v41  ;;  %v2243_v56 = vadd.f32 %v3154_v27, %v2191_v44 }
 0x54b   : > { %2277 = vst [vmem:[%s4179_s27 + $0xd8] sm:$0xff] %v2245_v48 }
 0x54c   : > { %2275 = vst [vmem:[%s4179_s27 + $0xc8] sm:$0xff] %v2243_v56 }
 0x554   : > { %v2832_v1 = vpop.f32.mrb[84].mxu1 }
 0x555   : > { %v2212_v59 = vadd.f32 %v2832_v1, %v4169_v21  ;;  %v2203_v24 = vpop.f32.mrb[85].mxu1 }
 0x556   : > { %v2204_v25 = vadd.f32 %v4169_v21, %v2203_v24  ;;  %v2833_v26 = vpop.f32.mrb[86].mxu1 }
 0x557   : > { %v2248_v6 = vadd.f32 %v3155_v28, %v2212_v59  ;;  %v2215_v46 = vadd.f32 %v2833_v26, %v4169_v21  ;;  %v2206_v51 = vpop.f32.mrb[87].mxu1 }
 0x558   : > { %v2246_v4 = vadd.f32 %v3156_v52, %v2204_v25  ;;  %v2207_v5 = vadd.f32 %v4169_v21, %v2206_v51 }
 0x559   : > { %2280 = vst [vmem:[%s4179_s27 + $0xf0] sm:$0xff] %v2248_v6  ;;  %v2249_v9 = vadd.f32 %v3157_v7, %v2215_v46 }
 0x55a   : > { %2278 = vst [vmem:[%s4179_s27 + $0xe0] sm:$0xff] %v2246_v4  ;;  %v2247_v45 = vadd.f32 %v3158_v22, %v2207_v5 }
 0x55b   : > { %2281 = vst [vmem:[%s4179_s27 + $0xf8] sm:$0xff] %v2249_v9 }
 0x55c   : > { %2279 = vst [vmem:[%s4179_s27 + $0xe8] sm:$0xff] %v2247_v45 }
 0x55d   : > { %3318 = shalt.err (!%p3315_p8)
}
 0x55e   : > { %s3319_s23 = scalar_lea.hbm %s4272_s15, 4096  ;;  %s3323_s27 = scalar_lea.hbm %s4428_s3, 8192 }
 0x55f   : > { %p3320_p11 = scmp.ne.s32.totalorder %s4272_s15, %s3319_s23  ;;  %p3324_p12 = scmp.lt.u32.totalorder %s4272_s15, %s4428_s3 }
 0x560   : > { %p3325_p1 = scmp.lt.u32.totalorder %s3323_s27, %s3319_s23  ;;  %p3327_p7 = scmp.lt.u32.totalorder %s3319_s23, %s4272_s15 }
 0x561   : > { %p3321_p0 = pnand %p3320_p11, %p3660_p4 }
 0x562   : > { %p3326_p5 = por %p3325_p1, %p3324_p12 }
 0x563   : > { %p3322_p2 = pneg %p3321_p0 }
 0x564   : > { %p3328_p10 = por %p3327_p7, %p3326_p5 }
 0x566   : > { %p3329_p9 = pnand %p3328_p10, %p3322_p2 }
 0x568   : > { %3332 = shalt.err (!%p3329_p9)
}
 0x569   : > { %s3407_s18 = smov 128   ;;  %s3408_s12 = smov 8  }
 0x56a   : > { %2864 = dma.vmem_to_hbm [thread:$0]  (%p3660_p4), %s4274_s22, 4096, %s4272_s15, %s2283_s28, %s3407_s18, %s3407_s18, %s3408_s12  }
 0x56b PF: > { %s4429_s17 = sld [smem:[#allocation16_spill]]  ;;  %s4430_s21 = sld [smem:[#allocation17_spill]] }
 0x56c   : > { %p4432_p6 = scmp.ge.s32.totalorder %s3395_s14, 2 }
 0x571   : > { %s2313_s16 = sand.u32 1, %s4429_s17   ;;  %p4431_p13 = scmp.ne.s32.totalorder %s4430_s21, 0 }
 0x572   : > { %s2314_s24 = scalar_lea.sflag [#allocation4], %s2313_s16 }
 0x573   : > { %p2884_p3 = pnand %p4432_p6, %p4431_p13 }
 0x575   : > { %3370 = dma.done.wait (!%p2884_p3), %s2314_s24, 4096  }
 0x576   : > { %3372 = vsyncadd (!%p2884_p3), %s2314_s24, 4294963200  ;;  %s27_s14 = sadd.s32 1, %s3395_s14   ;;  %s4433_s30 = smov %s3379_s10 }
 0x577   : > { %p24_p8 = scmp.ge.s32.totalorder %s27_s14, 4   ;;  %s4434_s10 = smov %s3383_s11 }
 0x578   : > { %s4435_s11 = smov %s3672_s29  ;;  %s4436_s12 = smov %s3391_s13 }
 0x579   : > { %s4437_s13 = smov %s4439_s26  ;;  %26 = sbr.rel (!%p24_p8) target bundleno = 12 (0xc), region = 125 }
 0x580   :  { %2319 = vsyncpa [#allocation3], 1 }
 0x581   :  { %2321 = vsyncpa [#allocation3 + $0x1], 1 }
 0x582   :  { %2322 = vsyncpa [#allocation6], 1 }
 0x583   :  { %2323 = vsyncpa [#allocation9], 1 }
 0x584   :  { %2324 = vsyncpa [#allocation4], 1 }
 0x585   :  { %2326 = vsyncpa [#allocation4 + $0x1], 1 }

// kernel: tpu_custom_call.1
= control target key start
LH: loop header
LB: loop body
LE: loop exit
PB: predicated region body
PF: predicated region fallthrough
CT: control target
= control target key end

     0   :  { %s4427_s0 = inlined_call_operand.hbm [shape: f32[2,256,128], index: 0, kind: input, shape index: {}]   ;;  %s4428_s1 = inlined_call_operand.vmem [shape: f32[2,1,128], index: 1, kind: input, shape index: {}]   ;;  %s4429_s2 = inlined_call_operand.vmem [shape: f32[2,1,128], index: 2, kind: input, shape index: {}]   ;;  %s4430_s3 = inlined_call_operand.hbm [shape: bf16[2,256,128], index: 3, kind: input, shape index: {}]   ;;  %s4431_s4 = inlined_call_operand.hbm [shape: bf16[2,256,128], index: 4, kind: input, shape index: {}]   ;;  %s4432_s5 = inlined_call_operand.hbm [shape: bf16[128,128], index: 5, kind: input, shape index: {}]   ;;  %s4433_s6 = inlined_call_operand.vmem [shape: f32[1,128], index: 6, kind: input, shape index: {}]   ;;  %s4434_s7 = inlined_call_operand.hbm [shape: bf16[128,128], index: 7, kind: input, shape index: {}]   ;;  %s4435_s8 = inlined_call_operand.vmem [shape: f32[1,128], index: 8, kind: input, shape index: {}]   ;;  %s4436_s9 = inlined_call_operand.hbm [shape: f32[2,256,128], index: 9, kind: output, shape index: {}]  }
   0x1   :  { %4475 = sst [smem:[#allocation37_spill]] %s4429_s2 }
   0x2   :  { %4476 = sst [smem:[#allocation38_spill]] %s4430_s3 }
   0x3   :  { %4477 = sst [smem:[#allocation39_spill]] %s4432_s5 }
   0x4   :  { %4478 = sst [smem:[#allocation40_spill]] %s4433_s6 }
   0x5   :  { %4479 = sst [smem:[#allocation41_spill]] %s4435_s8 }
   0x6   :  { %4480 = sst [smem:[#allocation42_spill]] %s4436_s9 }
   0x7   :  { %14 = vsyncpa [#allocation3], 0 }
   0x8   :  { %16 = vsyncpa [#allocation3 + $0x1], 0 }
   0x9   :  { %17 = vsyncpa [#allocation6], 0 }
   0xa   :  { %19 = vsyncpa [#allocation6 + $0x1], 0 }
   0xb   :  { %20 = vsyncpa [#allocation9], 0 }
   0xc   :  { %21 = vsyncpa [#allocation4], 0 }
   0xd   :  { %23 = vsyncpa [#allocation4 + $0x1], 0  ;;  %s3507_s30 = smov 0   ;;  %s3509_s10 = smov 0  }
   0xe   :  { %s3511_s11 = smov 0   ;;  %s3513_s12 = smov 0  }
   0xf   :  { %s3515_s13 = smov 0   ;;  %s3517_s14 = smov 0  }
  0x10 LB: > { %4481 = sst [smem:[#allocation16_spill]] %s3423_s30  ;;  %s3538_s15 = sadd.s32 4294967295, %s3443_s14   ;;  %s3443_s14 = sphi %s3517_s14, %s29_s14   ;;  %s3439_s13 = sphi %s3515_s13, %s4559_s13   ;;  %s3435_s12 = sphi %s3513_s12, %s4558_s12   ;;  %s3431_s11 = sphi %s3511_s11, %s4554_s11   ;;  %s3427_s10 = sphi %s3509_s10, %s4557_s10   ;;  %s3423_s30 = sphi %s3507_s30, %s4556_s30  }
  0x11   : > { %4482 = sst [smem:[#allocation17_spill]] %s3431_s11  ;;  %s2498_s16 = sadd.s32 4294967294, %s3443_s14  }
  0x12   : > { %p57_p0 = scmp.ne.s32.totalorder %s3431_s11, %s3427_s10  ;;  %p58_p1 = scmp.eq.s32.totalorder %s3443_s14, 0 }
  0x13   : > { %p63_p2 = scmp.ne.s32.totalorder %s3427_s10, %s3423_s30  ;;  %p4440_p3 = scmp.eq.s32.totalorder %s3538_s15, 0 }
  0x14   : > { %p277_p4 = scmp.eq.s32.totalorder %s3538_s15, 1  ;;  %p3549_p5 = por %p58_p1, %p57_p0 }
  0x15   : > { %p283_p6 = scmp.eq.s32.totalorder %s2498_s16, 1  ;;  %p3555_p7 = por %p4440_p3, %p63_p2 }
  0x16   : > { %p3559_p8 = por %p277_p4, %p57_p0  ;;  %p2499_p10 = scmp.ge.s32.totalorder %s3443_s14, 1 }
  0x17   : > { %s4484_s19 = scalar_select %p3555_p7, 1, 0 }
  0x18   : > { %s4485_s20 = scalar_select %p3559_p8, 1, 0 }
  0x19   : > { %p3563_p9 = por %p283_p6, %p63_p2  ;;  %p290_p11 = scmp.lt.s32.totalorder %s3443_s14, 3 }
  0x1a   : > { %4486 = sst [smem:[#allocation18_spill]] %s4485_s20  ;;  %s3445_s23 = smov [#allocation8]  }
  0x1b   : > { %s4487_s21 = scalar_select %p3563_p9, 1, 0 }
  0x1c   : > { %p3569_p12 = pnand %p2499_p10, %p290_p11  ;;  %s302_s24 = sshll.u32 %s3445_s23, 4  ;;  %s3573_s24 = int_to_ptr.vmem [resolvable:$true] %s302_s24 }
  0x1d   : > { %4488 = sst [smem:[#allocation19_spill]] %s4487_s21  ;;  %s41_s26 = sadd.s32 1, %s3439_s13 }
  0x1e   : > { %s4489_s22 = scalar_select %p3569_p12, 1, 0 }
  0x1f   : > { %p2916_p13 = pneg %p3569_p12  ;;  %s3587_s27 = sand.u32 1, %s3431_s11  }
  0x20   : > { %p3589_p4 = scmp.ge.s32.totalorder %s41_s26, 2  ;;  %s4492_s5 = sld [smem:[#allocation39_spill]] }
  0x21   : > { %p3581_p2 = pnand %p2916_p13, %p4440_p3 }
  0x23   : > { %s4490_s25 = scalar_select %p3581_p2, 1, 0 }
  0x24   : > { %p4451_p10 = pneg %p3581_p2 }
  0x26   : > { %s3207_s23 = scalar_lea.hbm %s4492_s5, 1024 }
  0x27   : > { %p3208_p6 = scmp.ne.s32.totalorder %s4492_s5, %s3207_s23  ;;  %p3214_p0 = scmp.lt.u32.totalorder %s3207_s23, %s4492_s5 }
  0x29   : > { %p3210_p11 = pnand %p4451_p10, %p3208_p6 }
  0x2b   : > { %p3211_p13 = pneg %p3210_p11 }
  0x2d   : > { %p3216_p3 = pnand %p3214_p0, %p3211_p13 }
  0x2f   : > { %3219 = shalt.err (!%p3216_p3)
}
  0x30   : > { %s3220_s29 = scalar_lea.vmem %s3573_s24, 1024  ;;  %p3228_p7 = scmp.lt.s32.totalorder %s3573_s24, %s3573_s24 }
  0x31   : > { %p3221_p1 = scmp.ne.s32.totalorder %s3573_s24, %s3220_s29  ;;  %p3229_p6 = scmp.lt.s32.totalorder %s3220_s29, %s3220_s29 }
  0x33   : > { %p3223_p9 = pnand %p3221_p1, %p4451_p10  ;;  %p3230_p11 = por %p3229_p6, %p3228_p7 }
  0x35   : > { %p3224_p8 = pneg %p3223_p9 }
  0x37   : > { %p3231_p12 = pnand %p3230_p11, %p3224_p8 }
  0x39   : > { %3234 = shalt.err (!%p3231_p12)
}
  0x3a   : > { %s4446_s9 = smov 64   ;;  %s4448_s30 = smov 4  }
  0x3b   : > { %2919 = dma.hbm_to_vmem [thread:$0]  (!%p3581_p2), %s4492_s5, 1024, %s3573_s24, [#allocation9], %s4446_s9, %s4446_s9, %s4448_s30  }
  0x3c   : > { %s4561_s26 = smov (%p3589_p4, %s41_s26), 0  ;;  %p4494_p3 = scmp.lt.s32.totalorder %s3443_s14, 2 }
  0x3d   : > { %4493 = sst [smem:[#allocation20_spill]] %s4561_s26  ;;  %s370_s23 = sand.u32 1, %s3443_s14  }
  0x3e   : > { %p3631_p7 = pnand %p4494_p3, %p3549_p5  ;;  %s45_s29 = ssub.s32 %s3439_s13, %s4561_s26 }
  0x3f   : > { %p48_p8 = scmp.eq.s32.totalorder %s45_s29, 0  ;;  %s4450_s20 = sshll.u32 %s3587_s27, 7 }
  0x40   : > { %s4495_s16 = scalar_select %p3631_p7, 1, 0 }
  0x41   : > { %s2577_s8 = sshll.u32 %s3439_s13, 11  ;;  %s4496_s6 = sadd.s32 1, %s3431_s11 }
  0x42   : > { %s3643_s2 = scalar_select %p48_p8, %s3431_s11, %s4496_s6  }
  0x43   : > { %s4498_s3 = sld [smem:[#allocation38_spill]]  ;;  %s374_s18 = scalar_lea.vmem [#allocation5], %s4450_s20 }
  0x44   : > { %4497 = sst [smem:[#allocation21_spill]] %s3643_s2  ;;  %s381_s21 = sshll.u32 %s374_s18, 4  ;;  %s3652_s21 = int_to_ptr.vmem [resolvable:$true] %s381_s21 }
  0x45   : > { %s3657_s30 = scalar_lea.hbm %s4431_s4, %s2577_s8  ;;  %s3659_s6 = scalar_lea.sflag [#allocation6], %s370_s23 }
  0x46   : > { %p3665_p9 = pneg %p3631_p7 }
  0x48   : > { %s4499_s24 = scalar_select %p3665_p9, 1, 0 }
  0x49   : > { %s3648_s17 = scalar_lea.hbm %s4498_s3, %s2577_s8  ;;  %s3240_s20 = scalar_lea.hbm %s4498_s3, 4096 }
  0x4a   : > { %s3235_s5 = scalar_lea.hbm %s3648_s17, 2048  ;;  %p3241_p1 = scmp.lt.u32.totalorder %s3648_s17, %s4498_s3 }
  0x4b   : > { %p3236_p5 = scmp.ne.s32.totalorder %s3648_s17, %s3235_s5  ;;  %p3242_p4 = scmp.lt.u32.totalorder %s3240_s20, %s3235_s5 }
  0x4c   : > { %p3244_p6 = scmp.lt.u32.totalorder %s3235_s5, %s3648_s17 }
  0x4d   : > { %p3238_p12 = pnand %p3665_p9, %p3236_p5  ;;  %p3243_p13 = por %p3242_p4, %p3241_p1 }
  0x4f   : > { %p3239_p0 = pneg %p3238_p12  ;;  %p3245_p11 = por %p3244_p6, %p3243_p13 }
  0x51   : > { %p3246_p3 = pnand %p3245_p11, %p3239_p0 }
  0x53   : > { %3249 = shalt.err (!%p3246_p3)
}
  0x54   : > { %s3250_s23 = scalar_lea.vmem %s3652_s21, 2048  ;;  %s3448_s29 = smov [#allocation5]  }
  0x55   : > { %p3251_p8 = scmp.ne.s32.totalorder %s3652_s21, %s3250_s23  ;;  %s3255_s28 = sshll.u32 %s3448_s29, 4  ;;  %s3256_s28 = int_to_ptr.vmem [resolvable:$false] %s3255_s28 }
  0x56   : > { %s3257_s18 = scalar_lea.vmem %s3256_s28, 4096  ;;  %p3258_p10 = scmp.lt.s32.totalorder %s3652_s21, %s3256_s28 }
  0x57   : > { %p3253_p5 = pnand %p3251_p8, %p3665_p9  ;;  %p3259_p2 = scmp.lt.s32.totalorder %s3257_s18, %s3250_s23 }
  0x59   : > { %p3254_p12 = pneg %p3253_p5  ;;  %p3260_p1 = por %p3259_p2, %p3258_p10 }
  0x5b   : > { %p3261_p4 = pnand %p3260_p1, %p3254_p12 }
  0x5d   : > { %3264 = shalt.err (!%p3261_p4)
}
  0x5e   : > { %s4500_s5 = smov 4   ;;  %s4501_s20 = smov 64  }
  0x5f   : > { %2929 = dma.hbm_to_vmem [thread:$0]  (!%p3631_p7), %s3648_s17, 2048, %s3652_s21, %s3659_s6, %s4501_s20, %s4501_s20, %s4500_s5  }
  0x60   : > { %s4502_s9 = sshll.u32 %s3587_s27, 7  ;;  %s3449_s23 = smov [#allocation10]  }
  0x61   : > { %s395_s8 = scalar_lea.vmem [#allocation7], %s4502_s9  ;;  %s318_s28 = sshll.u32 %s3449_s23, 4  ;;  %s319_s28 = int_to_ptr.vmem [resolvable:$true] %s318_s28 }
  0x62   : > { %s402_s29 = sshll.u32 %s395_s8, 4  ;;  %s3265_s26 = scalar_lea.hbm %s4434_s7, 1024  ;;  %s3694_s29 = int_to_ptr.vmem [resolvable:$true] %s402_s29 }
  0x63   : > { %p3266_p2 = scmp.ne.s32.totalorder %s4434_s7, %s3265_s26  ;;  %p4503_p10 = scmp.ne.s32.totalorder %s4490_s25, 0 }
  0x64   : > { %p3272_p11 = scmp.lt.u32.totalorder %s3265_s26, %s4434_s7 }
  0x65   : > { %p4504_p0 = pneg %p4503_p10 }
  0x67   : > { %p3268_p13 = pnand %p3266_p2, %p4504_p0 }
  0x69   : > { %p3269_p6 = pneg %p3268_p13 }
  0x6b   : > { %p3274_p3 = pnand %p3272_p11, %p3269_p6 }
  0x6d   : > { %3277 = shalt.err (!%p3274_p3)
}
  0x6e   : > { %s3278_s9 = scalar_lea.vmem %s319_s28, 1024  ;;  %p4505_p5 = pmov %p4504_p0 }
  0x6f   : > { %p3279_p8 = scmp.ne.s32.totalorder %s319_s28, %s3278_s9  ;;  %p3286_p4 = scmp.lt.s32.totalorder %s319_s28, %s319_s28 }
  0x70   : > { %p3287_p7 = scmp.lt.s32.totalorder %s3278_s9, %s3278_s9 }
  0x71   : > { %p3281_p12 = pnand %p3279_p8, %p4505_p5 }
  0x72   : > { %p3288_p9 = por %p3287_p7, %p3286_p4 }
  0x73   : > { %p3282_p1 = pneg %p3281_p12 }
  0x75   : > { %p3289_p0 = pnand %p3288_p9, %p3282_p1 }
  0x77   : > { %3292 = shalt.err (!%p3289_p0)
}
  0x78   : > { %2922 = dma.hbm_to_vmem [thread:$0]  (!%p4503_p10), %s4434_s7, 1024, %s319_s28, [#allocation9], %s4501_s20, %s4501_s20, %s4500_s5  }
  0x79   : > { %s2503_s11 = sshll.u32 %s3587_s27, 8  ;;  %s2576_s26 = sshll.u32 %s3439_s13, 12 }
  0x7a   : > { %s3724_s18 = scalar_lea.hbm %s4427_s0, %s2576_s26  ;;  %s339_s25 = scalar_lea.vmem [#allocation2], %s2503_s11 }
  0x7b   : > { %s348_s17 = sshll.u32 %s339_s25, 4  ;;  %s336_s21 = scalar_lea.sflag [#allocation3], %s3587_s27  ;;  %s3726_s17 = int_to_ptr.vmem [resolvable:$true] %s348_s17 }
  0x7c   : > { %s3293_s9 = scalar_lea.hbm %s3724_s18, 4096  ;;  %p4506_p9 = scmp.ne.s32.totalorder %s4499_s24, 0 }
  0x7d   : > { %p3294_p7 = scmp.ne.s32.totalorder %s3724_s18, %s3293_s9  ;;  %s3298_s3 = scalar_lea.hbm %s4427_s0, 8192 }
  0x7e   : > { %p3299_p13 = scmp.lt.u32.totalorder %s3724_s18, %s4427_s0  ;;  %p3300_p6 = scmp.lt.u32.totalorder %s3298_s3, %s3293_s9 }
  0x7f   : > { %p3296_p2 = pnand %p3294_p7, %p4506_p9  ;;  %p3302_p3 = scmp.lt.u32.totalorder %s3293_s9, %s3724_s18 }
  0x80   : > { %p3301_p11 = por %p3300_p6, %p3299_p13 }
  0x81   : > { %p3297_p10 = pneg %p3296_p2 }
  0x82   : > { %p3303_p8 = por %p3302_p3, %p3301_p11 }
  0x84   : > { %p3304_p5 = pnand %p3303_p8, %p3297_p10 }
  0x86   : > { %3307 = shalt.err (!%p3304_p5)
}
  0x87   : > { %s3308_s11 = scalar_lea.vmem %s3726_s17, 4096  ;;  %s3450_s23 = smov [#allocation2]  }
  0x88   : > { %p3309_p12 = scmp.ne.s32.totalorder %s3726_s17, %s3308_s11  ;;  %s3313_s25 = sshll.u32 %s3450_s23, 4  ;;  %s3314_s25 = int_to_ptr.vmem [resolvable:$false] %s3313_s25 }
  0x89   : > { %s3315_s28 = scalar_lea.vmem %s3314_s25, 8192  ;;  %p3316_p0 = scmp.lt.s32.totalorder %s3726_s17, %s3314_s25 }
  0x8a   : > { %p3311_p1 = pnand %p3309_p12, %p4506_p9  ;;  %p3317_p7 = scmp.lt.s32.totalorder %s3315_s28, %s3308_s11 }
  0x8c   : > { %p3312_p4 = pneg %p3311_p1  ;;  %p3318_p2 = por %p3317_p7, %p3316_p0 }
  0x8e   : > { %p3319_p13 = pnand %p3318_p2, %p3312_p4 }
  0x90   : > { %3322 = shalt.err (!%p3319_p13)
}
  0x91   : > { %s3451_s9 = smov 128   ;;  %s3452_s2 = smov 8  }
  0x92   : > { %p4507_p10 = scmp.ne.s32.totalorder %s4495_s16, 0  ;;  %s3323_s3 = scalar_lea.hbm %s3657_s30, 2048 }
  0x93   : > { %p3324_p6 = scmp.ne.s32.totalorder %s3657_s30, %s3323_s3  ;;  %s3328_s11 = scalar_lea.hbm %s4431_s4, 4096 }
  0x94   : > { %2926 = dma.hbm_to_vmem [thread:$0]  (!%p4507_p10), %s3724_s18, 4096, %s3726_s17, %s336_s21, %s3451_s9, %s3451_s9, %s3452_s2  }
  0x95   : > { %p3326_p11 = pnand %p3324_p6, %p4506_p9  ;;  %p3329_p8 = scmp.lt.u32.totalorder %s3657_s30, %s4431_s4 }
  0x96   : > { %p3330_p5 = scmp.lt.u32.totalorder %s3328_s11, %s3323_s3  ;;  %p3332_p1 = scmp.lt.u32.totalorder %s3323_s3, %s3657_s30 }
  0x97   : > { %p3327_p3 = pneg %p3326_p11 }
  0x98   : > { %p3331_p12 = por %p3330_p5, %p3329_p8 }
  0x9a   : > { %p3333_p4 = por %p3332_p1, %p3331_p12 }
  0x9c   : > { %p3334_p0 = pnand %p3333_p4, %p3327_p3 }
  0x9e   : > { %3337 = shalt.err (!%p3334_p0)
}
  0x9f   : > { %s3338_s27 = scalar_lea.vmem %s3694_s29, 2048  ;;  %s3453_s18 = smov [#allocation7]  }
  0xa0   : > { %p3339_p7 = scmp.ne.s32.totalorder %s3694_s29, %s3338_s27  ;;  %s3343_s17 = sshll.u32 %s3453_s18, 4  ;;  %s3344_s17 = int_to_ptr.vmem [resolvable:$false] %s3343_s17 }
  0xa1   : > { %s3345_s21 = scalar_lea.vmem %s3344_s17, 4096  ;;  %p3346_p6 = scmp.lt.s32.totalorder %s3694_s29, %s3344_s17 }
  0xa2   : > { %p3341_p2 = pnand %p3339_p7, %p4506_p9  ;;  %p3347_p11 = scmp.lt.s32.totalorder %s3345_s21, %s3338_s27 }
  0xa4   : > { %p3342_p13 = pneg %p3341_p2  ;;  %p3348_p8 = por %p3347_p11, %p3346_p6 }
  0xa6   : > { %p3349_p5 = pnand %p3348_p8, %p3342_p13 }
  0xa8   : > { %3352 = shalt.err (!%p3349_p5)
}
  0xa9   : > { %2932 = dma.hbm_to_vmem [thread:$0]  (!%p4507_p10), %s3657_s30, 2048, %s3694_s29, %s3659_s6, %s4501_s20, %s4501_s20, %s4500_s5  }
  0xaa   : > { %p4508_p9 = scmp.ne.s32.totalorder %s4489_s22, 0 }
  0xac   : > { %414 = sbr.rel (%p4508_p9) target bundleno = 1398 (0x576), region = 56 }
  0xb3   : > { %s3780_s24 = sand.u32 1, %s3427_s10   ;;  %p4509_p3 = scmp.ne.s32.totalorder %s4484_s19, 0 }
  0xb4   : > { %s2513_s28 = sshll.u32 %s3780_s24, 8  ;;  %s417_s9 = scalar_lea.sflag [#allocation3], %s3780_s24 }
  0xb5   : > { %s3786_s16 = scalar_lea.vmem [#allocation2], %s2513_s28 }
  0xb6   : > { %3406 = dma.done.wait (%p4509_p3), %s417_s9, 4096  }
  0xb7   : > { %3408 = vsyncadd (%p4509_p3), %s417_s9, 4294963200  ;;  %s425_s22 = sand.u32 1, %s3538_s15   ;;  %s2514_s30 = sshll.u32 %s3780_s24, 7 }
  0xb8   : > { %s426_s6 = scalar_lea.sflag [#allocation6], %s425_s22  ;;  %s3794_s5 = scalar_lea.vmem [#allocation5], %s2514_s30 }
  0xb9   : > { %3410 = dma.done.wait (%p4509_p3), %s426_s6, 4096  }
  0xba   : > { %3412 = vsyncadd (%p4509_p3), %s426_s6, 4294963200  ;;  %s3800_s20 = scalar_lea.vmem [#allocation7], %s2514_s30  ;;  %p4510_p10 = scmp.eq.s32.totalorder %s3538_s15, 0 }
  0xbc   : > { %3414 = dma.done.wait (%p4510_p10), [#allocation9], 2048   ;;  %p4511_p12 = pmov %p4510_p10 }
  0xbd   : > { %p498_p1 = scmp.lt.s32.totalorder %s3435_s12, 1  ;;  %v2999_v0 = vld [vmem:[#allocation8] sm:$0xff]   ;;  %v3000_v1 = vld [vmem:[#allocation8 + $0x8] sm:$0xff]   ;;  %v3001_v2 = vld [vmem:[#allocation8 + $0x10] sm:$0xff]   ;;  %s4512_s15 = sld [smem:[#allocation37_spill]] }
  0xbe   : > { %3416 = vsyncadd (%p4511_p12), [#allocation9], 4294965248  ;;  %2788 = vmatprep.subr.bf16.mxu0 %v2999_v0  ;;  %v3002_v3 = vld [vmem:[#allocation8 + $0x18] sm:$0xff]   ;;  %v506_v4 = vld [vmem:[%s3786_s16] sm:$0xff]  ;;  %s4513_s27 = sld [smem:[#allocation40_spill]]  ;;  %s4544_s21 = sld [smem:[#allocation41_spill]] }
  0xbf   : > { %s499_s29 = scalar_select %p498_p1, %s3435_s12, 1  ;;  %2789 = vmatpush3.bf16.msra.mxu0 %v2999_v0  ;;  %v507_v5 = vld [vmem:[%s3786_s16 + $0x8] sm:$0xff]  ;;  %v3003_v12 = vld [vmem:[#allocation8 + $0x20] sm:$0xff]   ;;  %v3005_v15 = vld [vmem:[#allocation8 + $0x30] sm:$0xff]  }
  0xc0   : > { %2790 = vmatprep.subr.bf16.mxu0 %v3000_v1  ;;  %v3004_v14 = vld [vmem:[#allocation8 + $0x28] sm:$0xff]   ;;  %v508_v16 = vld [vmem:[%s3786_s16 + $0x10] sm:$0xff]  ;;  %v509_v17 = vld [vmem:[%s3786_s16 + $0x18] sm:$0xff]  ;;  %s4279_s9 = scalar_lea.vmem [#allocation11], %s2513_s28  ;;  %s2579_s28 = sshll.u32 %s3435_s12, 12 }
  0xc1   : > { %s500_s3 = scalar_lea.vmem %s4428_s1, %s499_s29  ;;  %v510_v18 = vld [vmem:[%s3786_s16 + $0x20] sm:$0xff]  ;;  %v511_v19 = vld [vmem:[%s3786_s16 + $0x28] sm:$0xff]  ;;  %v532_v20 = vld [vmem:[%s3786_s16 + $0xd0] sm:$0xff]  ;;  %s2330_s22 = sshll.u32 %s4279_s9, 4  ;;  %s4374_s22 = int_to_ptr.vmem [resolvable:$true] %s2330_s22 }
  0xc2   : > { %v3816_v6 = vld [vmem:[%s500_s3] ss:$0 sm:$0xff]  ;;  %v533_v21 = vld [vmem:[%s3786_s16 + $0xd8] sm:$0xff]  ;;  %v3009_v29 = vld [vmem:[%s3794_s5 + $0x48] sm:$0xff]   ;;  %s4545_s30 = sld [smem:[#allocation18_spill]]  ;;  %s4546_s12 = sld [smem:[#allocation42_spill]] }
  0xc3   : > { %s503_s11 = scalar_lea.vmem %s4512_s15, %s499_s29  ;;  %2791 = vmatpush3.bf16.msra.mxu0 %v3000_v1  ;;  %v545_v7 = vsub.f32 %v506_v4, %v3816_v6  ;;  %v546_v8 = vsub.f32 %v507_v5, %v3816_v6  ;;  %v3007_v22 = vld [vmem:[%s3794_s5 + $0x40] sm:$0xff]   ;;  %v547_v23 = vsub.f32 %v508_v16, %v3816_v6  ;;  %v3006_v26 = vld [vmem:[#allocation8 + $0x38] sm:$0xff]   ;;  %v548_v27 = vsub.f32 %v509_v17, %v3816_v6  ;;  %v535_v31 = vld [vmem:[%s3786_s16 + $0xe8] sm:$0xff]  ;;  %s2315_s19 = scalar_lea.sflag [#allocation4], %s3780_s24 }
  0xc4   : > { %2792 = vmatprep.subr.bf16.mxu0 %v3001_v2  ;;  %v3820_v9 = vld [vmem:[%s503_s11] ss:$0 sm:$0xff]  ;;  %v549_v28 = vsub.f32 %v510_v18, %v3816_v6  ;;  %2604 = vmatprep.subr.bf16.mxu1 %v3007_v22  ;;  %v550_v30 = vsub.f32 %v511_v19, %v3816_v6  ;;  %v512_v32 = vld [vmem:[%s3786_s16 + $0x30] sm:$0xff]  ;;  %v571_v35 = vsub.f32 %v532_v20, %v3816_v6  ;;  %v537_v37 = vld [vmem:[%s3786_s16 + $0xf8] sm:$0xff]  ;;  %s3353_s2 = scalar_lea.vmem %s4374_s22, 4096  ;;  %s3454_s3 = smov [#allocation11]  }
  0xc5   : > { %v584_v10 = vmul.f32 %v3820_v9, %v545_v7  ;;  %v585_v11 = vmul.f32 %v3820_v9, %v546_v8  ;;  %v534_v24 = vld [vmem:[%s3786_s16 + $0xe0] sm:$0xff]  ;;  %v536_v33 = vld [vmem:[%s3786_s16 + $0xf0] sm:$0xff]  ;;  %v586_v34 = vmul.f32 %v3820_v9, %v547_v23  ;;  %v572_v36 = vsub.f32 %v533_v21, %v3816_v6  ;;  %v513_v40 = vld [vmem:[%s3786_s16 + $0x38] sm:$0xff]  ;;  %p3354_p4 = scmp.ne.s32.totalorder %s4374_s22, %s3353_s2  ;;  %s3357_s26 = sshll.u32 %s3454_s3, 4  ;;  %s3358_s26 = int_to_ptr.vmem [resolvable:$false] %s3357_s26 }
  0xc6   : > { %v3008_v25 = vld [vmem:[%s3794_s5] sm:$0xff]   ;;  %v587_v38 = vmul.f32 %v3820_v9, %v548_v27  ;;  %v588_v39 = vmul.f32 %v3820_v9, %v549_v28  ;;  %v573_v41 = vsub.f32 %v534_v24, %v3816_v6  ;;  %v574_v42 = vsub.f32 %v535_v31, %v3816_v6  ;;  %v515_v48 = vld [vmem:[%s3786_s16 + $0x48] sm:$0xff]  ;;  %v3011_v60 = vld [vmem:[%s3794_s5 + $0x50] sm:$0xff]   ;;  %s3359_s8 = scalar_lea.vmem %s3358_s26, 8192  ;;  %p3360_p13 = scmp.lt.s32.totalorder %s4374_s22, %s3358_s26 }
  0xc7   : > { %2793 = vmatpush3.bf16.msra.mxu0 %v3001_v2  ;;  %v616_v13 = vpack.c.bf16 %v585_v11, %v584_v10  ;;  %2605 = vmatpush3.bf16.xpose.msra.mxu1 %v3008_v25  ;;  %v589_v43 = vmul.f32 %v3820_v9, %v550_v30  ;;  %v514_v44 = vld [vmem:[%s3786_s16 + $0x40] sm:$0xff]  ;;  %v3853_v45 = vmul.f32 %v3820_v9, %v571_v35  ;;  %v3010_v55 = vld [vmem:[%s3794_s5 + $0x8] sm:$0xff]   ;;  %v516_v1 = vld [vmem:[%s3786_s16 + $0x50] sm:$0xff]  ;;  %p3361_p6 = scmp.lt.s32.totalorder %s3359_s8, %s3353_s2 }
  0xc8   : > { %2794 = vmatprep.subr.bf16.mxu0 %v3002_v3  ;;  %2606 = vmatprep.subr.bf16.mxu1 %v3009_v29  ;;  %v3856_v46 = vmul.f32 %v3820_v9, %v572_v36  ;;  %v575_v47 = vsub.f32 %v536_v33, %v3816_v6  ;;  %v3861_v49 = vmul.f32 %v3820_v9, %v573_v41  ;;  %v517_v2 = vld [vmem:[%s3786_s16 + $0x58] sm:$0xff]  ;;  %v518_v5 = vld [vmem:[%s3786_s16 + $0x60] sm:$0xff]  ;;  %v519_v7 = vld [vmem:[%s3786_s16 + $0x68] sm:$0xff]  ;;  %s4372_s29 = scalar_lea.hbm %s4546_s12, %s2579_s28  ;;  %p4548_p0 = scmp.ne.s32.totalorder %s4545_s30, 0 }
  0xc9   : > { %2804 = vmatprep.mubr.bf16.mxu0 %v616_v13  ;;  %v3864_v50 = vmul.f32 %v3820_v9, %v574_v42  ;;  %v576_v51 = vsub.f32 %v537_v37, %v3816_v6  ;;  %v551_v52 = vsub.f32 %v512_v32, %v3816_v6  ;;  %v617_v56 = vpack.c.bf16 %v587_v38, %v586_v34  ;;  %v3012_v11 = vld [vmem:[%s3794_s5 + $0x10] sm:$0xff]   ;;  %v521_v20 = vld [vmem:[%s3786_s16 + $0x78] sm:$0xff]  ;;  %v522_v23 = vld [vmem:[%s3786_s16 + $0x80] sm:$0xff]  ;;  %p3362_p11 = por %p3361_p6, %p3360_p13 }
  0xca   : > { %v629_v53 = vpack.c.bf16 %v3856_v46, %v3853_v45  ;;  %v3871_v54 = vmul.f32 %v3820_v9, %v575_v47  ;;  %v552_v57 = vsub.f32 %v513_v40, %v3816_v6  ;;  %v618_v61 = vpack.c.bf16 %v589_v43, %v588_v39  ;;  %v520_v19 = vld [vmem:[%s3786_s16 + $0x70] sm:$0xff]  ;;  %v523_v24 = vld [vmem:[%s3786_s16 + $0x88] sm:$0xff]  ;;  %v3014_v27 = vld [vmem:[%s3794_s5 + $0x18] sm:$0xff]   ;;  %p3355_p7 = pnand %p3354_p4, %p4548_p0 }
  0xcb   : > { %2795 = vmatpush3.bf16.msra.mxu0 %v3002_v3  ;;  %v630_v58 = vpack.c.bf16 %v3864_v50, %v3861_v49  ;;  %v3878_v59 = vmul.f32 %v3820_v9, %v576_v51  ;;  %v553_v62 = vsub.f32 %v514_v44, %v3816_v6  ;;  %v554_v63 = vsub.f32 %v515_v48, %v3816_v6  ;;  %v3015_v28 = vld [vmem:[%s3794_s5 + $0x60] sm:$0xff]   ;;  %v524_v39 = vld [vmem:[%s3786_s16 + $0x90] sm:$0xff]  ;;  %v525_v40 = vld [vmem:[%s3786_s16 + $0x98] sm:$0xff] }
  0xcc   : > { %2796 = vmatprep.subr.bf16.mxu0 %v3003_v12  ;;  %v590_v3 = vmul.f32 %v3820_v9, %v551_v52  ;;  %v591_v4 = vmul.f32 %v3820_v9, %v552_v57  ;;  %v557_v17 = vsub.f32 %v518_v5, %v3816_v6  ;;  %v558_v18 = vsub.f32 %v519_v7, %v3816_v6  ;;  %v526_v41 = vld [vmem:[%s3786_s16 + $0xa0] sm:$0xff]  ;;  %v527_v42 = vld [vmem:[%s3786_s16 + $0xa8] sm:$0xff]  ;;  %p3356_p2 = pneg %p3355_p7 }
  0xcd   : > { %v631_v0 = vpack.c.bf16 %v3878_v59, %v3871_v54  ;;  %v592_v8 = vmul.f32 %v3820_v9, %v553_v62  ;;  %v593_v10 = vmul.f32 %v3820_v9, %v554_v63  ;;  %v559_v30 = vsub.f32 %v520_v19, %v3816_v6  ;;  %v3016_v43 = vld [vmem:[%s3794_s5 + $0x20] sm:$0xff]   ;;  %v3017_v51 = vld [vmem:[%s3794_s5 + $0x68] sm:$0xff]   ;;  %v528_v63 = vld [vmem:[%s3786_s16 + $0xb0] sm:$0xff] }
  0xce   : > { %v619_v13 = vpack.c.bf16 %v591_v4, %v590_v3  ;;  %v596_v25 = vmul.f32 %v3820_v9, %v557_v17  ;;  %v560_v31 = vsub.f32 %v521_v20, %v3816_v6  ;;  %v561_v33 = vsub.f32 %v522_v23, %v3816_v6  ;;  %v531_v3 = vld [vmem:[%s3786_s16 + $0xc8] sm:$0xff]  ;;  %p3363_p8 = pnand %p3362_p11, %p3356_p2 }
  0xcf   : > { %2797 = vmatpush3.bf16.msra.mxu0 %v3003_v12  ;;  %2607 = vmatpush3.bf16.xpose.msra.mxu1 %v3010_v55  ;;  %v3013_v12 = vld [vmem:[%s3794_s5 + $0x58] sm:$0xff]   ;;  %v620_v16 = vpack.c.bf16 %v593_v10, %v592_v8  ;;  %v562_v34 = vsub.f32 %v523_v24, %v3816_v6  ;;  %v598_v35 = vmul.f32 %v3820_v9, %v559_v30  ;;  %v3018_v4 = vld [vmem:[%s3794_s5 + $0x28] sm:$0xff]   ;;  %v3019_v10 = vld [vmem:[%s3794_s5 + $0x70] sm:$0xff]  }
  0xd0   : > { %2798 = vmatprep.subr.bf16.mxu0 %v3004_v14  ;;  %2608 = vmatprep.subr.bf16.mxu1 %v3011_v60  ;;  %v599_v36 = vmul.f32 %v3820_v9, %v560_v31  ;;  %v600_v37 = vmul.f32 %v3820_v9, %v561_v33  ;;  %v563_v47 = vsub.f32 %v524_v39, %v3816_v6 }
  0xd1   : > { %v601_v38 = vmul.f32 %v3820_v9, %v562_v34  ;;  %v564_v48 = vsub.f32 %v525_v40, %v3816_v6  ;;  %v565_v55 = vsub.f32 %v526_v41, %v3816_v6  ;;  %v567_v7 = vsub.f32 %v528_v63, %v3816_v6 }
  0xd2   : > { %v623_v44 = vpack.c.bf16 %v599_v36, %v598_v35  ;;  %v602_v57 = vmul.f32 %v3820_v9, %v563_v47 }
  0xd3   : > { %2799 = vmatpush3.bf16.msra.mxu0 %v3004_v14  ;;  %v555_v14 = vsub.f32 %v516_v1, %v3816_v6  ;;  %v624_v52 = vpack.c.bf16 %v601_v38, %v600_v37  ;;  %v603_v60 = vmul.f32 %v3820_v9, %v564_v48  ;;  %v529_v1 = vld [vmem:[%s3786_s16 + $0xb8] sm:$0xff] }
  0xd4   : > { %2800 = vmatprep.subr.bf16.mxu0 %v3005_v15  ;;  %v568_v8 = vsub.f32 %v529_v1, %v3816_v6 }
  0xd5   : > { %v594_v21 = vmul.f32 %v3820_v9, %v555_v14  ;;  %v625_v5 = vpack.c.bf16 %v603_v60, %v602_v57  ;;  %v606_v14 = vmul.f32 %v3820_v9, %v567_v7 }
  0xd7   : > { %2801 = vmatpush3.bf16.msra.mxu0 %v3005_v15  ;;  %v556_v15 = vsub.f32 %v517_v2, %v3816_v6  ;;  %2609 = vmatpush3.bf16.xpose.msra.mxu1 %v3012_v11  ;;  %v530_v2 = vld [vmem:[%s3786_s16 + $0xc0] sm:$0xff] }
  0xd8   : > { %2802 = vmatprep.subr.bf16.mxu0 %v3006_v26  ;;  %2610 = vmatprep.subr.bf16.mxu1 %v3013_v12  ;;  %v569_v12 = vsub.f32 %v530_v2, %v3816_v6 }
  0xd9   : > { %v595_v22 = vmul.f32 %v3820_v9, %v556_v15  ;;  %v607_v15 = vmul.f32 %v3820_v9, %v568_v8 }
  0xdb   : > { %2803 = vmatpush3.bf16.msra.mxu0 %v3006_v26  ;;  %v597_v26 = vmul.f32 %v3820_v9, %v558_v18  ;;  %v621_v29 = vpack.c.bf16 %v595_v22, %v594_v21  ;;  %v3020_v18 = vld [vmem:[%s3794_s5 + $0x30] sm:$0xff]   ;;  %v627_v19 = vpack.c.bf16 %v607_v15, %v606_v14  ;;  %v3960_v22 = vld [vmem:[%s4513_s27] ss:$0 sm:$0xff] }
  0xdd   : > { %v622_v32 = vpack.c.bf16 %v597_v26, %v596_v25 }
  0xde   : > { %2805 = vmatmul.mubr.bf16.vlgmr.msra.gmra.mrb[0].mxu0 %v617_v56  ;;  %v566_v56 = vsub.f32 %v527_v42, %v3816_v6 }
  0xdf   : > { %2808 = vmatprep.mubr.bf16.mxu0 %v618_v61  ;;  %2611 = vmatpush3.bf16.xpose.msra.mxu1 %v3014_v27  ;;  %v604_v61 = vmul.f32 %v3820_v9, %v565_v55 }
  0xe0   : > { %2612 = vmatprep.subr.bf16.mxu1 %v3015_v28  ;;  %v605_v62 = vmul.f32 %v3820_v9, %v566_v56 }
  0xe2   : > { %v626_v11 = vpack.c.bf16 %v605_v62, %v604_v61 }
  0xe6   : > { %2809 = vmatmul.mubr.bf16.gmra.mrb[4].mxu0 %v619_v13  ;;  %v570_v13 = vsub.f32 %v531_v3, %v3816_v6  ;;  %v3021_v6 = vld [vmem:[%s3794_s5 + $0x78] sm:$0xff]  }
  0xe7   : > { %2812 = vmatprep.mubr.bf16.mxu0 %v620_v16  ;;  %2613 = vmatpush3.bf16.xpose.msra.mxu1 %v3016_v43  ;;  %v608_v16 = vmul.f32 %v3820_v9, %v569_v12 }
  0xe8   : > { %2614 = vmatprep.subr.bf16.mxu1 %v3017_v51  ;;  %v609_v17 = vmul.f32 %v3820_v9, %v570_v13  ;;  %v3022_v9 = vld [vmem:[%s3794_s5 + $0x38] sm:$0xff]  }
  0xea   : > { %v628_v20 = vpack.c.bf16 %v609_v17, %v608_v16 }
  0xee   : > { %2813 = vmatmul.mubr.bf16.gmra.mrb[8].mxu0 %v621_v29 }
  0xef   : > { %2816 = vmatprep.mubr.bf16.mxu0 %v622_v32  ;;  %2615 = vmatpush3.bf16.xpose.msra.mxu1 %v3018_v4 }
  0xf0   : > { %2616 = vmatprep.subr.bf16.mxu1 %v3019_v10 }
  0xf6   : > { %2817 = vmatmul.mubr.bf16.gmra.mrb[12].mxu0 %v623_v44 }
  0xf7   : > { %2820 = vmatprep.mubr.bf16.mxu0 %v624_v52  ;;  %2617 = vmatpush3.bf16.xpose.msra.mxu1 %v3020_v18 }
  0xf8   : > { %2618 = vmatprep.subr.bf16.mxu1 %v3021_v6 }
  0xfe   : > { %2821 = vmatmul.mubr.bf16.gmra.mrb[16].mxu0 %v625_v5 }
  0xff   : > { %2824 = vmatprep.mubr.bf16.mxu0 %v626_v11  ;;  %2619 = vmatpush3.bf16.xpose.msra.mxu1 %v3022_v9 }
 0x106   : > { %2825 = vmatmul.mubr.bf16.gmra.mrb[20].mxu0 %v627_v19 }
 0x107   : > { %2828 = vmatprep.mubr.bf16.mxu0 %v628_v20 }
 0x10e   : > { %2829 = vmatmul.mubr.bf16.gmra.mrb[24].mxu0 %v629_v53 }
 0x10f   : > { %2832 = vmatprep.mubr.bf16.mxu0 %v630_v58 }
 0x116   : > { %2833 = vmatmul.mubr.bf16.gmra.mrb[28].mxu0 %v631_v0 }
 0x1b1   : > { %v2806_v21 = vpop.f32.mrb[0].mxu0 }
 0x1b2   : > { %v737_v45 = vpop.f32.mrb[1].mxu0  ;;  %v746_v53 = vadd.f32 %v2806_v21, %v3960_v22 }
 0x1b3   : > { %v2807_v46 = vpop.f32.mrb[2].mxu0  ;;  %v738_v54 = vadd.f32 %v3960_v22, %v737_v45 }
 0x1b4   : > { %v749_v49 = vadd.f32 %v2807_v46, %v3960_v22  ;;  %v740_v50 = vpop.f32.mrb[3].mxu0 }
 0x1b5   : > { %v741_v58 = vadd.f32 %v3960_v22, %v740_v50 }
 0x1b6   : > { %v865_v59 = vpack.c.bf16 %v749_v49, %v746_v53 }
 0x1b7   : > { %v864_v0 = vpack.c.bf16 %v741_v58, %v738_v54 }
 0x1b9   : > { %2620 = vmatprep.mubr.bf16.mxu1 %v864_v0  ;;  %v2810_v23 = vpop.f32.mrb[4].mxu0 }
 0x1ba   : > { %2621 = vmatmul.mubr.bf16.vlgmr.msra.gmra.mrb[0].mxu1 %v864_v0  ;;  %v762_v24 = vadd.f32 %v2810_v23, %v3960_v22  ;;  %v753_v25 = vpop.f32.mrb[5].mxu0 }
 0x1bb   : > { %2622 = vmatprep.mubr.bf16.mxu1 %v865_v59  ;;  %v754_v26 = vadd.f32 %v3960_v22, %v753_v25  ;;  %v2811_v27 = vpop.f32.mrb[6].mxu0 }
 0x1bc   : > { %v765_v28 = vadd.f32 %v2811_v27, %v3960_v22  ;;  %v756_v29 = vpop.f32.mrb[7].mxu0 }
 0x1bd   : > { %v757_v30 = vadd.f32 %v3960_v22, %v756_v29 }
 0x1be   : > { %v867_v31 = vpack.c.bf16 %v765_v28, %v762_v24 }
 0x1bf   : > { %v866_v32 = vpack.c.bf16 %v757_v30, %v754_v26  ;;  %v3024_v30 = vld [vmem:[%s3800_s20] sm:$0xff]  }
 0x1c1   : > { %v2814_v33 = vpop.f32.mrb[8].mxu0 }
 0x1c2   : > { %2623 = vmatmul.mubr.bf16.gmra.mrb[4].mxu1 %v865_v59  ;;  %v778_v34 = vadd.f32 %v2814_v33, %v3960_v22  ;;  %v769_v35 = vpop.f32.mrb[9].mxu0  ;;  %v3027_v33 = vld [vmem:[%s3800_s20 + $0x50] sm:$0xff]  }
 0x1c3   : > { %2624 = vmatprep.mubr.bf16.mxu1 %v866_v32  ;;  %v770_v36 = vadd.f32 %v3960_v22, %v769_v35  ;;  %v2815_v37 = vpop.f32.mrb[10].mxu0  ;;  %v3029_v35 = vld [vmem:[%s3800_s20 + $0x58] sm:$0xff]  }
 0x1c4   : > { %v781_v38 = vadd.f32 %v2815_v37, %v3960_v22  ;;  %v772_v39 = vpop.f32.mrb[11].mxu0  ;;  %v3031_v37 = vld [vmem:[%s3800_s20 + $0x60] sm:$0xff]  }
 0x1c5   : > { %v773_v40 = vadd.f32 %v3960_v22, %v772_v39 }
 0x1c6   : > { %v869_v41 = vpack.c.bf16 %v781_v38, %v778_v34  ;;  %v3028_v34 = vld [vmem:[%s3800_s20 + $0x10] sm:$0xff]  }
 0x1c7   : > { %v868_v42 = vpack.c.bf16 %v773_v40, %v770_v36  ;;  %v3030_v36 = vld [vmem:[%s3800_s20 + $0x18] sm:$0xff]   ;;  %v3032_v40 = vld [vmem:[%s3800_s20 + $0x20] sm:$0xff]  }
 0x1c9   : > { %v2818_v43 = vpop.f32.mrb[12].mxu0 }
 0x1ca   : > { %2625 = vmatmul.mubr.bf16.gmra.mrb[8].mxu1 %v866_v32  ;;  %v794_v44 = vadd.f32 %v2818_v43, %v3960_v22  ;;  %v785_v47 = vpop.f32.mrb[13].mxu0  ;;  %v3026_v32 = vld [vmem:[%s3800_s20 + $0x8] sm:$0xff]  }
 0x1cb   : > { %2626 = vmatprep.mubr.bf16.mxu1 %v867_v31  ;;  %v786_v48 = vadd.f32 %v3960_v22, %v785_v47  ;;  %v2819_v51 = vpop.f32.mrb[14].mxu0  ;;  %v3033_v43 = vld [vmem:[%s3800_s20 + $0x68] sm:$0xff]  }
 0x1cc   : > { %v797_v52 = vadd.f32 %v2819_v51, %v3960_v22  ;;  %v788_v55 = vpop.f32.mrb[15].mxu0 }
 0x1cd   : > { %v789_v56 = vadd.f32 %v3960_v22, %v788_v55 }
 0x1ce   : > { %v871_v57 = vpack.c.bf16 %v797_v52, %v794_v44 }
 0x1cf   : > { %v870_v60 = vpack.c.bf16 %v789_v56, %v786_v48  ;;  %v3034_v48 = vld [vmem:[%s3800_s20 + $0x28] sm:$0xff]  }
 0x1d1   : > { %v2822_v61 = vpop.f32.mrb[16].mxu0 }
 0x1d2   : > { %2627 = vmatmul.mubr.bf16.gmra.mrb[12].mxu1 %v867_v31  ;;  %v810_v62 = vadd.f32 %v2822_v61, %v3960_v22  ;;  %v801_v63 = vpop.f32.mrb[17].mxu0  ;;  %v3025_v31 = vld [vmem:[%s3800_s20 + $0x48] sm:$0xff]  }
 0x1d3   : > { %2628 = vmatprep.mubr.bf16.mxu1 %v868_v42  ;;  %v802_v1 = vadd.f32 %v3960_v22, %v801_v63  ;;  %v2823_v2 = vpop.f32.mrb[18].mxu0 }
 0x1d4   : > { %v813_v3 = vadd.f32 %v2823_v2, %v3960_v22  ;;  %v804_v4 = vpop.f32.mrb[19].mxu0 }
 0x1d5   : > { %v805_v5 = vadd.f32 %v3960_v22, %v804_v4 }
 0x1d6   : > { %v873_v7 = vpack.c.bf16 %v813_v3, %v810_v62 }
 0x1d7   : > { %v872_v8 = vpack.c.bf16 %v805_v5, %v802_v1 }
 0x1d9   : > { %v2826_v10 = vpop.f32.mrb[20].mxu0 }
 0x1da   : > { %2629 = vmatmul.mubr.bf16.gmra.mrb[16].mxu1 %v868_v42  ;;  %v826_v11 = vadd.f32 %v2826_v10, %v3960_v22  ;;  %v817_v12 = vpop.f32.mrb[21].mxu0 }
 0x1db   : > { %2630 = vmatprep.mubr.bf16.mxu1 %v869_v41  ;;  %v818_v13 = vadd.f32 %v3960_v22, %v817_v12  ;;  %v2827_v14 = vpop.f32.mrb[22].mxu0  ;;  %v3035_v12 = vld [vmem:[%s3800_s20 + $0x70] sm:$0xff]  }
 0x1dc   : > { %v829_v15 = vadd.f32 %v2827_v14, %v3960_v22  ;;  %v820_v16 = vpop.f32.mrb[23].mxu0 }
 0x1dd   : > { %v821_v17 = vadd.f32 %v3960_v22, %v820_v16 }
 0x1de   : > { %v875_v18 = vpack.c.bf16 %v829_v15, %v826_v11 }
 0x1df   : > { %v874_v19 = vpack.c.bf16 %v821_v17, %v818_v13  ;;  %v3036_v13 = vld [vmem:[%s3800_s20 + $0x30] sm:$0xff]  }
 0x1e1   : > { %v2830_v20 = vpop.f32.mrb[24].mxu0 }
 0x1e2   : > { %2631 = vmatmul.mubr.bf16.gmra.mrb[20].mxu1 %v869_v41  ;;  %v842_v6 = vadd.f32 %v2830_v20, %v3960_v22  ;;  %v833_v9 = vpop.f32.mrb[25].mxu0  ;;  %v3037_v20 = vld [vmem:[%s3800_s20 + $0x78] sm:$0xff]  }
 0x1e3   : > { %2632 = vmatprep.mubr.bf16.mxu1 %v870_v60  ;;  %v834_v21 = vadd.f32 %v3960_v22, %v833_v9  ;;  %v2831_v45 = vpop.f32.mrb[26].mxu0 }
 0x1e4   : > { %v845_v46 = vadd.f32 %v2831_v45, %v3960_v22  ;;  %v836_v53 = vpop.f32.mrb[27].mxu0 }
 0x1e5   : > { %v837_v49 = vadd.f32 %v3960_v22, %v836_v53 }
 0x1e6   : > { %v877_v50 = vpack.c.bf16 %v845_v46, %v842_v6  ;;  %v3038_v6 = vld [vmem:[%s3800_s20 + $0x38] sm:$0xff]  }
 0x1e7   : > { %v876_v54 = vpack.c.bf16 %v837_v49, %v834_v21 }
 0x1e9   : > { %v2834_v58 = vpop.f32.mrb[28].mxu0 }
 0x1ea   : > { %2633 = vmatmul.mubr.bf16.gmra.mrb[24].mxu1 %v870_v60  ;;  %v858_v59 = vadd.f32 %v2834_v58, %v3960_v22  ;;  %v849_v0 = vpop.f32.mrb[29].mxu0 }
 0x1eb   : > { %2634 = vmatprep.mubr.bf16.mxu1 %v871_v57  ;;  %v850_v23 = vadd.f32 %v3960_v22, %v849_v0  ;;  %v2835_v24 = vpop.f32.mrb[30].mxu0 }
 0x1ec   : > { %v861_v25 = vadd.f32 %v2835_v24, %v3960_v22  ;;  %v852_v26 = vpop.f32.mrb[31].mxu0 }
 0x1ed   : > { %v853_v27 = vadd.f32 %v3960_v22, %v852_v26  ;;  %v3023_v22 = vld [vmem:[%s3800_s20 + $0x40] sm:$0xff]   ;;  %s4547_s20 = smov %s4546_s12 }
 0x1ee   : > { %v879_v28 = vpack.c.bf16 %v861_v25, %v858_v59  ;;  %2652 = vmatprep.subr.bf16.mxu0 %v3023_v22 }
 0x1ef   : > { %v878_v29 = vpack.c.bf16 %v853_v27, %v850_v23  ;;  %2653 = vmatpush3.bf16.msra.mxu0 %v3024_v30 }
 0x1f0   : > { %2654 = vmatprep.subr.bf16.mxu0 %v3025_v31 }
 0x1f2   : > { %2635 = vmatmul.mubr.bf16.gmra.mrb[28].mxu1 %v871_v57 }
 0x1f3   : > { %2636 = vmatprep.mubr.bf16.mxu1 %v872_v8  ;;  %2655 = vmatpush3.bf16.msra.mxu0 %v3026_v32 }
 0x1f4   : > { %2656 = vmatprep.subr.bf16.mxu0 %v3027_v33 }
 0x1f7   : > { %2657 = vmatpush3.bf16.msra.mxu0 %v3028_v34 }
 0x1f8   : > { %2658 = vmatprep.subr.bf16.mxu0 %v3029_v35 }
 0x1fa   : > { %2637 = vmatmul.mubr.bf16.gmra.mrb[32].mxu1 %v872_v8 }
 0x1fb   : > { %2638 = vmatprep.mubr.bf16.mxu1 %v873_v7  ;;  %2659 = vmatpush3.bf16.msra.mxu0 %v3030_v36 }
 0x1fc   : > { %2660 = vmatprep.subr.bf16.mxu0 %v3031_v37 }
 0x1ff   : > { %2661 = vmatpush3.bf16.msra.mxu0 %v3032_v40 }
 0x200   : > { %2662 = vmatprep.subr.bf16.mxu0 %v3033_v43 }
 0x202   : > { %2639 = vmatmul.mubr.bf16.gmra.mrb[36].mxu1 %v873_v7 }
 0x203   : > { %2640 = vmatprep.mubr.bf16.mxu1 %v874_v19  ;;  %2663 = vmatpush3.bf16.msra.mxu0 %v3034_v48 }
 0x204   : > { %2664 = vmatprep.subr.bf16.mxu0 %v3035_v12 }
 0x207   : > { %2665 = vmatpush3.bf16.msra.mxu0 %v3036_v13 }
 0x208   : > { %2666 = vmatprep.subr.bf16.mxu0 %v3037_v20 }
 0x20a   : > { %2641 = vmatmul.mubr.bf16.gmra.mrb[40].mxu1 %v874_v19 }
 0x20b   : > { %2642 = vmatprep.mubr.bf16.mxu1 %v875_v18  ;;  %2667 = vmatpush3.bf16.msra.mxu0 %v3038_v6 }
 0x212   : > { %2643 = vmatmul.mubr.bf16.gmra.mrb[44].mxu1 %v875_v18 }
 0x213   : > { %2644 = vmatprep.mubr.bf16.mxu1 %v876_v54 }
 0x21a   : > { %2645 = vmatmul.mubr.bf16.gmra.mrb[48].mxu1 %v876_v54 }
 0x21b   : > { %2646 = vmatprep.mubr.bf16.mxu1 %v877_v50 }
 0x222   : > { %2647 = vmatmul.mubr.bf16.gmra.mrb[52].mxu1 %v877_v50 }
 0x223   : > { %2648 = vmatprep.mubr.bf16.mxu1 %v878_v29 }
 0x22a   : > { %2649 = vmatmul.mubr.bf16.gmra.mrb[56].mxu1 %v878_v29 }
 0x22b   : > { %2650 = vmatprep.mubr.bf16.mxu1 %v879_v28 }
 0x232   : > { %2651 = vmatmul.mubr.bf16.gmra.mrb[60].mxu1 %v879_v28 }
 0x28d   : > { %v4003_v38 = vpop.f32.mrb[0].mxu1 }
 0x28e   : > { %v4005_v39 = vpop.f32.mrb[1].mxu1 }
 0x28f   : > { %v4008_v41 = vpop.f32.mrb[2].mxu1  ;;  %v1201_v42 = vmax.f32 %v4003_v38, %v4005_v39 }
 0x290   : > { %v4013_v44 = vpop.f32.mrb[3].mxu1 }
 0x291   : > { %1202 = vmax.xlane.f32.xlu0 %v1201_v42  ;;  %v1204_v47 = vmax.f32 %v4008_v41, %v4013_v44 }
 0x295   : > { %1205 = vmax.xlane.f32.xlu0 %v1204_v47  ;;  %v4018_v51 = vpop.f32.mrb[4].mxu1 }
 0x296   : > { %v4020_v52 = vpop.f32.mrb[5].mxu1 }
 0x297   : > { %v4022_v55 = vpop.f32.mrb[6].mxu1  ;;  %v1207_v56 = vmax.f32 %v4018_v51, %v4020_v52 }
 0x298   : > { %v4026_v57 = vpop.f32.mrb[7].mxu1 }
 0x299   : > { %1208 = vmax.xlane.f32.xlu1 %v1207_v56  ;;  %v1210_v60 = vmax.f32 %v4022_v55, %v4026_v57 }
 0x29d   : > { %1211 = vmax.xlane.f32.xlu1 %v1210_v60  ;;  %v4030_v61 = vpop.f32.mrb[8].mxu1 }
 0x29e   : > { %v4032_v62 = vpop.f32.mrb[9].mxu1 }
 0x29f   : > { %v4034_v63 = vpop.f32.mrb[10].mxu1  ;;  %v1213_v1 = vmax.f32 %v4030_v61, %v4032_v62 }
 0x2a0   : > { %v4038_v2 = vpop.f32.mrb[11].mxu1 }
 0x2a1   : > { %1214 = vmax.xlane.f32.xlu0 %v1213_v1  ;;  %v1216_v3 = vmax.f32 %v4034_v63, %v4038_v2 }
 0x2a3   : > { %1217 = vmax.xlane.f32.xlu1 %v1216_v3 }
 0x2a5   : > { %v4042_v4 = vpop.f32.mrb[12].mxu1 }
 0x2a6   : > { %v4044_v5 = vpop.f32.mrb[13].mxu1 }
 0x2a7   : > { %v4046_v7 = vpop.f32.mrb[14].mxu1  ;;  %v1219_v8 = vmax.f32 %v4042_v4, %v4044_v5 }
 0x2a8   : > { %v4050_v10 = vpop.f32.mrb[15].mxu1 }
 0x2a9   : > { %1220 = vmax.xlane.f32.xlu0 %v1219_v8  ;;  %v1222_v11 = vmax.f32 %v4046_v7, %v4050_v10 }
 0x2ab   : > { %1223 = vmax.xlane.f32.xlu1 %v1222_v11 }
 0x2ad   : > { %v4056_v14 = vpop.f32.mrb[16].mxu1 }
 0x2ae   : > { %v4058_v15 = vpop.f32.mrb[17].mxu1 }
 0x2af   : > { %v4060_v16 = vpop.f32.mrb[18].mxu1  ;;  %v1225_v17 = vmax.f32 %v4056_v14, %v4058_v15 }
 0x2b0   : > { %v4064_v18 = vpop.f32.mrb[19].mxu1 }
 0x2b1   : > { %1226 = vmax.xlane.f32.xlu0 %v1225_v17  ;;  %v1228_v19 = vmax.f32 %v4060_v16, %v4064_v18 }
 0x2b3   : > { %1229 = vmax.xlane.f32.xlu1 %v1228_v19 }
 0x2b5   : > { %v4070_v9 = vpop.f32.mrb[20].mxu1 }
 0x2b6   : > { %v4072_v21 = vpop.f32.mrb[21].mxu1 }
 0x2b7   : > { %v4074_v45 = vpop.f32.mrb[22].mxu1  ;;  %v1231_v46 = vmax.f32 %v4070_v9, %v4072_v21 }
 0x2b8   : > { %v4078_v53 = vpop.f32.mrb[23].mxu1 }
 0x2b9   : > { %1232 = vmax.xlane.f32.xlu0 %v1231_v46  ;;  %v1234_v49 = vmax.f32 %v4074_v45, %v4078_v53 }
 0x2bb   : > { %1235 = vmax.xlane.f32.xlu1 %v1234_v49 }
 0x2bd   : > { %v4082_v50 = vpop.f32.mrb[24].mxu1 }
 0x2be   : > { %v4084_v54 = vpop.f32.mrb[25].mxu1 }
 0x2bf   : > { %v4086_v58 = vpop.f32.mrb[26].mxu1  ;;  %v1237_v59 = vmax.f32 %v4082_v50, %v4084_v54 }
 0x2c0   : > { %v4090_v0 = vpop.f32.mrb[27].mxu1 }
 0x2c1   : > { %1238 = vmax.xlane.f32.xlu0 %v1237_v59  ;;  %v1240_v23 = vmax.f32 %v4086_v58, %v4090_v0 }
 0x2c3   : > { %1241 = vmax.xlane.f32.xlu1 %v1240_v23 }
 0x2c5   : > { %v4094_v24 = vpop.f32.mrb[28].mxu1 }
 0x2c6   : > { %v4096_v25 = vpop.f32.mrb[29].mxu1 }
 0x2c7   : > { %v4098_v26 = vpop.f32.mrb[30].mxu1  ;;  %v1243_v27 = vmax.f32 %v4094_v24, %v4096_v25 }
 0x2c8   : > { %v4102_v28 = vpop.f32.mrb[31].mxu1 }
 0x2c9   : > { %1244 = vmax.xlane.f32.xlu0 %v1243_v27  ;;  %v1246_v29 = vmax.f32 %v4098_v26, %v4102_v28 }
 0x2cb   : > { %1247 = vmax.xlane.f32.xlu1 %v1246_v29 }
 0x2cd   : > { %v4106_v22 = vpop.f32.mrb[32].mxu1 }
 0x2ce   : > { %v4108_v30 = vpop.f32.mrb[33].mxu1 }
 0x2cf   : > { %v4110_v31 = vpop.f32.mrb[34].mxu1  ;;  %v1249_v32 = vmax.f32 %v4106_v22, %v4108_v30 }
 0x2d0   : > { %v4114_v33 = vpop.f32.mrb[35].mxu1 }
 0x2d1   : > { %1250 = vmax.xlane.f32.xlu0 %v1249_v32  ;;  %v1252_v34 = vmax.f32 %v4110_v31, %v4114_v33 }
 0x2d3   : > { %1253 = vmax.xlane.f32.xlu1 %v1252_v34 }
 0x2d5   : > { %v4118_v35 = vpop.f32.mrb[36].mxu1 }
 0x2d6   : > { %v4120_v36 = vpop.f32.mrb[37].mxu1 }
 0x2d7   : > { %v4122_v37 = vpop.f32.mrb[38].mxu1  ;;  %v1255_v40 = vmax.f32 %v4118_v35, %v4120_v36 }
 0x2d8   : > { %v4126_v42 = vpop.f32.mrb[39].mxu1 }
 0x2d9   : > { %1256 = vmax.xlane.f32.xlu0 %v1255_v40  ;;  %v1258_v43 = vmax.f32 %v4122_v37, %v4126_v42 }
 0x2db   : > { %1259 = vmax.xlane.f32.xlu1 %v1258_v43 }
 0x2dd   : > { %v4130_v47 = vpop.f32.mrb[40].mxu1 }
 0x2de   : > { %v4132_v48 = vpop.f32.mrb[41].mxu1 }
 0x2df   : > { %v4134_v56 = vpop.f32.mrb[42].mxu1  ;;  %v1261_v60 = vmax.f32 %v4130_v47, %v4132_v48 }
 0x2e0   : > { %v4138_v1 = vpop.f32.mrb[43].mxu1 }
 0x2e1   : > { %1262 = vmax.xlane.f32.xlu0 %v1261_v60  ;;  %v1264_v3 = vmax.f32 %v4134_v56, %v4138_v1 }
 0x2e3   : > { %1265 = vmax.xlane.f32.xlu1 %v1264_v3 }
 0x2e5   : > { %v4142_v8 = vpop.f32.mrb[44].mxu1 }
 0x2e6   : > { %v4144_v11 = vpop.f32.mrb[45].mxu1 }
 0x2e7   : > { %v4146_v12 = vpop.f32.mrb[46].mxu1  ;;  %v1267_v13 = vmax.f32 %v4142_v8, %v4144_v11 }
 0x2e8   : > { %v4150_v17 = vpop.f32.mrb[47].mxu1 }
 0x2e9   : > { %1268 = vmax.xlane.f32.xlu0 %v1267_v13  ;;  %v1270_v19 = vmax.f32 %v4146_v12, %v4150_v17 }
 0x2eb   : > { %1271 = vmax.xlane.f32.xlu1 %v1270_v19 }
 0x2ed   : > { %v4154_v20 = vpop.f32.mrb[48].mxu1 }
 0x2ee   : > { %v4156_v6 = vpop.f32.mrb[49].mxu1 }
 0x2ef   : > { %4514 = vst [vmem:[#allocation22_spill] sm:$0xff] %v4156_v6  ;;  %v4158_v46 = vpop.f32.mrb[50].mxu1  ;;  %v1273_v49 = vmax.f32 %v4154_v20, %v4156_v6 }
 0x2f0   : > { %4515 = vst [vmem:[#allocation23_spill] sm:$0xff] %v4158_v46  ;;  %v4162_v59 = vpop.f32.mrb[51].mxu1 }
 0x2f1   : > { %4516 = vst [vmem:[#allocation24_spill] sm:$0xff] %v4162_v59  ;;  %1274 = vmax.xlane.f32.xlu0 %v1273_v49  ;;  %v1276_v23 = vmax.f32 %v4158_v46, %v4162_v59 }
 0x2f3   : > { %1277 = vmax.xlane.f32.xlu1 %v1276_v23 }
 0x2f5   : > { %v4166_v27 = vpop.f32.mrb[52].mxu1 }
 0x2f6   : > { %4517 = vst [vmem:[#allocation25_spill] sm:$0xff] %v4166_v27  ;;  %v4168_v29 = vpop.f32.mrb[53].mxu1 }
 0x2f7   : > { %4518 = vst [vmem:[#allocation26_spill] sm:$0xff] %v4168_v29  ;;  %v4170_v32 = vpop.f32.mrb[54].mxu1  ;;  %v1279_v34 = vmax.f32 %v4166_v27, %v4168_v29 }
 0x2f8   : > { %4519 = vst [vmem:[#allocation27_spill] sm:$0xff] %v4170_v32  ;;  %v4174_v40 = vpop.f32.mrb[55].mxu1 }
 0x2f9   : > { %4520 = vst [vmem:[#allocation28_spill] sm:$0xff] %v4174_v40  ;;  %1280 = vmax.xlane.f32.xlu0 %v1279_v34  ;;  %v1282_v43 = vmax.f32 %v4170_v32, %v4174_v40 }
 0x2fb   : > { %1283 = vmax.xlane.f32.xlu1 %v1282_v43 }
 0x2fd   : > { %v4178_v60 = vpop.f32.mrb[56].mxu1 }
 0x2fe   : > { %4521 = vst [vmem:[#allocation29_spill] sm:$0xff] %v4178_v60  ;;  %v4180_v3 = vpop.f32.mrb[57].mxu1 }
 0x2ff   : > { %4522 = vst [vmem:[#allocation30_spill] sm:$0xff] %v4180_v3  ;;  %v4182_v13 = vpop.f32.mrb[58].mxu1  ;;  %v1285_v19 = vmax.f32 %v4178_v60, %v4180_v3 }
 0x300   : > { %4523 = vst [vmem:[#allocation31_spill] sm:$0xff] %v4182_v13  ;;  %v4186_v49 = vpop.f32.mrb[59].mxu1 }
 0x301   : > { %4524 = vst [vmem:[#allocation32_spill] sm:$0xff] %v4186_v49  ;;  %1286 = vmax.xlane.f32.xlu0 %v1285_v19  ;;  %v1288_v23 = vmax.f32 %v4182_v13, %v4186_v49 }
 0x303   : > { %1289 = vmax.xlane.f32.xlu1 %v1288_v23 }
 0x305   : > { %v4190_v34 = vpop.f32.mrb[60].mxu1 }
 0x306   : > { %4525 = vst [vmem:[#allocation33_spill] sm:$0xff] %v4190_v34  ;;  %v4192_v40 = vpop.f32.mrb[61].mxu1 }
 0x307   : > { %4526 = vst [vmem:[#allocation34_spill] sm:$0xff] %v4192_v40  ;;  %v4194_v43 = vpop.f32.mrb[62].mxu1  ;;  %v1291_v32 = vmax.f32 %v4190_v34, %v4192_v40 }
 0x308   : > { %4527 = vst [vmem:[#allocation35_spill] sm:$0xff] %v4194_v43  ;;  %v4198_v29 = vpop.f32.mrb[63].mxu1 }
 0x309   : > { %4528 = vst [vmem:[#allocation36_spill] sm:$0xff] %v4198_v29  ;;  %1292 = vmax.xlane.f32.xlu0 %v1291_v32  ;;  %v1294_v3 = vmax.f32 %v4194_v43, %v4198_v29 }
 0x30b   : > { %1295 = vmax.xlane.f32.xlu1 %v1294_v3 }
 0x31e   : > { %v1203_v19 = vpop.xlane.xlu0 %1202 }
 0x31f   : > { %v1297_v23 = vsub.f32 %v4003_v38, %v1203_v19  ;;  %v1298_v49 = vsub.f32 %v4005_v39, %v1203_v19 }
 0x322   : > { %v1206_v60 = vpop.xlane.xlu0 %1205 }
 0x323   : > { %v1299_v13 = vsub.f32 %v4008_v41, %v1206_v60  ;;  %v1300_v27 = vsub.f32 %v4013_v44, %v1206_v60 }
 0x325   : > { %v1361_v59 = vpack.c.bf16 %v1299_v13, %v1297_v23  ;;  %v1362_v46 = vpack.c.bf16 %v1300_v27, %v1298_v49 }
 0x326   : > { %v1209_v40 = vpop.xlane.xlu1 %1208 }
 0x327   : > { %v1394_v34 = vmul.bf16 1069105081, %v1361_v59  ;;  %v1397_v6 = vmul.bf16 1069105081, %v1362_v46  ;;  %v1301_v3 = vsub.f32 %v4018_v51, %v1209_v40  ;;  %v1302_v29 = vsub.f32 %v4020_v52, %v1209_v40 }
 0x329   : > { %3047 = vpow.bf16 %v1394_v34 }
 0x32a   : > { %3049 = vpow.bf16 %v1397_v6  ;;  %v1212_v32 = vpop.xlane.xlu1 %1211 }
 0x32b   : > { %v1303_v38 = vsub.f32 %v4022_v55, %v1212_v32  ;;  %v1304_v39 = vsub.f32 %v4026_v57, %v1212_v32 }
 0x32d   : > { %v1363_v19 = vpack.c.bf16 %v1303_v38, %v1301_v3  ;;  %v1364_v41 = vpack.c.bf16 %v1304_v39, %v1302_v29 }
 0x32e   : > { %v1215_v43 = vpop.xlane.xlu0 %1214 }
 0x32f   : > { %v1400_v44 = vmul.bf16 1069105081, %v1363_v19  ;;  %v1403_v60 = vmul.bf16 1069105081, %v1364_v41  ;;  %v1305_v27 = vsub.f32 %v4030_v61, %v1215_v43  ;;  %v1306_v6 = vsub.f32 %v4032_v62, %v1215_v43 }
 0x330   : > { %v1218_v59 = vpop.xlane.xlu1 %1217 }
 0x331   : > { %3051 = vpow.bf16 %v1400_v44  ;;  %v1307_v46 = vsub.f32 %v4034_v63, %v1218_v59  ;;  %v1308_v51 = vsub.f32 %v4038_v2, %v1218_v59 }
 0x332   : > { %3053 = vpow.bf16 %v1403_v60 }
 0x333   : > { %v1365_v52 = vpack.c.bf16 %v1307_v46, %v1305_v27  ;;  %v1366_v55 = vpack.c.bf16 %v1308_v51, %v1306_v6 }
 0x334   : > { %v3048_v40 = vpop.eup %3047 }
 0x335   : > { %v3050_v57 = vpop.eup %3049  ;;  %v1406_v13 = vmul.bf16 1069105081, %v1365_v52  ;;  %v1409_v29 = vmul.bf16 1069105081, %v1366_v55  ;;  %v1489_v49 = vunpack.c.l.bf16 %v3048_v40  ;;  %v1491_v34 = vunpack.c.h.bf16 %v3048_v40 }
 0x336   : > { %1809 = vmatprep.mubr.bf16.mxu0 %v3050_v57  ;;  %v1221_v23 = vpop.xlane.xlu0 %1220  ;;  %v1490_v61 = vunpack.c.l.bf16 %v3050_v57  ;;  %v1492_v32 = vunpack.c.h.bf16 %v3050_v57 }
 0x337   : > { %3055 = vpow.bf16 %v1406_v13  ;;  %1810 = vmatmul.mubr.bf16.vlgmr.msra.gmra.mrb[32].mxu0 %v3048_v40  ;;  %v1309_v2 = vsub.f32 %v4042_v4, %v1221_v23  ;;  %v1310_v3 = vsub.f32 %v4044_v5, %v1221_v23 }
 0x338   : > { %3057 = vpow.bf16 %v1409_v29  ;;  %v1224_v62 = vpop.xlane.xlu1 %1223  ;;  %v1553_v63 = vadd.f32 %v1490_v61, %v1489_v49  ;;  %v1556_v43 = vadd.f32 %v1492_v32, %v1491_v34 }
 0x339   : > { %v1311_v38 = vsub.f32 %v4046_v7, %v1224_v62  ;;  %v1312_v39 = vsub.f32 %v4050_v10, %v1224_v62 }
 0x33a   : > { %1554 = vadd.xlane.f32.xlu0 %v1553_v63  ;;  %1557 = vadd.xlane.f32.xlu1 %v1556_v43 }
 0x33b   : > { %v1367_v19 = vpack.c.bf16 %v1311_v38, %v1309_v2  ;;  %v1368_v41 = vpack.c.bf16 %v1312_v39, %v1310_v3 }
 0x33c   : > { %v3052_v44 = vpop.eup %3051 }
 0x33d   : > { %v3054_v60 = vpop.eup %3053  ;;  %v1412_v27 = vmul.bf16 1069105081, %v1367_v19  ;;  %v1415_v59 = vmul.bf16 1069105081, %v1368_v41  ;;  %v1493_v6 = vunpack.c.l.bf16 %v3052_v44  ;;  %v1495_v46 = vunpack.c.h.bf16 %v3052_v44 }
 0x33e   : > { %1817 = vmatprep.mubr.bf16.mxu0 %v3054_v60  ;;  %v1227_v51 = vpop.xlane.xlu0 %1226  ;;  %v1494_v52 = vunpack.c.l.bf16 %v3054_v60  ;;  %v1496_v4 = vunpack.c.h.bf16 %v3054_v60 }
 0x33f   : > { %3059 = vpow.bf16 %v1412_v27  ;;  %1818 = vmatmul.mubr.bf16.gmra.mrb[36].mxu0 %v3052_v44  ;;  %v1313_v55 = vsub.f32 %v4056_v14, %v1227_v51  ;;  %v1314_v40 = vsub.f32 %v4058_v15, %v1227_v51 }
 0x340   : > { %3061 = vpow.bf16 %v1415_v59  ;;  %v1230_v5 = vpop.xlane.xlu1 %1229  ;;  %v1559_v7 = vadd.f32 %v1494_v52, %v1493_v6  ;;  %v1562_v10 = vadd.f32 %v1496_v4, %v1495_v46 }
 0x341   : > { %v1315_v57 = vsub.f32 %v4060_v16, %v1230_v5  ;;  %v1316_v13 = vsub.f32 %v4064_v18, %v1230_v5 }
 0x342   : > { %v3056_v29 = vpop.eup %3055  ;;  %1560 = vadd.xlane.f32.xlu0 %v1559_v7  ;;  %1563 = vadd.xlane.f32.xlu1 %v1562_v10 }
 0x343   : > { %v3058_v49 = vpop.eup %3057  ;;  %v1369_v34 = vpack.c.bf16 %v1315_v57, %v1313_v55  ;;  %v1370_v23 = vpack.c.bf16 %v1316_v13, %v1314_v40  ;;  %v1497_v61 = vunpack.c.l.bf16 %v3056_v29  ;;  %v1499_v32 = vunpack.c.h.bf16 %v3056_v29 }
 0x344   : > { %1825 = vmatprep.mubr.bf16.mxu0 %v3058_v49  ;;  %v1498_v62 = vunpack.c.l.bf16 %v3058_v49  ;;  %v1500_v63 = vunpack.c.h.bf16 %v3058_v49 }
 0x345   : > { %v1418_v43 = vmul.bf16 1069105081, %v1369_v34  ;;  %v1421_v2 = vmul.bf16 1069105081, %v1370_v23 }
 0x346   : > { %v1233_v14 = vpop.xlane.xlu0 %1232  ;;  %v1565_v3 = vadd.f32 %v1498_v62, %v1497_v61  ;;  %v1568_v15 = vadd.f32 %v1500_v63, %v1499_v32 }
 0x347   : > { %3063 = vpow.bf16 %v1418_v43  ;;  %1826 = vmatmul.mubr.bf16.gmra.mrb[40].mxu0 %v3056_v29  ;;  %v1317_v18 = vsub.f32 %v4070_v9, %v1233_v14  ;;  %v1318_v38 = vsub.f32 %v4072_v21, %v1233_v14 }
 0x348   : > { %3065 = vpow.bf16 %v1421_v2  ;;  %1566 = vadd.xlane.f32.xlu0 %v1565_v3  ;;  %1569 = vadd.xlane.f32.xlu1 %v1568_v15  ;;  %v1236_v16 = vpop.xlane.xlu1 %1235 }
 0x349   : > { %v1319_v39 = vsub.f32 %v4074_v45, %v1236_v16  ;;  %v1320_v19 = vsub.f32 %v4078_v53, %v1236_v16 }
 0x34a   : > { %v3060_v41 = vpop.eup %3059 }
 0x34b   : > { %v3062_v44 = vpop.eup %3061  ;;  %v1371_v60 = vpack.c.bf16 %v1319_v39, %v1317_v18  ;;  %v1372_v27 = vpack.c.bf16 %v1320_v19, %v1318_v38  ;;  %v1501_v59 = vunpack.c.l.bf16 %v3060_v41  ;;  %v1503_v6 = vunpack.c.h.bf16 %v3060_v41 }
 0x34c   : > { %1833 = vmatprep.mubr.bf16.mxu0 %v3062_v44  ;;  %v1502_v46 = vunpack.c.l.bf16 %v3062_v44  ;;  %v1504_v51 = vunpack.c.h.bf16 %v3062_v44 }
 0x34d   : > { %v1424_v52 = vmul.bf16 1069105081, %v1371_v60  ;;  %v1427_v4 = vmul.bf16 1069105081, %v1372_v27 }
 0x34e   : > { %v1239_v5 = vpop.xlane.xlu0 %1238  ;;  %v1571_v7 = vadd.f32 %v1502_v46, %v1501_v59  ;;  %v1574_v9 = vadd.f32 %v1504_v51, %v1503_v6 }
 0x34f   : > { %3067 = vpow.bf16 %v1424_v52  ;;  %1834 = vmatmul.mubr.bf16.gmra.mrb[44].mxu0 %v3060_v41  ;;  %v1321_v45 = vsub.f32 %v4082_v50, %v1239_v5  ;;  %v1322_v53 = vsub.f32 %v4084_v54, %v1239_v5 }
 0x350   : > { %3069 = vpow.bf16 %v1427_v4  ;;  %1572 = vadd.xlane.f32.xlu0 %v1571_v7  ;;  %1575 = vadd.xlane.f32.xlu1 %v1574_v9  ;;  %v1242_v21 = vpop.xlane.xlu1 %1241 }
 0x351   : > { %v1323_v10 = vsub.f32 %v4086_v58, %v1242_v21  ;;  %v1324_v55 = vsub.f32 %v4090_v0, %v1242_v21 }
 0x352   : > { %v3064_v40 = vpop.eup %3063 }
 0x353   : > { %v3066_v57 = vpop.eup %3065  ;;  %v1373_v13 = vpack.c.bf16 %v1323_v10, %v1321_v45  ;;  %v1374_v29 = vpack.c.bf16 %v1324_v55, %v1322_v53  ;;  %v1505_v49 = vunpack.c.l.bf16 %v3064_v40  ;;  %v1507_v34 = vunpack.c.h.bf16 %v3064_v40 }
 0x354   : > { %1841 = vmatprep.mubr.bf16.mxu0 %v3066_v57  ;;  %v1506_v23 = vunpack.c.l.bf16 %v3066_v57  ;;  %v1508_v61 = vunpack.c.h.bf16 %v3066_v57 }
 0x355   : > { %v1430_v32 = vmul.bf16 1069105081, %v1373_v13  ;;  %v1433_v62 = vmul.bf16 1069105081, %v1374_v29 }
 0x356   : > { %v1245_v63 = vpop.xlane.xlu0 %1244  ;;  %v1577_v43 = vadd.f32 %v1506_v23, %v1505_v49  ;;  %v1580_v50 = vadd.f32 %v1508_v61, %v1507_v34 }
 0x357   : > { %3071 = vpow.bf16 %v1430_v32  ;;  %1842 = vmatmul.mubr.bf16.gmra.mrb[48].mxu0 %v3064_v40  ;;  %v1325_v58 = vsub.f32 %v4094_v24, %v1245_v63  ;;  %v1326_v0 = vsub.f32 %v4096_v25, %v1245_v63  ;;  %v3039_v25 = vld [vmem:[#allocation10] sm:$0xff]  }
 0x358   : > { %3073 = vpow.bf16 %v1433_v62  ;;  %1578 = vadd.xlane.f32.xlu0 %v1577_v43  ;;  %1581 = vadd.xlane.f32.xlu1 %v1580_v50  ;;  %v1248_v54 = vpop.xlane.xlu1 %1247 }
 0x359   : > { %v1327_v2 = vsub.f32 %v4098_v26, %v1248_v54  ;;  %v1328_v14 = vsub.f32 %v4102_v28, %v1248_v54  ;;  %2884 = vmatprep.subr.bf16.mxu1 %v3039_v25  ;;  %2836 = vmatprep.subr.bf16.mxu0 %v3039_v25 }
 0x35a   : > { %v3068_v3 = vpop.eup %3067  ;;  %2892 = vmatpush3.bf16.msra.mxu1 %v3039_v25  ;;  %2837 = vmatpush3.bf16.msra.mxu0 %v3039_v25 }
 0x35b   : > { %v3070_v15 = vpop.eup %3069  ;;  %v1375_v16 = vpack.c.bf16 %v1327_v2, %v1325_v58  ;;  %v1376_v18 = vpack.c.bf16 %v1328_v14, %v1326_v0  ;;  %v1509_v38 = vunpack.c.l.bf16 %v3068_v3  ;;  %v1511_v39 = vunpack.c.h.bf16 %v3068_v3 }
 0x35c   : > { %1849 = vmatprep.mubr.bf16.mxu0 %v3070_v15  ;;  %v1510_v19 = vunpack.c.l.bf16 %v3070_v15  ;;  %v1512_v41 = vunpack.c.h.bf16 %v3070_v15 }
 0x35d   : > { %v1436_v44 = vmul.bf16 1069105081, %v1375_v16  ;;  %v1439_v60 = vmul.bf16 1069105081, %v1376_v18 }
 0x35e   : > { %v1251_v27 = vpop.xlane.xlu0 %1250  ;;  %v1583_v59 = vadd.f32 %v1510_v19, %v1509_v38  ;;  %v1586_v24 = vadd.f32 %v1512_v41, %v1511_v39 }
 0x35f   : > { %3075 = vpow.bf16 %v1436_v44  ;;  %1850 = vmatmul.mubr.bf16.gmra.mrb[52].mxu0 %v3068_v3  ;;  %v1329_v26 = vsub.f32 %v4106_v22, %v1251_v27  ;;  %v1330_v6 = vsub.f32 %v4108_v30, %v1251_v27 }
 0x360   : > { %3077 = vpow.bf16 %v1439_v60  ;;  %1584 = vadd.xlane.f32.xlu0 %v1583_v59  ;;  %1587 = vadd.xlane.f32.xlu1 %v1586_v24  ;;  %v1254_v28 = vpop.xlane.xlu1 %1253 }
 0x361   : > { %v1331_v46 = vsub.f32 %v4110_v31, %v1254_v28  ;;  %v1332_v51 = vsub.f32 %v4114_v33, %v1254_v28 }
 0x362   : > { %v3072_v52 = vpop.eup %3071 }
 0x363   : > { %v3074_v4 = vpop.eup %3073  ;;  %v1377_v5 = vpack.c.bf16 %v1331_v46, %v1329_v26  ;;  %v1378_v7 = vpack.c.bf16 %v1332_v51, %v1330_v6  ;;  %v1513_v9 = vunpack.c.l.bf16 %v3072_v52  ;;  %v1515_v21 = vunpack.c.h.bf16 %v3072_v52 }
 0x364   : > { %1857 = vmatprep.mubr.bf16.mxu0 %v3074_v4  ;;  %v1514_v22 = vunpack.c.l.bf16 %v3074_v4  ;;  %v1516_v45 = vunpack.c.h.bf16 %v3074_v4 }
 0x365   : > { %v1442_v53 = vmul.bf16 1069105081, %v1377_v5  ;;  %v1445_v10 = vmul.bf16 1069105081, %v1378_v7 }
 0x366   : > { %v1257_v30 = vpop.xlane.xlu0 %1256  ;;  %v1589_v55 = vadd.f32 %v1514_v22, %v1513_v9  ;;  %v1592_v31 = vadd.f32 %v1516_v45, %v1515_v21 }
 0x367   : > { %3079 = vpow.bf16 %v1442_v53  ;;  %1858 = vmatmul.mubr.bf16.gmra.mrb[56].mxu0 %v3072_v52  ;;  %v1333_v40 = vsub.f32 %v4118_v35, %v1257_v30  ;;  %v1334_v57 = vsub.f32 %v4120_v36, %v1257_v30  ;;  %v3040_v36 = vld [vmem:[#allocation10 + $0x8] sm:$0xff]   ;;  %v4529_v53 = vld [vmem:[#allocation22_spill] sm:$0xff] }
 0x368   : > { %3081 = vpow.bf16 %v1445_v10  ;;  %1590 = vadd.xlane.f32.xlu0 %v1589_v55  ;;  %1593 = vadd.xlane.f32.xlu1 %v1592_v31  ;;  %v1260_v33 = vpop.xlane.xlu1 %1259  ;;  %v4530_v30 = vld [vmem:[#allocation23_spill] sm:$0xff]  ;;  %v4531_v31 = vld [vmem:[#allocation24_spill] sm:$0xff] }
 0x369   : > { %v1335_v13 = vsub.f32 %v4122_v37, %v1260_v33  ;;  %v1336_v29 = vsub.f32 %v4126_v42, %v1260_v33  ;;  %2885 = vmatprep.subr.bf16.mxu1 %v3040_v36  ;;  %2838 = vmatprep.subr.bf16.mxu0 %v3040_v36 }
 0x36a   : > { %v3076_v49 = vpop.eup %3075  ;;  %2893 = vmatpush3.bf16.msra.mxu1 %v3040_v36  ;;  %2839 = vmatpush3.bf16.msra.mxu0 %v3040_v36 }
 0x36b   : > { %v3078_v34 = vpop.eup %3077  ;;  %v1379_v23 = vpack.c.bf16 %v1335_v13, %v1333_v40  ;;  %v1380_v61 = vpack.c.bf16 %v1336_v29, %v1334_v57  ;;  %v1517_v32 = vunpack.c.l.bf16 %v3076_v49  ;;  %v1519_v62 = vunpack.c.h.bf16 %v3076_v49 }
 0x36c   : > { %1865 = vmatprep.mubr.bf16.mxu0 %v3078_v34  ;;  %v1518_v63 = vunpack.c.l.bf16 %v3078_v34  ;;  %v1520_v43 = vunpack.c.h.bf16 %v3078_v34 }
 0x36d   : > { %v1448_v50 = vmul.bf16 1069105081, %v1379_v23  ;;  %v1451_v54 = vmul.bf16 1069105081, %v1380_v61 }
 0x36e   : > { %v1263_v58 = vpop.xlane.xlu0 %1262  ;;  %v1595_v0 = vadd.f32 %v1518_v63, %v1517_v32  ;;  %v1598_v35 = vadd.f32 %v1520_v43, %v1519_v62 }
 0x36f   : > { %3083 = vpow.bf16 %v1448_v50  ;;  %1866 = vmatmul.mubr.bf16.gmra.mrb[60].mxu0 %v3076_v49  ;;  %v1337_v37 = vsub.f32 %v4130_v47, %v1263_v58  ;;  %v1338_v2 = vsub.f32 %v4132_v48, %v1263_v58  ;;  %v3042_v50 = vld [vmem:[#allocation10 + $0x18] sm:$0xff]  }
 0x370   : > { %3085 = vpow.bf16 %v1451_v54  ;;  %1596 = vadd.xlane.f32.xlu0 %v1595_v0  ;;  %1599 = vadd.xlane.f32.xlu1 %v1598_v35  ;;  %v1266_v42 = vpop.xlane.xlu1 %1265  ;;  %v4532_v54 = vld [vmem:[#allocation25_spill] sm:$0xff]  ;;  %v4533_v35 = vld [vmem:[#allocation26_spill] sm:$0xff] }
 0x371   : > { %v1339_v14 = vsub.f32 %v4134_v56, %v1266_v42  ;;  %v1340_v3 = vsub.f32 %v4138_v1, %v1266_v42 }
 0x372   : > { %v3080_v15 = vpop.eup %3079 }
 0x373   : > { %v3082_v16 = vpop.eup %3081  ;;  %v1381_v18 = vpack.c.bf16 %v1339_v14, %v1337_v37  ;;  %v1382_v38 = vpack.c.bf16 %v1340_v3, %v1338_v2  ;;  %v1521_v39 = vunpack.c.l.bf16 %v3080_v15  ;;  %v1523_v19 = vunpack.c.h.bf16 %v3080_v15  ;;  %v4534_v37 = vld [vmem:[#allocation27_spill] sm:$0xff]  ;;  %v4535_v2 = vld [vmem:[#allocation28_spill] sm:$0xff] }
 0x374   : > { %1873 = vmatprep.mubr.bf16.mxu0 %v3082_v16  ;;  %v1522_v47 = vunpack.c.l.bf16 %v3082_v16  ;;  %v1524_v41 = vunpack.c.h.bf16 %v3082_v16 }
 0x375   : > { %v1454_v44 = vmul.bf16 1069105081, %v1381_v18  ;;  %v1457_v60 = vmul.bf16 1069105081, %v1382_v38 }
 0x376   : > { %v1269_v48 = vpop.xlane.xlu0 %1268  ;;  %v1601_v27 = vadd.f32 %v1522_v47, %v1521_v39  ;;  %v1604_v56 = vadd.f32 %v1524_v41, %v1523_v19  ;;  %v3043_v19 = vld [vmem:[#allocation10 + $0x20] sm:$0xff]  }
 0x377   : > { %3087 = vpow.bf16 %v1454_v44  ;;  %1874 = vmatmul.mubr.bf16.gmra.mrb[64].mxu0 %v3080_v15  ;;  %v1341_v59 = vsub.f32 %v4142_v8, %v1269_v48  ;;  %v1342_v24 = vsub.f32 %v4144_v11, %v1269_v48  ;;  %v3041_v11 = vld [vmem:[#allocation10 + $0x10] sm:$0xff]  }
 0x378   : > { %3089 = vpow.bf16 %v1457_v60  ;;  %1602 = vadd.xlane.f32.xlu0 %v1601_v27  ;;  %1605 = vadd.xlane.f32.xlu1 %v1604_v56  ;;  %v1272_v1 = vpop.xlane.xlu1 %1271 }
 0x379   : > { %v1343_v25 = vsub.f32 %v4146_v12, %v1272_v1  ;;  %v1344_v26 = vsub.f32 %v4150_v17, %v1272_v1  ;;  %2886 = vmatprep.subr.bf16.mxu1 %v3041_v11  ;;  %2840 = vmatprep.subr.bf16.mxu0 %v3041_v11  ;;  %v3044_v1 = vld [vmem:[#allocation10 + $0x28] sm:$0xff]  }
 0x37a   : > { %v3084_v28 = vpop.eup %3083  ;;  %2894 = vmatpush3.bf16.msra.mxu1 %v3041_v11  ;;  %2841 = vmatpush3.bf16.msra.mxu0 %v3041_v11 }
 0x37b   : > { %v3086_v6 = vpop.eup %3085  ;;  %v1383_v46 = vpack.c.bf16 %v1343_v25, %v1341_v59  ;;  %v1384_v51 = vpack.c.bf16 %v1344_v26, %v1342_v24  ;;  %v1525_v52 = vunpack.c.l.bf16 %v3084_v28  ;;  %v1527_v4 = vunpack.c.h.bf16 %v3084_v28  ;;  %2842 = vmatprep.subr.bf16.mxu0 %v3042_v50  ;;  %2887 = vmatprep.subr.bf16.mxu1 %v3042_v50  ;;  %v4536_v59 = vld [vmem:[#allocation29_spill] sm:$0xff]  ;;  %v4537_v26 = vld [vmem:[#allocation30_spill] sm:$0xff] }
 0x37c   : > { %1881 = vmatprep.mubr.bf16.mxu0 %v3086_v6  ;;  %v1526_v5 = vunpack.c.l.bf16 %v3086_v6  ;;  %v1528_v7 = vunpack.c.h.bf16 %v3086_v6  ;;  %v4538_v6 = vld [vmem:[#allocation31_spill] sm:$0xff] }
 0x37d   : > { %v1460_v9 = vmul.bf16 1069105081, %v1383_v46  ;;  %v1463_v21 = vmul.bf16 1069105081, %v1384_v51  ;;  %v4539_v51 = vld [vmem:[#allocation32_spill] sm:$0xff] }
 0x37e   : > { %v1275_v22 = vpop.xlane.xlu0 %1274  ;;  %v1607_v45 = vadd.f32 %v1526_v5, %v1525_v52  ;;  %v1610_v8 = vadd.f32 %v1528_v7, %v1527_v4  ;;  %2843 = vmatpush3.bf16.msra.mxu0 %v3042_v50  ;;  %2895 = vmatpush3.bf16.msra.mxu1 %v3042_v50 }
 0x37f   : > { %3091 = vpow.bf16 %v1460_v9  ;;  %1882 = vmatmul.mubr.bf16.gmra.mrb[68].mxu0 %v3084_v28  ;;  %v1345_v12 = vsub.f32 %v4154_v20, %v1275_v22  ;;  %v1346_v10 = vsub.f32 %v4529_v53, %v1275_v22  ;;  %2844 = vmatprep.subr.bf16.mxu0 %v3043_v19 }
 0x380   : > { %3093 = vpow.bf16 %v1463_v21  ;;  %1608 = vadd.xlane.f32.xlu0 %v1607_v45  ;;  %1611 = vadd.xlane.f32.xlu1 %v1610_v8  ;;  %v1278_v17 = vpop.xlane.xlu1 %1277  ;;  %v3045_v45 = vld [vmem:[#allocation10 + $0x30] sm:$0xff]  }
 0x381   : > { %v1347_v55 = vsub.f32 %v4530_v30, %v1278_v17  ;;  %v1348_v33 = vsub.f32 %v4531_v31, %v1278_v17  ;;  %2888 = vmatprep.subr.bf16.mxu1 %v3043_v19  ;;  %v4540_v31 = vld [vmem:[#allocation33_spill] sm:$0xff] }
 0x382   : > { %v3088_v40 = vpop.eup %3087  ;;  %2845 = vmatpush3.bf16.msra.mxu0 %v3043_v19  ;;  %2896 = vmatpush3.bf16.msra.mxu1 %v3043_v19 }
 0x383   : > { %v3090_v57 = vpop.eup %3089  ;;  %v1385_v13 = vpack.c.bf16 %v1347_v55, %v1345_v12  ;;  %v1386_v29 = vpack.c.bf16 %v1348_v33, %v1346_v10  ;;  %v1529_v49 = vunpack.c.l.bf16 %v3088_v40  ;;  %v1531_v34 = vunpack.c.h.bf16 %v3088_v40  ;;  %2846 = vmatprep.subr.bf16.mxu0 %v3044_v1  ;;  %2889 = vmatprep.subr.bf16.mxu1 %v3044_v1  ;;  %v3046_v55 = vld [vmem:[#allocation10 + $0x38] sm:$0xff]  }
 0x384   : > { %1889 = vmatprep.mubr.bf16.mxu0 %v3090_v57  ;;  %v1530_v20 = vunpack.c.l.bf16 %v3090_v57  ;;  %v1532_v23 = vunpack.c.h.bf16 %v3090_v57  ;;  %v4541_v57 = vld [vmem:[#allocation34_spill] sm:$0xff] }
 0x385   : > { %v1466_v61 = vmul.bf16 1069105081, %v1385_v13  ;;  %v1469_v32 = vmul.bf16 1069105081, %v1386_v29  ;;  %v4542_v29 = vld [vmem:[#allocation35_spill] sm:$0xff] }
 0x386   : > { %v1281_v62 = vpop.xlane.xlu0 %1280  ;;  %v1613_v63 = vadd.f32 %v1530_v20, %v1529_v49  ;;  %v1616_v43 = vadd.f32 %v1532_v23, %v1531_v34  ;;  %2847 = vmatpush3.bf16.msra.mxu0 %v3044_v1  ;;  %2897 = vmatpush3.bf16.msra.mxu1 %v3044_v1  ;;  %v4543_v34 = vld [vmem:[#allocation36_spill] sm:$0xff] }
 0x387   : > { %3095 = vpow.bf16 %v1466_v61  ;;  %1890 = vmatmul.mubr.bf16.gmra.mrb[72].mxu0 %v3088_v40  ;;  %v1349_v58 = vsub.f32 %v4532_v54, %v1281_v62  ;;  %v1350_v36 = vsub.f32 %v4533_v35, %v1281_v62  ;;  %2848 = vmatprep.subr.bf16.mxu0 %v3045_v45 }
 0x388   : > { %3097 = vpow.bf16 %v1469_v32  ;;  %1614 = vadd.xlane.f32.xlu0 %v1613_v63  ;;  %1617 = vadd.xlane.f32.xlu1 %v1616_v43  ;;  %v1284_v0 = vpop.xlane.xlu1 %1283 }
 0x389   : > { %v1351_v42 = vsub.f32 %v4534_v37, %v1284_v0  ;;  %v1352_v14 = vsub.f32 %v4535_v2, %v1284_v0  ;;  %2890 = vmatprep.subr.bf16.mxu1 %v3045_v45 }
 0x38a   : > { %v3092_v3 = vpop.eup %3091  ;;  %2849 = vmatpush3.bf16.msra.mxu0 %v3045_v45  ;;  %2898 = vmatpush3.bf16.msra.mxu1 %v3045_v45 }
 0x38b   : > { %v3094_v15 = vpop.eup %3093  ;;  %v1387_v16 = vpack.c.bf16 %v1351_v42, %v1349_v58  ;;  %v1388_v18 = vpack.c.bf16 %v1352_v14, %v1350_v36  ;;  %v1533_v38 = vunpack.c.l.bf16 %v3092_v3  ;;  %v1535_v39 = vunpack.c.h.bf16 %v3092_v3  ;;  %2850 = vmatprep.subr.bf16.mxu0 %v3046_v55  ;;  %2891 = vmatprep.subr.bf16.mxu1 %v3046_v55 }
 0x38c   : > { %1897 = vmatprep.mubr.bf16.mxu0 %v3094_v15  ;;  %v1534_v47 = vunpack.c.l.bf16 %v3094_v15  ;;  %v1536_v41 = vunpack.c.h.bf16 %v3094_v15 }
 0x38d   : > { %v1472_v44 = vmul.bf16 1069105081, %v1387_v16  ;;  %v1475_v60 = vmul.bf16 1069105081, %v1388_v18 }
 0x38e   : > { %v1287_v48 = vpop.xlane.xlu0 %1286  ;;  %v1619_v27 = vadd.f32 %v1534_v47, %v1533_v38  ;;  %v1622_v56 = vadd.f32 %v1536_v41, %v1535_v39  ;;  %2851 = vmatpush3.bf16.msra.mxu0 %v3046_v55  ;;  %2899 = vmatpush3.bf16.msra.mxu1 %v3046_v55 }
 0x38f   : > { %3099 = vpow.bf16 %v1472_v44  ;;  %1898 = vmatmul.mubr.bf16.gmra.mrb[76].mxu0 %v3092_v3  ;;  %v1353_v24 = vsub.f32 %v4536_v59, %v1287_v48  ;;  %v1354_v28 = vsub.f32 %v4537_v26, %v1287_v48 }
 0x390   : > { %3101 = vpow.bf16 %v1475_v60  ;;  %1620 = vadd.xlane.f32.xlu0 %v1619_v27  ;;  %1623 = vadd.xlane.f32.xlu1 %v1622_v56  ;;  %v1290_v25 = vpop.xlane.xlu1 %1289 }
 0x391   : > { %v1355_v46 = vsub.f32 %v4538_v6, %v1290_v25  ;;  %v1356_v52 = vsub.f32 %v4539_v51, %v1290_v25 }
 0x392   : > { %v3096_v4 = vpop.eup %3095 }
 0x393   : > { %v3098_v5 = vpop.eup %3097  ;;  %v1389_v7 = vpack.c.bf16 %v1355_v46, %v1353_v24  ;;  %v1390_v9 = vpack.c.bf16 %v1356_v52, %v1354_v28  ;;  %v1537_v21 = vunpack.c.l.bf16 %v3096_v4  ;;  %v1539_v22 = vunpack.c.h.bf16 %v3096_v4 }
 0x394   : > { %1905 = vmatprep.mubr.bf16.mxu0 %v3098_v5  ;;  %v1538_v8 = vunpack.c.l.bf16 %v3098_v5  ;;  %v1540_v11 = vunpack.c.h.bf16 %v3098_v5 }
 0x395   : > { %v1478_v12 = vmul.bf16 1069105081, %v1389_v7  ;;  %v1481_v17 = vmul.bf16 1069105081, %v1390_v9 }
 0x396   : > { %v1293_v53 = vpop.xlane.xlu0 %1292  ;;  %v1625_v10 = vadd.f32 %v1538_v8, %v1537_v21  ;;  %v1628_v30 = vadd.f32 %v1540_v11, %v1539_v22 }
 0x397   : > { %3103 = vpow.bf16 %v1478_v12  ;;  %1906 = vmatmul.mubr.bf16.gmra.mrb[80].mxu0 %v3096_v4  ;;  %v1357_v33 = vsub.f32 %v4540_v31, %v1293_v53  ;;  %v1358_v13 = vsub.f32 %v4541_v57, %v1293_v53 }
 0x398   : > { %3105 = vpow.bf16 %v1481_v17  ;;  %1626 = vadd.xlane.f32.xlu0 %v1625_v10  ;;  %1629 = vadd.xlane.f32.xlu1 %v1628_v30  ;;  %v1296_v40 = vpop.xlane.xlu1 %1295 }
 0x399   : > { %v1359_v49 = vsub.f32 %v4542_v29, %v1296_v40  ;;  %v1360_v20 = vsub.f32 %v4543_v34, %v1296_v40 }
 0x39a   : > { %v3100_v23 = vpop.eup %3099 }
 0x39b   : > { %v3102_v61 = vpop.eup %3101  ;;  %v1391_v32 = vpack.c.bf16 %v1359_v49, %v1357_v33  ;;  %v1392_v62 = vpack.c.bf16 %v1360_v20, %v1358_v13  ;;  %v1541_v63 = vunpack.c.l.bf16 %v3100_v23  ;;  %v1543_v43 = vunpack.c.h.bf16 %v3100_v23 }
 0x39c   : > { %1913 = vmatprep.mubr.bf16.mxu0 %v3102_v61  ;;  %v1542_v50 = vunpack.c.l.bf16 %v3102_v61  ;;  %v1544_v54 = vunpack.c.h.bf16 %v3102_v61 }
 0x39d   : > { %v1484_v58 = vmul.bf16 1069105081, %v1391_v32  ;;  %v1487_v0 = vmul.bf16 1069105081, %v1392_v62 }
 0x39e   : > { %v1631_v35 = vadd.f32 %v1542_v50, %v1541_v63  ;;  %v1634_v36 = vadd.f32 %v1544_v54, %v1543_v43 }
 0x39f   : > { %3107 = vpow.bf16 %v1484_v58  ;;  %1914 = vmatmul.mubr.bf16.gmra.mrb[84].mxu0 %v3100_v23 }
 0x3a0   : > { %3109 = vpow.bf16 %v1487_v0  ;;  %1632 = vadd.xlane.f32.xlu0 %v1631_v35  ;;  %1635 = vadd.xlane.f32.xlu1 %v1634_v36 }
 0x3a2   : > { %v3104_v37 = vpop.eup %3103 }
 0x3a3   : > { %v3106_v42 = vpop.eup %3105  ;;  %v1545_v2 = vunpack.c.l.bf16 %v3104_v37  ;;  %v1547_v14 = vunpack.c.h.bf16 %v3104_v37 }
 0x3a4   : > { %1921 = vmatprep.mubr.bf16.mxu0 %v3106_v42  ;;  %v1546_v3 = vunpack.c.l.bf16 %v3106_v42  ;;  %v1548_v15 = vunpack.c.h.bf16 %v3106_v42 }
 0x3a6   : > { %v1637_v16 = vadd.f32 %v1546_v3, %v1545_v2  ;;  %v1640_v18 = vadd.f32 %v1548_v15, %v1547_v14 }
 0x3a7   : > { %1922 = vmatmul.mubr.bf16.gmra.mrb[88].mxu0 %v3104_v37 }
 0x3a8   : > { %1638 = vadd.xlane.f32.xlu0 %v1637_v16  ;;  %1641 = vadd.xlane.f32.xlu1 %v1640_v18 }
 0x3aa   : > { %v3108_v38 = vpop.eup %3107 }
 0x3ab   : > { %v3110_v39 = vpop.eup %3109  ;;  %v1551_v19 = vunpack.c.h.bf16 %v3108_v38  ;;  %v1549_v47 = vunpack.c.l.bf16 %v3108_v38 }
 0x3ac   : > { %1929 = vmatprep.mubr.bf16.mxu0 %v3110_v39  ;;  %v1552_v41 = vunpack.c.h.bf16 %v3110_v39  ;;  %v1550_v44 = vunpack.c.l.bf16 %v3110_v39 }
 0x3ae   : > { %v1646_v60 = vadd.f32 %v1552_v41, %v1551_v19  ;;  %v1643_v48 = vadd.f32 %v1550_v44, %v1549_v47 }
 0x3af   : > { %1930 = vmatmul.mubr.bf16.gmra.mrb[92].mxu0 %v3108_v38 }
 0x3b0   : > { %1647 = vadd.xlane.f32.xlu1 %v1646_v60  ;;  %1644 = vadd.xlane.f32.xlu0 %v1643_v48 }
 0x3c7   : > { %v1555_v27 = vpop.xlane.xlu0 %1554  ;;  %v1558_v56 = vpop.xlane.xlu1 %1557 }
 0x3c8   : > { %3111 = vrcp.f32 %v1555_v27 }
 0x3c9   : > { %3113 = vrcp.f32 %v1558_v56 }
 0x3cf   : > { %v1561_v1 = vpop.xlane.xlu0 %1560  ;;  %v1564_v59 = vpop.xlane.xlu1 %1563 }
 0x3d0   : > { %3115 = vrcp.f32 %v1561_v1 }
 0x3d1   : > { %3117 = vrcp.f32 %v1564_v59 }
 0x3d2   : > { %v3112_v46 = vpop.eup %3111 }
 0x3d3   : > { %v3114_v52 = vpop.eup %3113 }
 0x3d5   : > { %v1567_v7 = vpop.xlane.xlu0 %1566  ;;  %v1570_v9 = vpop.xlane.xlu1 %1569 }
 0x3d6   : > { %3119 = vrcp.f32 %v1567_v7 }
 0x3d7   : > { %3121 = vrcp.f32 %v1570_v9 }
 0x3da   : > { %v3116_v17 = vpop.eup %3115 }
 0x3db   : > { %v3118_v10 = vpop.eup %3117 }
 0x3dd   : > { %v1573_v31 = vpop.xlane.xlu0 %1572  ;;  %v1576_v33 = vpop.xlane.xlu1 %1575 }
 0x3de   : > { %3123 = vrcp.f32 %v1573_v31 }
 0x3df   : > { %3125 = vrcp.f32 %v1576_v33 }
 0x3e0   : > { %v3120_v20 = vpop.eup %3119 }
 0x3e1   : > { %v3122_v61 = vpop.eup %3121 }
 0x3e5   : > { %v1579_v63 = vpop.xlane.xlu0 %1578  ;;  %v1582_v43 = vpop.xlane.xlu1 %1581 }
 0x3e6   : > { %3127 = vrcp.f32 %v1579_v63 }
 0x3e7   : > { %3129 = vrcp.f32 %v1582_v43 }
 0x3e8   : > { %v3124_v37 = vpop.eup %3123 }
 0x3e9   : > { %v3126_v2 = vpop.eup %3125 }
 0x3ed   : > { %v1585_v15 = vpop.xlane.xlu0 %1584  ;;  %v1588_v16 = vpop.xlane.xlu1 %1587 }
 0x3ee   : > { %3131 = vrcp.f32 %v1585_v15 }
 0x3ef   : > { %3133 = vrcp.f32 %v1588_v16 }
 0x3f0   : > { %v3128_v44 = vpop.eup %3127 }
 0x3f1   : > { %v3130_v48 = vpop.eup %3129 }
 0x3f5   : > { %v1591_v1 = vpop.xlane.xlu0 %1590  ;;  %v1594_v59 = vpop.xlane.xlu1 %1593 }
 0x3f6   : > { %3135 = vrcp.f32 %v1591_v1 }
 0x3f7   : > { %3137 = vrcp.f32 %v1594_v59 }
 0x3fd   : > { %v1597_v9 = vpop.xlane.xlu0 %1596 }
 0x3fe   : > { %3139 = vrcp.f32 %v1597_v9 }
 0x405   : > { %v1603_v33 = vpop.xlane.xlu0 %1602 }
 0x40a   : > { %v2668_v24 = vpop.f32.mrb[32].mxu0 }
 0x40b   : > { %v2669_v25 = vpop.f32.mrb[33].mxu0 }
 0x40c   : > { %v2670_v26 = vadd.f32 %v2669_v25, %v2668_v24  ;;  %v2671_v28 = vpop.f32.mrb[34].mxu0 }
 0x40d   : > { %v2672_v6 = vpop.f32.mrb[35].mxu0  ;;  %v1609_v43 = vpop.xlane.xlu0 %1608 }
 0x40e   : > { %v2673_v51 = vadd.f32 %v2672_v6, %v2671_v28  ;;  %v1970_v4 = vmul.f32 %v3112_v46, %v2670_v26 }
 0x410   : > { %v1971_v5 = vmul.f32 %v3114_v52, %v2673_v51  ;;  %v3132_v51 = vpop.eup %3131 }
 0x412   : > { %v2674_v21 = vpop.f32.mrb[36].mxu0  ;;  %v2002_v22 = vpack.c.bf16 %v1971_v5, %v1970_v4  ;;  %v3134_v4 = vpop.eup %3133 }
 0x413   : > { %v2675_v45 = vpop.f32.mrb[37].mxu0 }
 0x414   : > { %v2676_v8 = vadd.f32 %v2675_v45, %v2674_v21  ;;  %v2677_v11 = vpop.f32.mrb[38].mxu0  ;;  %2852 = vmatprep.mubr.bf16.mxu0 %v2002_v22  ;;  %v1600_v21 = vpop.xlane.xlu1 %1599 }
 0x415   : > { %v2678_v12 = vpop.f32.mrb[39].mxu0  ;;  %3141 = vrcp.f32 %v1600_v21  ;;  %v1615_v16 = vpop.xlane.xlu0 %1614 }
 0x416   : > { %v2679_v53 = vadd.f32 %v2678_v12, %v2677_v11  ;;  %v1972_v30 = vmul.f32 %v3116_v17, %v2676_v8  ;;  %3143 = vrcp.f32 %v1603_v33 }
 0x418   : > { %v1973_v55 = vmul.f32 %v3118_v10, %v2679_v53  ;;  %v3136_v53 = vpop.eup %3135 }
 0x41a   : > { %v2003_v40 = vpack.c.bf16 %v1973_v55, %v1972_v30  ;;  %v2680_v57 = vpop.f32.mrb[40].mxu0  ;;  %v3138_v30 = vpop.eup %3137 }
 0x41b   : > { %v2681_v13 = vpop.f32.mrb[41].mxu0 }
 0x41c   : > { %v2682_v29 = vadd.f32 %v2681_v13, %v2680_v57  ;;  %v2683_v49 = vpop.f32.mrb[42].mxu0  ;;  %2853 = vmatmul.mubr.bf16.vlgmr.msra.gmra.mrb[96].mxu0 %v2003_v40  ;;  %v1606_v40 = vpop.xlane.xlu1 %1605 }
 0x41d   : > { %v2684_v34 = vpop.f32.mrb[43].mxu0  ;;  %3145 = vrcp.f32 %v1606_v40  ;;  %v1621_v59 = vpop.xlane.xlu0 %1620 }
 0x41e   : > { %v2685_v23 = vadd.f32 %v2684_v34, %v2683_v49  ;;  %v1974_v32 = vmul.f32 %v3120_v20, %v2682_v29  ;;  %3147 = vrcp.f32 %v1609_v43 }
 0x420   : > { %v1975_v62 = vmul.f32 %v3122_v61, %v2685_v23  ;;  %v3140_v23 = vpop.eup %3139 }
 0x422   : > { %v2686_v50 = vpop.f32.mrb[44].mxu0  ;;  %v2004_v54 = vpack.c.bf16 %v1975_v62, %v1974_v32  ;;  %v3142_v32 = vpop.eup %3141 }
 0x423   : > { %v2687_v58 = vpop.f32.mrb[45].mxu0 }
 0x424   : > { %v2688_v0 = vadd.f32 %v2687_v58, %v2686_v50  ;;  %v2689_v35 = vpop.f32.mrb[46].mxu0  ;;  %2856 = vmatprep.mubr.bf16.mxu0 %v2004_v54  ;;  %v1612_v50 = vpop.xlane.xlu1 %1611 }
 0x425   : > { %v2690_v36 = vpop.f32.mrb[47].mxu0  ;;  %3149 = vrcp.f32 %v1612_v50  ;;  %v1627_v21 = vpop.xlane.xlu0 %1626 }
 0x426   : > { %v2691_v42 = vadd.f32 %v2690_v36, %v2689_v35  ;;  %v1976_v14 = vmul.f32 %v3124_v37, %v2688_v0  ;;  %3151 = vrcp.f32 %v1615_v16 }
 0x428   : > { %v1977_v3 = vmul.f32 %v3126_v2, %v2691_v42  ;;  %v3144_v42 = vpop.eup %3143 }
 0x42a   : > { %v2692_v18 = vpop.f32.mrb[48].mxu0  ;;  %v2005_v38 = vpack.c.bf16 %v1977_v3, %v1976_v14  ;;  %v3146_v14 = vpop.eup %3145 }
 0x42b   : > { %v2693_v39 = vpop.f32.mrb[49].mxu0 }
 0x42c   : > { %v2694_v19 = vadd.f32 %v2693_v39, %v2692_v18  ;;  %v2695_v47 = vpop.f32.mrb[50].mxu0  ;;  %2857 = vmatmul.mubr.bf16.gmra.mrb[100].mxu0 %v2005_v38  ;;  %v1618_v18 = vpop.xlane.xlu1 %1617 }
 0x42d   : > { %v2696_v41 = vpop.f32.mrb[51].mxu0  ;;  %3153 = vrcp.f32 %v1618_v18  ;;  %v1633_v40 = vpop.xlane.xlu0 %1632 }
 0x42e   : > { %v2697_v60 = vadd.f32 %v2696_v41, %v2695_v47  ;;  %v1978_v27 = vmul.f32 %v3128_v44, %v2694_v19  ;;  %3155 = vrcp.f32 %v1621_v59 }
 0x430   : > { %v1979_v56 = vmul.f32 %v3130_v48, %v2697_v60  ;;  %v3148_v60 = vpop.eup %3147 }
 0x432   : > { %v2698_v24 = vpop.f32.mrb[52].mxu0  ;;  %v2006_v25 = vpack.c.bf16 %v1979_v56, %v1978_v27  ;;  %v3150_v27 = vpop.eup %3149 }
 0x433   : > { %v2699_v26 = vpop.f32.mrb[53].mxu0 }
 0x434   : > { %v2700_v28 = vadd.f32 %v2699_v26, %v2698_v24  ;;  %v2701_v6 = vpop.f32.mrb[54].mxu0  ;;  %2860 = vmatprep.mubr.bf16.mxu1 %v2006_v25  ;;  %v1624_v24 = vpop.xlane.xlu1 %1623 }
 0x435   : > { %v2702_v46 = vpop.f32.mrb[55].mxu0  ;;  %3157 = vrcp.f32 %v1624_v24  ;;  %v1639_v50 = vpop.xlane.xlu0 %1638 }
 0x436   : > { %v2703_v52 = vadd.f32 %v2702_v46, %v2701_v6  ;;  %v1980_v5 = vmul.f32 %v3132_v51, %v2700_v28  ;;  %3159 = vrcp.f32 %v1627_v21  ;;  %v4269_v21 = vld [vmem:[%s4544_s21] ss:$0 sm:$0xff] }
 0x438   : > { %v1981_v7 = vmul.f32 %v3134_v4, %v2703_v52  ;;  %v3152_v52 = vpop.eup %3151 }
 0x43a   : > { %v2007_v22 = vpack.c.bf16 %v1981_v7, %v1980_v5  ;;  %v2704_v45 = vpop.f32.mrb[56].mxu0  ;;  %v3154_v5 = vpop.eup %3153 }
 0x43b   : > { %v2705_v8 = vpop.f32.mrb[57].mxu0 }
 0x43c   : > { %v2706_v11 = vadd.f32 %v2705_v8, %v2704_v45  ;;  %v2707_v12 = vpop.f32.mrb[58].mxu0  ;;  %2861 = vmatmul.mubr.bf16.vlgmr.msra.gmra.mrb[64].mxu1 %v2007_v22  ;;  %v1630_v22 = vpop.xlane.xlu1 %1629 }
 0x43d   : > { %v2708_v17 = vpop.f32.mrb[59].mxu0  ;;  %3161 = vrcp.f32 %v1630_v22  ;;  %v1645_v18 = vpop.xlane.xlu0 %1644 }
 0x43e   : > { %v2709_v10 = vadd.f32 %v2708_v17, %v2707_v12  ;;  %v1982_v55 = vmul.f32 %v3136_v53, %v2706_v11  ;;  %3163 = vrcp.f32 %v1633_v40  ;;  %v3177_v40 = vld [vmem:[%s3786_s16 + $0x18] sm:$0xff] }
 0x440   : > { %v1983_v31 = vmul.f32 %v3138_v30, %v2709_v10  ;;  %v3156_v10 = vpop.eup %3155 }
 0x442   : > { %v2710_v57 = vpop.f32.mrb[60].mxu0  ;;  %v2008_v13 = vpack.c.bf16 %v1983_v31, %v1982_v55  ;;  %v3158_v55 = vpop.eup %3157 }
 0x443   : > { %v2711_v29 = vpop.f32.mrb[61].mxu0 }
 0x444   : > { %v2712_v49 = vadd.f32 %v2711_v29, %v2710_v57  ;;  %v2713_v34 = vpop.f32.mrb[62].mxu0  ;;  %2864 = vmatprep.mubr.bf16.mxu1 %v2008_v13  ;;  %v1636_v57 = vpop.xlane.xlu1 %1635 }
 0x445   : > { %v2714_v20 = vpop.f32.mrb[63].mxu0  ;;  %3165 = vrcp.f32 %v1636_v57 }
 0x446   : > { %v2715_v61 = vadd.f32 %v2714_v20, %v2713_v34  ;;  %v1984_v62 = vmul.f32 %v3140_v23, %v2712_v49  ;;  %3167 = vrcp.f32 %v1639_v50  ;;  %v3180_v50 = vld [vmem:[%s3786_s16 + $0x20] sm:$0xff] }
 0x448   : > { %v1985_v63 = vmul.f32 %v3142_v32, %v2715_v61  ;;  %v3160_v61 = vpop.eup %3159 }
 0x44a   : > { %v2716_v54 = vpop.f32.mrb[64].mxu0  ;;  %v2009_v58 = vpack.c.bf16 %v1985_v63, %v1984_v62  ;;  %v3162_v62 = vpop.eup %3161 }
 0x44b   : > { %v2717_v0 = vpop.f32.mrb[65].mxu0 }
 0x44c   : > { %v2718_v35 = vadd.f32 %v2717_v0, %v2716_v54  ;;  %v2719_v36 = vpop.f32.mrb[66].mxu0  ;;  %2865 = vmatmul.mubr.bf16.gmra.mrb[68].mxu1 %v2009_v58  ;;  %v1642_v54 = vpop.xlane.xlu1 %1641 }
 0x44d   : > { %v2720_v37 = vpop.f32.mrb[67].mxu0  ;;  %3169 = vrcp.f32 %v1642_v54 }
 0x44e   : > { %v2721_v2 = vadd.f32 %v2720_v37, %v2719_v36  ;;  %v1986_v3 = vmul.f32 %v3144_v42, %v2718_v35  ;;  %3171 = vrcp.f32 %v1645_v18 }
 0x450   : > { %v1987_v15 = vmul.f32 %v3146_v14, %v2721_v2  ;;  %v3164_v2 = vpop.eup %3163 }
 0x452   : > { %v2722_v38 = vpop.f32.mrb[68].mxu0  ;;  %v2010_v39 = vpack.c.bf16 %v1987_v15, %v1986_v3  ;;  %v3166_v3 = vpop.eup %3165 }
 0x453   : > { %v2723_v19 = vpop.f32.mrb[69].mxu0 }
 0x454   : > { %v2724_v47 = vadd.f32 %v2723_v19, %v2722_v38  ;;  %v2725_v41 = vpop.f32.mrb[70].mxu0  ;;  %2868 = vmatprep.mubr.bf16.mxu1 %v2010_v39  ;;  %v1648_v38 = vpop.xlane.xlu1 %1647 }
 0x455   : > { %v2726_v44 = vpop.f32.mrb[71].mxu0  ;;  %3173 = vrcp.f32 %v1648_v38 }
 0x456   : > { %v2727_v48 = vadd.f32 %v2726_v44, %v2725_v41  ;;  %v1988_v56 = vmul.f32 %v3148_v60, %v2724_v47 }
 0x458   : > { %v1989_v1 = vmul.f32 %v3150_v27, %v2727_v48  ;;  %v3168_v48 = vpop.eup %3167 }
 0x45a   : > { %v2728_v25 = vpop.f32.mrb[72].mxu0  ;;  %v2011_v26 = vpack.c.bf16 %v1989_v1, %v1988_v56  ;;  %v3170_v56 = vpop.eup %3169 }
 0x45b   : > { %v2729_v28 = vpop.f32.mrb[73].mxu0 }
 0x45c   : > { %v2730_v6 = vadd.f32 %v2729_v28, %v2728_v25  ;;  %v2731_v46 = vpop.f32.mrb[74].mxu0  ;;  %2869 = vmatmul.mubr.bf16.gmra.mrb[72].mxu1 %v2011_v26 }
 0x45d   : > { %v2732_v51 = vpop.f32.mrb[75].mxu0 }
 0x45e   : > { %v2733_v4 = vadd.f32 %v2732_v51, %v2731_v46  ;;  %v1990_v7 = vmul.f32 %v3152_v52, %v2730_v6  ;;  %v3172_v51 = vpop.eup %3171 }
 0x460   : > { %v1991_v9 = vmul.f32 %v3154_v5, %v2733_v4  ;;  %v3174_v4 = vpop.eup %3173 }
 0x462   : > { %v2734_v45 = vpop.f32.mrb[76].mxu0  ;;  %v2012_v8 = vpack.c.bf16 %v1991_v9, %v1990_v7 }
 0x463   : > { %v2735_v11 = vpop.f32.mrb[77].mxu0 }
 0x464   : > { %v2736_v12 = vadd.f32 %v2735_v11, %v2734_v45  ;;  %v2737_v17 = vpop.f32.mrb[78].mxu0  ;;  %2872 = vmatprep.mubr.bf16.mxu1 %v2012_v8 }
 0x465   : > { %v2738_v53 = vpop.f32.mrb[79].mxu0 }
 0x466   : > { %v2739_v30 = vadd.f32 %v2738_v53, %v2737_v17  ;;  %v1992_v31 = vmul.f32 %v3156_v10, %v2736_v12  ;;  %v3175_v17 = vld [vmem:[%s3786_s16 + $0x10] sm:$0xff] }
 0x468   : > { %v1993_v33 = vmul.f32 %v3158_v55, %v2739_v30  ;;  %v3176_v55 = vld [vmem:[%s3786_s16] sm:$0xff] }
 0x46a   : > { %v2740_v13 = vpop.f32.mrb[80].mxu0  ;;  %v2013_v29 = vpack.c.bf16 %v1993_v33, %v1992_v31 }
 0x46b   : > { %v2741_v49 = vpop.f32.mrb[81].mxu0 }
 0x46c   : > { %v2742_v34 = vadd.f32 %v2741_v49, %v2740_v13  ;;  %v2743_v20 = vpop.f32.mrb[82].mxu0  ;;  %2873 = vmatmul.mubr.bf16.gmra.mrb[76].mxu1 %v2013_v29  ;;  %v3178_v13 = vld [vmem:[%s3786_s16 + $0x8] sm:$0xff] }
 0x46d   : > { %v2744_v23 = vpop.f32.mrb[83].mxu0 }
 0x46e   : > { %v2745_v32 = vadd.f32 %v2744_v23, %v2743_v20  ;;  %v1994_v63 = vmul.f32 %v3160_v61, %v2742_v34 }
 0x470   : > { %v1995_v43 = vmul.f32 %v3162_v62, %v2745_v32  ;;  %v3179_v32 = vld [vmem:[%s3786_s16 + $0x30] sm:$0xff] }
 0x472   : > { %v2746_v58 = vpop.f32.mrb[84].mxu0  ;;  %v2014_v0 = vpack.c.bf16 %v1995_v43, %v1994_v63 }
 0x473   : > { %v2747_v35 = vpop.f32.mrb[85].mxu0 }
 0x474   : > { %v2748_v36 = vadd.f32 %v2747_v35, %v2746_v58  ;;  %v2749_v37 = vpop.f32.mrb[86].mxu0  ;;  %2876 = vmatprep.mubr.bf16.mxu1 %v2014_v0  ;;  %v3181_v0 = vld [vmem:[%s3786_s16 + $0x38] sm:$0xff] }
 0x475   : > { %v2750_v42 = vpop.f32.mrb[87].mxu0 }
 0x476   : > { %v2751_v14 = vadd.f32 %v2750_v42, %v2749_v37  ;;  %v1996_v15 = vmul.f32 %v3164_v2, %v2748_v36  ;;  %v3182_v36 = vld [vmem:[%s3786_s16 + $0x28] sm:$0xff] }
 0x478   : > { %v1997_v16 = vmul.f32 %v3166_v3, %v2751_v14 }
 0x47a   : > { %v2752_v39 = vpop.f32.mrb[88].mxu0  ;;  %v2015_v19 = vpack.c.bf16 %v1997_v16, %v1996_v15  ;;  %v3183_v16 = vld [vmem:[%s3786_s16 + $0x50] sm:$0xff] }
 0x47b   : > { %v2753_v47 = vpop.f32.mrb[89].mxu0 }
 0x47c   : > { %v2754_v41 = vadd.f32 %v2753_v47, %v2752_v39  ;;  %v2755_v44 = vpop.f32.mrb[90].mxu0  ;;  %2877 = vmatmul.mubr.bf16.gmra.mrb[80].mxu1 %v2015_v19  ;;  %v3184_v19 = vld [vmem:[%s3786_s16 + $0x40] sm:$0xff] }
 0x47d   : > { %v2756_v60 = vpop.f32.mrb[91].mxu0 }
 0x47e   : > { %v2757_v27 = vadd.f32 %v2756_v60, %v2755_v44  ;;  %v1998_v1 = vmul.f32 %v3168_v48, %v2754_v41  ;;  %v3185_v44 = vld [vmem:[%s3786_s16 + $0x58] sm:$0xff]  ;;  %v3186_v48 = vld [vmem:[%s3786_s16 + $0x48] sm:$0xff] }
 0x480   : > { %v1999_v59 = vmul.f32 %v3170_v56, %v2757_v27 }
 0x482   : > { %v2758_v24 = vpop.f32.mrb[92].mxu0  ;;  %v2016_v25 = vpack.c.bf16 %v1999_v59, %v1998_v1 }
 0x483   : > { %v2759_v26 = vpop.f32.mrb[93].mxu0 }
 0x484   : > { %v2760_v28 = vadd.f32 %v2759_v26, %v2758_v24  ;;  %v2761_v6 = vpop.f32.mrb[94].mxu0  ;;  %2880 = vmatprep.mubr.bf16.mxu1 %v2016_v25  ;;  %v3187_v26 = vld [vmem:[%s3786_s16 + $0x70] sm:$0xff] }
 0x485   : > { %v2762_v46 = vpop.f32.mrb[95].mxu0 }
 0x486   : > { %v2763_v52 = vadd.f32 %v2762_v46, %v2761_v6  ;;  %v2000_v5 = vmul.f32 %v3172_v51, %v2760_v28  ;;  %v3188_v51 = vld [vmem:[%s3786_s16 + $0x60] sm:$0xff] }
 0x488   : > { %v2001_v7 = vmul.f32 %v3174_v4, %v2763_v52 }
 0x48a   : > { %v2017_v9 = vpack.c.bf16 %v2001_v7, %v2000_v5  ;;  %v3189_v5 = vld [vmem:[%s3786_s16 + $0x78] sm:$0xff] }
 0x48c   : > { %2881 = vmatmul.mubr.bf16.gmra.mrb[84].mxu1 %v2017_v9  ;;  %v3190_v9 = vld [vmem:[%s3786_s16 + $0x68] sm:$0xff] }
 0x4ef   : > { %v2854_v22 = vpop.f32.mrb[96].mxu0 }
 0x4f0   : > { %v2132_v45 = vadd.f32 %v2854_v22, %v4269_v21  ;;  %v2123_v8 = vpop.f32.mrb[97].mxu0 }
 0x4f1   : > { %v2124_v11 = vadd.f32 %v4269_v21, %v2123_v8  ;;  %v2855_v12 = vpop.f32.mrb[98].mxu0 }
 0x4f2   : > { %v2252_v53 = vadd.f32 %v3175_v17, %v2132_v45  ;;  %v2135_v10 = vadd.f32 %v2855_v12, %v4269_v21  ;;  %v2126_v30 = vpop.f32.mrb[99].mxu0 }
 0x4f3   : > { %v2250_v31 = vadd.f32 %v3176_v55, %v2124_v11  ;;  %v2127_v33 = vadd.f32 %v4269_v21, %v2126_v30 }
 0x4f4   : > { %2284 = vst [vmem:[%s4279_s9 + $0x10] sm:$0xff] %v2252_v53  ;;  %v2253_v57 = vadd.f32 %v3177_v40, %v2135_v10  ;;  %v3191_v53 = vld [vmem:[%s3786_s16 + $0x90] sm:$0xff] }
 0x4f5   : > { %2282 = vst [vmem:[%s4279_s9] sm:$0xff] %v2250_v31  ;;  %v2251_v29 = vadd.f32 %v3178_v13, %v2127_v33  ;;  %v3192_v31 = vld [vmem:[%s3786_s16 + $0x80] sm:$0xff] }
 0x4f6   : > { %2285 = vst [vmem:[%s4279_s9 + $0x18] sm:$0xff] %v2253_v57  ;;  %v3193_v57 = vld [vmem:[%s3786_s16 + $0x98] sm:$0xff] }
 0x4f7   : > { %2283 = vst [vmem:[%s4279_s9 + $0x8] sm:$0xff] %v2251_v29  ;;  %v3194_v29 = vld [vmem:[%s3786_s16 + $0x88] sm:$0xff] }
 0x4ff   : > { %v2858_v49 = vpop.f32.mrb[100].mxu0 }
 0x500   : > { %v2148_v34 = vadd.f32 %v2858_v49, %v4269_v21  ;;  %v2139_v20 = vpop.f32.mrb[101].mxu0 }
 0x501   : > { %v2140_v23 = vadd.f32 %v4269_v21, %v2139_v20  ;;  %v2859_v61 = vpop.f32.mrb[102].mxu0 }
 0x502   : > { %v2256_v62 = vadd.f32 %v3179_v32, %v2148_v34  ;;  %v2151_v63 = vadd.f32 %v2859_v61, %v4269_v21  ;;  %v2142_v43 = vpop.f32.mrb[103].mxu0 }
 0x503   : > { %v2254_v54 = vadd.f32 %v3180_v50, %v2140_v23  ;;  %v2143_v58 = vadd.f32 %v4269_v21, %v2142_v43 }
 0x504   : > { %2288 = vst [vmem:[%s4279_s9 + $0x30] sm:$0xff] %v2256_v62  ;;  %v2257_v35 = vadd.f32 %v3181_v0, %v2151_v63  ;;  %v3195_v62 = vld [vmem:[%s3786_s16 + $0xb0] sm:$0xff] }
 0x505   : > { %2286 = vst [vmem:[%s4279_s9 + $0x20] sm:$0xff] %v2254_v54  ;;  %v2255_v37 = vadd.f32 %v3182_v36, %v2143_v58  ;;  %v3196_v54 = vld [vmem:[%s3786_s16 + $0xa0] sm:$0xff] }
 0x506   : > { %2289 = vst [vmem:[%s4279_s9 + $0x38] sm:$0xff] %v2257_v35  ;;  %v3197_v35 = vld [vmem:[%s3786_s16 + $0xb8] sm:$0xff] }
 0x507   : > { %2287 = vst [vmem:[%s4279_s9 + $0x28] sm:$0xff] %v2255_v37  ;;  %v3198_v37 = vld [vmem:[%s3786_s16 + $0xa8] sm:$0xff] }
 0x50f   : > { %v2862_v42 = vpop.f32.mrb[64].mxu1 }
 0x510   : > { %v2164_v2 = vadd.f32 %v2862_v42, %v4269_v21  ;;  %v2155_v14 = vpop.f32.mrb[65].mxu1 }
 0x511   : > { %v2156_v3 = vadd.f32 %v4269_v21, %v2155_v14  ;;  %v2863_v15 = vpop.f32.mrb[66].mxu1 }
 0x512   : > { %v2260_v18 = vadd.f32 %v3183_v16, %v2164_v2  ;;  %v2167_v38 = vadd.f32 %v2863_v15, %v4269_v21  ;;  %v2158_v39 = vpop.f32.mrb[67].mxu1 }
 0x513   : > { %v2258_v47 = vadd.f32 %v3184_v19, %v2156_v3  ;;  %v2159_v41 = vadd.f32 %v4269_v21, %v2158_v39 }
 0x514   : > { %2292 = vst [vmem:[%s4279_s9 + $0x50] sm:$0xff] %v2260_v18  ;;  %v2261_v60 = vadd.f32 %v3185_v44, %v2167_v38  ;;  %v3199_v18 = vld [vmem:[%s3786_s16 + $0xd0] sm:$0xff] }
 0x515   : > { %2290 = vst [vmem:[%s4279_s9 + $0x40] sm:$0xff] %v2258_v47  ;;  %v2259_v27 = vadd.f32 %v3186_v48, %v2159_v41  ;;  %v3200_v47 = vld [vmem:[%s3786_s16 + $0xc0] sm:$0xff] }
 0x516   : > { %2293 = vst [vmem:[%s4279_s9 + $0x58] sm:$0xff] %v2261_v60  ;;  %v3201_v60 = vld [vmem:[%s3786_s16 + $0xd8] sm:$0xff] }
 0x517   : > { %2291 = vst [vmem:[%s4279_s9 + $0x48] sm:$0xff] %v2259_v27  ;;  %v3202_v27 = vld [vmem:[%s3786_s16 + $0xc8] sm:$0xff] }
 0x51f   : > { %v2866_v56 = vpop.f32.mrb[68].mxu1 }
 0x520   : > { %v2180_v1 = vadd.f32 %v2866_v56, %v4269_v21  ;;  %v2171_v59 = vpop.f32.mrb[69].mxu1 }
 0x521   : > { %v2172_v24 = vadd.f32 %v4269_v21, %v2171_v59  ;;  %v2867_v25 = vpop.f32.mrb[70].mxu1 }
 0x522   : > { %v2264_v28 = vadd.f32 %v3187_v26, %v2180_v1  ;;  %v2183_v6 = vadd.f32 %v2867_v25, %v4269_v21  ;;  %v2174_v46 = vpop.f32.mrb[71].mxu1 }
 0x523   : > { %v2262_v52 = vadd.f32 %v3188_v51, %v2172_v24  ;;  %v2175_v4 = vadd.f32 %v4269_v21, %v2174_v46 }
 0x524   : > { %2296 = vst [vmem:[%s4279_s9 + $0x70] sm:$0xff] %v2264_v28  ;;  %v2265_v7 = vadd.f32 %v3189_v5, %v2183_v6  ;;  %v3203_v28 = vld [vmem:[%s3786_s16 + $0xf0] sm:$0xff] }
 0x525   : > { %2294 = vst [vmem:[%s4279_s9 + $0x60] sm:$0xff] %v2262_v52  ;;  %v2263_v22 = vadd.f32 %v3190_v9, %v2175_v4  ;;  %v3204_v52 = vld [vmem:[%s3786_s16 + $0xe0] sm:$0xff] }
 0x526   : > { %2297 = vst [vmem:[%s4279_s9 + $0x78] sm:$0xff] %v2265_v7  ;;  %v3205_v7 = vld [vmem:[%s3786_s16 + $0xf8] sm:$0xff] }
 0x527   : > { %2295 = vst [vmem:[%s4279_s9 + $0x68] sm:$0xff] %v2263_v22  ;;  %v3206_v22 = vld [vmem:[%s3786_s16 + $0xe8] sm:$0xff] }
 0x52f   : > { %v2870_v45 = vpop.f32.mrb[72].mxu1 }
 0x530   : > { %v2196_v8 = vadd.f32 %v2870_v45, %v4269_v21  ;;  %v2187_v11 = vpop.f32.mrb[73].mxu1 }
 0x531   : > { %v2188_v12 = vadd.f32 %v4269_v21, %v2187_v11  ;;  %v2871_v17 = vpop.f32.mrb[74].mxu1 }
 0x532   : > { %v2268_v10 = vadd.f32 %v3191_v53, %v2196_v8  ;;  %v2199_v30 = vadd.f32 %v2871_v17, %v4269_v21  ;;  %v2190_v55 = vpop.f32.mrb[75].mxu1 }
 0x533   : > { %v2266_v33 = vadd.f32 %v3192_v31, %v2188_v12  ;;  %v2191_v40 = vadd.f32 %v4269_v21, %v2190_v55 }
 0x534   : > { %2300 = vst [vmem:[%s4279_s9 + $0x90] sm:$0xff] %v2268_v10  ;;  %v2269_v13 = vadd.f32 %v3193_v57, %v2199_v30 }
 0x535   : > { %2298 = vst [vmem:[%s4279_s9 + $0x80] sm:$0xff] %v2266_v33  ;;  %v2267_v49 = vadd.f32 %v3194_v29, %v2191_v40 }
 0x536   : > { %2301 = vst [vmem:[%s4279_s9 + $0x98] sm:$0xff] %v2269_v13 }
 0x537   : > { %2299 = vst [vmem:[%s4279_s9 + $0x88] sm:$0xff] %v2267_v49 }
 0x53f   : > { %v2874_v34 = vpop.f32.mrb[76].mxu1 }
 0x540   : > { %v2212_v20 = vadd.f32 %v2874_v34, %v4269_v21  ;;  %v2203_v23 = vpop.f32.mrb[77].mxu1 }
 0x541   : > { %v2204_v61 = vadd.f32 %v4269_v21, %v2203_v23  ;;  %v2875_v32 = vpop.f32.mrb[78].mxu1 }
 0x542   : > { %v2272_v63 = vadd.f32 %v3195_v62, %v2212_v20  ;;  %v2215_v43 = vadd.f32 %v2875_v32, %v4269_v21  ;;  %v2206_v50 = vpop.f32.mrb[79].mxu1 }
 0x543   : > { %v2270_v58 = vadd.f32 %v3196_v54, %v2204_v61  ;;  %v2207_v0 = vadd.f32 %v4269_v21, %v2206_v50 }
 0x544   : > { %2304 = vst [vmem:[%s4279_s9 + $0xb0] sm:$0xff] %v2272_v63  ;;  %v2273_v36 = vadd.f32 %v3197_v35, %v2215_v43 }
 0x545   : > { %2302 = vst [vmem:[%s4279_s9 + $0xa0] sm:$0xff] %v2270_v58  ;;  %v2271_v42 = vadd.f32 %v3198_v37, %v2207_v0 }
 0x546   : > { %2305 = vst [vmem:[%s4279_s9 + $0xb8] sm:$0xff] %v2273_v36 }
 0x547   : > { %2303 = vst [vmem:[%s4279_s9 + $0xa8] sm:$0xff] %v2271_v42 }
 0x54f   : > { %v2878_v2 = vpop.f32.mrb[80].mxu1 }
 0x550   : > { %v2228_v14 = vadd.f32 %v2878_v2, %v4269_v21  ;;  %v2219_v3 = vpop.f32.mrb[81].mxu1 }
 0x551   : > { %v2220_v15 = vadd.f32 %v4269_v21, %v2219_v3  ;;  %v2879_v16 = vpop.f32.mrb[82].mxu1 }
 0x552   : > { %v2276_v38 = vadd.f32 %v3199_v18, %v2228_v14  ;;  %v2231_v39 = vadd.f32 %v2879_v16, %v4269_v21  ;;  %v2222_v19 = vpop.f32.mrb[83].mxu1 }
 0x553   : > { %v2274_v41 = vadd.f32 %v3200_v47, %v2220_v15  ;;  %v2223_v44 = vadd.f32 %v4269_v21, %v2222_v19 }
 0x554   : > { %2308 = vst [vmem:[%s4279_s9 + $0xd0] sm:$0xff] %v2276_v38  ;;  %v2277_v48 = vadd.f32 %v3201_v60, %v2231_v39 }
 0x555   : > { %2306 = vst [vmem:[%s4279_s9 + $0xc0] sm:$0xff] %v2274_v41  ;;  %v2275_v56 = vadd.f32 %v3202_v27, %v2223_v44 }
 0x556   : > { %2309 = vst [vmem:[%s4279_s9 + $0xd8] sm:$0xff] %v2277_v48 }
 0x557   : > { %2307 = vst [vmem:[%s4279_s9 + $0xc8] sm:$0xff] %v2275_v56 }
 0x55f   : > { %v2882_v1 = vpop.f32.mrb[84].mxu1 }
 0x560   : > { %v2244_v59 = vadd.f32 %v2882_v1, %v4269_v21  ;;  %v2235_v24 = vpop.f32.mrb[85].mxu1 }
 0x561   : > { %v2236_v25 = vadd.f32 %v4269_v21, %v2235_v24  ;;  %v2883_v26 = vpop.f32.mrb[86].mxu1 }
 0x562   : > { %v2280_v6 = vadd.f32 %v3203_v28, %v2244_v59  ;;  %v2247_v46 = vadd.f32 %v2883_v26, %v4269_v21  ;;  %v2238_v51 = vpop.f32.mrb[87].mxu1 }
 0x563   : > { %v2278_v4 = vadd.f32 %v3204_v52, %v2236_v25  ;;  %v2239_v5 = vadd.f32 %v4269_v21, %v2238_v51 }
 0x564   : > { %2312 = vst [vmem:[%s4279_s9 + $0xf0] sm:$0xff] %v2280_v6  ;;  %v2281_v9 = vadd.f32 %v3205_v7, %v2247_v46 }
 0x565   : > { %2310 = vst [vmem:[%s4279_s9 + $0xe0] sm:$0xff] %v2278_v4  ;;  %v2279_v45 = vadd.f32 %v3206_v22, %v2239_v5 }
 0x566   : > { %2313 = vst [vmem:[%s4279_s9 + $0xf8] sm:$0xff] %v2281_v9 }
 0x567   : > { %2311 = vst [vmem:[%s4279_s9 + $0xe8] sm:$0xff] %v2279_v45 }
 0x568   : > { %3366 = shalt.err (!%p3363_p8)
}
 0x569   : > { %s3367_s16 = scalar_lea.hbm %s4372_s29, 4096  ;;  %s3371_s23 = scalar_lea.hbm %s4547_s20, 8192 }
 0x56a   : > { %p3368_p5 = scmp.ne.s32.totalorder %s4372_s29, %s3367_s16  ;;  %p3372_p10 = scmp.lt.u32.totalorder %s4372_s29, %s4547_s20 }
 0x56b   : > { %p3373_p12 = scmp.lt.u32.totalorder %s3371_s23, %s3367_s16  ;;  %p3375_p4 = scmp.lt.u32.totalorder %s3367_s16, %s4372_s29 }
 0x56c   : > { %p3369_p9 = pnand %p3368_p5, %p4548_p0 }
 0x56d   : > { %p3374_p1 = por %p3373_p12, %p3372_p10 }
 0x56e   : > { %p3370_p3 = pneg %p3369_p9 }
 0x56f   : > { %p3376_p7 = por %p3375_p4, %p3374_p1 }
 0x571   : > { %p3377_p2 = pnand %p3376_p7, %p3370_p3 }
 0x573   : > { %3380 = shalt.err (!%p3377_p2)
}
 0x574   : > { %s3455_s18 = smov 128   ;;  %s3456_s17 = smov 8  }
 0x575   : > { %2914 = dma.vmem_to_hbm [thread:$0]  (%p4548_p0), %s4374_s22, 4096, %s4372_s29, %s2315_s19, %s3455_s18, %s3455_s18, %s3456_s17  }
 0x576 PF: > { %s4549_s21 = sld [smem:[#allocation16_spill]]  ;;  %s4550_s9 = sld [smem:[#allocation19_spill]] }
 0x577   : > { %p4552_p6 = scmp.ge.s32.totalorder %s3443_s14, 2 }
 0x57c   : > { %s2345_s28 = sand.u32 1, %s4549_s21   ;;  %p4551_p13 = scmp.ne.s32.totalorder %s4550_s9, 0 }
 0x57d   : > { %s2346_s6 = scalar_lea.sflag [#allocation4], %s2345_s28 }
 0x57e   : > { %p2934_p11 = pnand %p4552_p6, %p4551_p13 }
 0x580   : > { %3418 = dma.done.wait (!%p2934_p11), %s2346_s6, 4096  }
 0x581   : > { %3420 = vsyncadd (!%p2934_p11), %s2346_s6, 4294963200  ;;  %s29_s14 = sadd.s32 1, %s3443_s14   ;;  %s4553_s5 = sld [smem:[#allocation17_spill]] }
 0x582   : > { %p26_p8 = scmp.ge.s32.totalorder %s29_s14, 4   ;;  %s4554_s11 = sld [smem:[#allocation21_spill]] }
 0x583   : > { %s4555_s24 = sld [smem:[#allocation20_spill]]  ;;  %s4556_s30 = smov %s3427_s10 }
 0x584   : > { %s4558_s12 = smov %s3439_s13  ;;  %28 = sbr.rel (!%p26_p8) target bundleno = 16 (0x10), region = 139 }
 0x587   : > { %s4557_s10 = smov %s4553_s5 }
 0x589   : > { %s4559_s13 = smov %s4555_s24 }
 0x58b   :  { %2351 = vsyncpa [#allocation3], 1 }
 0x58c   :  { %2353 = vsyncpa [#allocation3 + $0x1], 1 }
 0x58d   :  { %2354 = vsyncpa [#allocation6], 1 }
 0x58e   :  { %2356 = vsyncpa [#allocation6 + $0x1], 1 }
 0x58f   :  { %2357 = vsyncpa [#allocation9], 1 }
 0x590   :  { %2358 = vsyncpa [#allocation4], 1 }
 0x591   :  { %2360 = vsyncpa [#allocation4 + $0x1], 1 }

</bundles_post_ra>
